<compile_context>
chip_gen: v5e
topology: v5e:2x2
jax: 0.10.0
libtpu: 0.0.40
codegen_flags: <defaults>
</compile_context>

<pallas_src>
import functools

import jax
import jax.numpy as jnp
import numpy as np
from jax import lax
from jax.experimental import pallas as pl
from jax.experimental.pallas import tpu as pltpu


def _sam_kernel(hm_ref, wproj_ref, bproj_ref, wgate_ref, bgate_ref,
                new_h_ref, new_m_ref, *, hd, cp, bblk):
    f32 = jnp.float32
    bf16 = jnp.bfloat16
    n = hm_ref.shape[-1]
    c_out = new_h_ref.shape[1]

    # Hoist all loop-invariant weight/bias loads once (JAX does not CSE repeated
    # ref reads / broadcasts across an unrolled batch loop).
    w_proj = wproj_ref[...]          # (3*hd + 2*cp, 2*cp)
    b_proj = bproj_ref[...]          # (3*hd + 2*cp, 1)
    w_gate = wgate_ref[...]          # (3*cp, 3*cp)
    b_gate = bgate_ref[...]          # (3*cp, 1)

    def softmax_over_keys(s):
        # s: (N_key, N_query); normalize over the key (sublane) axis.
        e = jnp.exp(s - jnp.max(s, axis=0, keepdims=True))
        # EUP reciprocal instead of a VALU divide over the (N, N) tensor.
        return e * pl.reciprocal(jnp.sum(e, axis=0, keepdims=True), approx=True)

    def compute_one(i):
        hm = hm_ref[i]                                  # (2*cp, N): [h_pad ; m_pad]
        h = hm[0:cp]
        m = hm[cp:2 * cp]

        # Single block-diagonal fused projection (one MXU push).
        proj = jnp.dot(w_proj, hm, preferred_element_type=f32) + b_proj

        q = proj[0:hd].astype(bf16)                      # (hd, N), shared Q
        k_h = proj[hd:2 * hd]                            # (hd, N)
        v_h = proj[2 * hd:2 * hd + cp].astype(bf16)      # (cp, N), pad rows are 0
        k_m = proj[2 * hd + cp:3 * hd + cp]              # (hd, N)
        v_m = proj[3 * hd + cp:3 * hd + 2 * cp].astype(bf16)

        # One fused score matmul for both attentions: keys stacked on lanes,
        # scores come out (N_key, N_query) so downstream matmuls are natural.
        k_cat = jnp.concatenate([k_h, k_m], axis=1).astype(bf16)        # (hd, 2N)
        s_cat = lax.dot_general(k_cat, q, (((0,), (0,)), ((), ())),
                                preferred_element_type=f32)             # (2N, N)

        a_h = softmax_over_keys(s_cat[0:n]).astype(bf16)                # (N, N)
        a_m = softmax_over_keys(s_cat[n:2 * n]).astype(bf16)            # (N, N)

        # Context: natural (M,K)@(K,N) -- no transposed 256x256 operand.
        z_h = jnp.dot(v_h, a_h, preferred_element_type=f32)             # (cp, N)
        z_m = jnp.dot(v_m, a_m, preferred_element_type=f32)             # (cp, N)

        # Single fused gate matmul (layer_z . layer_m folded in the wrapper).
        zcat = jnp.concatenate([z_h, z_m, h], axis=0)                   # (3*cp, N)
        combined = jnp.dot(w_gate, zcat, preferred_element_type=f32) + b_gate

        mo = combined[0:cp]
        mg = combined[cp:2 * cp]
        mi = jax.nn.sigmoid(combined[2 * cp:3 * cp])

        new_m = (1.0 - mi) * m + mi * jnp.tanh(mg)                      # (cp, N)
        new_h = jax.nn.sigmoid(mo) * new_m

        new_h_ref[i] = new_h[0:c_out].astype(new_h_ref.dtype)           # lane-dense
        new_m_ref[i] = new_m[0:c_out].astype(new_m_ref.dtype)

    if bblk <= 2:
        # Tiny blocks: static unroll (live-range growth is negligible here).
        for i in range(bblk):
            compute_one(i)
    else:
        # Larger blocks (e.g. v7x with big B): bound live ranges so only one
        # (2N, N) score buffer is resident at a time.
        def body(i, carry):
            compute_one(i)
            return carry
        lax.fori_loop(0, bblk, body, 0)


def _pick_batch_block(B):
    """B on single-TC chips (v5e/v6e); <= B//2 on dual-TC v7x so both cores work."""
    try:
        kind = jax.devices()[0].device_kind.lower()
    except Exception:
        kind = ""
    dual_tc = ("v7" in kind) or ("7x" in kind)
    if dual_tc and B >= 2:
        cap = max(1, B // 2)
        for d in range(cap, 0, -1):
            if B % d == 0:
                return d
    return B


def sam_forward(h_nchw, m_nchw, p, *, batch_block=None):
    """h, m: (B, C, H, W) float32 NCHW (PyTorch convention). Returns (new_h, new_m) NCHW."""
    B, C, H, W = h_nchw.shape
    N = H * W
    hd = p['Wq'].shape[0]
    assert hd % 8 == 0, "hidden_dim must be a multiple of 8 for aligned slices"
    assert N % 128 == 0, "H*W must be a multiple of 128 for the lane-dense layout"
    Cp = ((C + 7) // 8) * 8

    if batch_block is None:
        batch_block = _pick_batch_block(B)
    assert B % batch_block == 0

    # NCHW -> (B, C, N) is a pure reshape; zero-pad channels up to the sublane tile.
    def to_slab(x):
        x = x.reshape(B, C, N).astype(jnp.float32)
        if Cp != C:
            x = jnp.pad(x, ((0, 0), (0, Cp - C), (0, 0)))
        return x

    hm = jnp.concatenate([to_slab(h_nchw), to_slab(m_nchw)], axis=1)    # (B, 2Cp, N)

    # ---- fused block-diagonal projection: [Q;K_h;V_h;K_m;V_m] = W_proj @ [h;m] + b ----
    P_rows = 3 * hd + 2 * Cp
    W_proj = np.zeros((P_rows, 2 * Cp), np.float32)
    b_proj = np.zeros((P_rows, 1), np.float32)

    def put(row, col, w, b):
        w = np.asarray(w, np.float32)
        b = np.asarray(b, np.float32)
        W_proj[row:row + w.shape[0], col:col + w.shape[1]] = w
        b_proj[row:row + w.shape[0], 0] = b

    put(0,           0,  p['Wq'],  p['bq'])     # rows [0, hd)
    put(hd,          0,  p['Wk'],  p['bk'])     # rows [hd, 2hd)
    put(2 * hd,      0,  p['Wv'],  p['bv'])     # rows [2hd, 2hd+C), pad rows stay 0
    put(2 * hd + Cp, Cp, p['Wk2'], p['bk2'])    # rows [2hd+Cp, 3hd+Cp)
    put(3 * hd + Cp, Cp, p['Wv2'], p['bv2'])    # rows [3hd+Cp, 3hd+Cp+C)

    # ---- layer_z . layer_m folded into ONE gate matmul over [Z_h; Z_m; h] ----
    #   combined = Wm[:, :2C] @ (Wz @ [Zh;Zm] + bz) + Wm[:, 2C:] @ h + bm
    Wz, bz = np.asarray(p['Wz'], np.float32), np.asarray(p['bz'], np.float32)
    Wm, bm = np.asarray(p['Wm'], np.float32), np.asarray(p['bm'], np.float32)
    Wmz, Wmh = Wm[:, :2 * C], Wm[:, 2 * C:]
    W_zh = Wmz @ Wz[:, :C]                      # (3C, C) applied to Z_h
    W_zm = Wmz @ Wz[:, C:]                      # (3C, C) applied to Z_m
    b_cmb = Wmz @ bz + bm                       # (3C,)

    W_gate = np.zeros((3 * Cp, 3 * Cp), np.float32)
    b_gate = np.zeros((3 * Cp, 1), np.float32)
    for g in range(3):                          # gate rows padded to Cp strides
        r0 = g * Cp
        W_gate[r0:r0 + C, 0:C] = W_zh[g * C:(g + 1) * C]
        W_gate[r0:r0 + C, Cp:Cp + C] = W_zm[g * C:(g + 1) * C]
        W_gate[r0:r0 + C, 2 * Cp:2 * Cp + C] = Wmh[g * C:(g + 1) * C]
        b_gate[r0:r0 + C, 0] = b_cmb[g * C:(g + 1) * C]

    args = [hm, jnp.asarray(W_proj), jnp.asarray(b_proj),
            jnp.asarray(W_gate), jnp.asarray(b_gate)]

    batched_in = pl.BlockSpec((batch_block, 2 * Cp, N), lambda b: (b, 0, 0))
    batched_out = pl.BlockSpec((batch_block, C, N), lambda b: (b, 0, 0))

    def full_spec(shape):
        return pl.BlockSpec(shape, lambda b, _n=len(shape): (0,) * _n)

    in_specs = [batched_in] + [full_spec(a.shape) for a in args[1:]]
    out_shape = [jax.ShapeDtypeStruct((B, C, N), jnp.float32),
                 jax.ShapeDtypeStruct((B, C, N), jnp.float32)]

    new_h_f, new_m_f = pl.pallas_call(
        functools.partial(_sam_kernel, hd=hd, cp=Cp, bblk=batch_block),
        grid=(B // batch_block,),
        in_specs=in_specs,
        out_specs=[batched_out, batched_out],
        out_shape=out_shape,
        compiler_params=pltpu.CompilerParams(
            dimension_semantics=("parallel",),
            vmem_limit_bytes=32 * 1024 * 1024),   # fits the 32 MiB scoped default on v7x
    )(*args)

    # (B, C, N) -> NCHW is a free reshape (no transpose).
    return new_h_f.reshape(B, C, H, W), new_m_f.reshape(B, C, H, W)


def sam_reference(h, m, p):
    """Pure-JAX f32 reference mirroring the PyTorch forward exactly (NCHW)."""
    B, C, H, W = h.shape
    N = H * W
    hd = p['Wq'].shape[0]

    def conv1x1(x, W_, b_):
        return jnp.einsum('oc,bchw->bohw', W_, x) + b_[None, :, None, None]

    K_h = conv1x1(h, p['Wk'], p['bk']).reshape(B, hd, N)
    Q_h = conv1x1(h, p['Wq'], p['bq']).reshape(B, hd, N).transpose(0, 2, 1)
    A_h = jax.nn.softmax(jnp.einsum('bnk,bkm->bnm', Q_h, K_h), axis=-1)
    V_h = conv1x1(h, p['Wv'], p['bv']).reshape(B, C, N)
    Z_h = jnp.einsum('bnm,bmc->bnc', A_h, V_h.transpose(0, 2, 1))

    K_m = conv1x1(m, p['Wk2'], p['bk2']).reshape(B, hd, N)
    V_m = conv1x1(m, p['Wv2'], p['bv2']).reshape(B, C, N)
    A_m = jax.nn.softmax(jnp.einsum('bnk,bkm->bnm', Q_h, K_m), axis=-1)
    Z_m = jnp.einsum('bnm,bmc->bnc', A_m, V_m.transpose(0, 2, 1))

    Z_h = Z_h.transpose(0, 2, 1).reshape(B, C, H, W)
    Z_m = Z_m.transpose(0, 2, 1).reshape(B, C, H, W)
    W_z = jnp.concatenate([Z_h, Z_m], axis=1)
    Z = conv1x1(W_z, p['Wz'], p['bz'])
    combined = conv1x1(jnp.concatenate([Z, h], axis=1), p['Wm'], p['bm'])
    mo, mg, mi = combined[:, :C], combined[:, C:2 * C], combined[:, 2 * C:]
    mi = jax.nn.sigmoid(mi)
    new_m = (1 - mi) * m + mi * jnp.tanh(mg)
    new_h = jax.nn.sigmoid(mo) * new_m
    return new_h, new_m


if __name__ == "__main__":
    key = jax.random.PRNGKey(0)
    B, C, H, W = 2, 4, 16, 16   # input_dim = 4
    hd = 32                     # hidden_dim = 32
    ks = jax.random.split(key, 16)

    def w(k, shape, scale=0.2):
        return (scale * jax.random.normal(k, shape)).astype(jnp.float32)

    params = {
        'Wq': w(ks[0], (hd, C)),      'bq': w(ks[1], (hd,)),
        'Wk': w(ks[2], (hd, C)),      'bk': w(ks[3], (hd,)),
        'Wk2': w(ks[4], (hd, C)),     'bk2': w(ks[5], (hd,)),
        'Wv': w(ks[6], (C, C)),       'bv': w(ks[7], (C,)),
        'Wv2': w(ks[8], (C, C)),      'bv2': w(ks[9], (C,)),
        'Wz': w(ks[10], (2 * C, 2 * C)), 'bz': w(ks[11], (2 * C,)),
        'Wm': w(ks[12], (3 * C, 3 * C)), 'bm': w(ks[13], (3 * C,)),
    }
    h = w(ks[14], (B, C, H, W), scale=1.0)
    m = w(ks[15], (B, C, H, W), scale=1.0)

    # batch_block auto-selected per generation (B on v5e/v6e, <= B//2 on v7x).
    new_h, new_m = sam_forward(h, m, params)
    jax.block_until_ready((new_h, new_m))

    ref_h, ref_m = sam_reference(h, m, params)
    # Tolerance accounts for bf16 inputs on the N x N attention matmuls (f32
    # accumulation) and the EUP approximate reciprocal in the softmax.
    assert np.allclose(np.asarray(new_h), np.asarray(ref_h), atol=2e-2, rtol=2e-2)
    assert np.allclose(np.asarray(new_m), np.asarray(ref_m), atol=2e-2, rtol=2e-2)
    print("KERNEL_OK")
</pallas_src>

<mosaic_0001>
module attributes {stable_mosaic.version = 11 : i64} {
  func.func @_sam_kernel(%arg0: i32, %arg1: memref<2x16x256xf32, #tpu.memory_space<vmem>>, %arg2: memref<112x16xf32, #tpu.memory_space<vmem>>, %arg3: memref<112x1xf32, #tpu.memory_space<vmem>>, %arg4: memref<24x24xf32, #tpu.memory_space<vmem>>, %arg5: memref<24x1xf32, #tpu.memory_space<vmem>>, %arg6: memref<2x4x256xf32, #tpu.memory_space<vmem>>, %arg7: memref<2x4x256xf32, #tpu.memory_space<vmem>>) attributes {dimension_semantics = [#tpu.dimension_semantics<parallel>], iteration_bounds = array<i64: 1>, scalar_prefetch = 0 : i64, scratch_operands = 0 : i64, tpu.core_type = #tpu.core_type<tc>, window_params = [{transform_indices = @transform_0, window_bounds = array<i64: 2, 16, 256>}, {pipeline_mode = #tpu.pipeline_mode<synchronous>, transform_indices = @transform_1, window_bounds = array<i64: 112, 16>}, {pipeline_mode = #tpu.pipeline_mode<synchronous>, transform_indices = @transform_2, window_bounds = array<i64: 112, 1>}, {pipeline_mode = #tpu.pipeline_mode<synchronous>, transform_indices = @transform_3, window_bounds = array<i64: 24, 24>}, {pipeline_mode = #tpu.pipeline_mode<synchronous>, transform_indices = @transform_4, window_bounds = array<i64: 24, 1>}, {transform_indices = @transform_5, window_bounds = array<i64: 2, 4, 256>}, {transform_indices = @transform_6, window_bounds = array<i64: 2, 4, 256>}]} {
    %c0 = arith.constant 0 : index
    %c0_0 = arith.constant 0 : index
    %0 = vector.load %arg2[%c0, %c0_0] : memref<112x16xf32, #tpu.memory_space<vmem>>, vector<112x16xf32>
    %c0_1 = arith.constant 0 : index
    %c0_2 = arith.constant 0 : index
    %1 = vector.load %arg3[%c0_1, %c0_2] : memref<112x1xf32, #tpu.memory_space<vmem>>, vector<112x1xf32>
    %c0_3 = arith.constant 0 : index
    %c0_4 = arith.constant 0 : index
    %2 = vector.load %arg4[%c0_3, %c0_4] : memref<24x24xf32, #tpu.memory_space<vmem>>, vector<24x24xf32>
    %c0_5 = arith.constant 0 : index
    %c0_6 = arith.constant 0 : index
    %3 = vector.load %arg5[%c0_5, %c0_6] : memref<24x1xf32, #tpu.memory_space<vmem>>, vector<24x1xf32>
    %c0_7 = arith.constant 0 : index
    %c0_8 = arith.constant 0 : index
    %c0_9 = arith.constant 0 : index
    %4 = vector.load %arg1[%c0_7, %c0_8, %c0_9] : memref<2x16x256xf32, #tpu.memory_space<vmem>>, vector<1x16x256xf32>
    %5 = vector.shape_cast %4 : vector<1x16x256xf32> to vector<16x256xf32>
    %6 = vector.extract_strided_slice %5 {offsets = [0, 0], sizes = [8, 256], strides = [1, 1]} : vector<16x256xf32> to vector<8x256xf32>
    %7 = vector.extract_strided_slice %5 {offsets = [8, 0], sizes = [8, 256], strides = [1, 1]} : vector<16x256xf32> to vector<8x256xf32>
    %cst = arith.constant dense<0.000000e+00> : vector<112x256xf32>
    %8 = tpu.matmul %0, %5, %cst {dimension_numbers = #tpu.dot_dimension_numbers<[1], [0], [0], [1], [0, 0, 1, 1], [], []>} : vector<112x16xf32>, vector<16x256xf32>, vector<112x256xf32> -> vector<112x256xf32>
    %9 = vector.broadcast %1 : vector<112x1xf32> to vector<112x256xf32>
    %10 = arith.addf %8, %9 : vector<112x256xf32>
    %11 = vector.extract_strided_slice %10 {offsets = [0, 0], sizes = [32, 256], strides = [1, 1]} : vector<112x256xf32> to vector<32x256xf32>
    %12 = arith.truncf %11 : vector<32x256xf32> to vector<32x256xbf16>
    %13 = vector.extract_strided_slice %10 {offsets = [32, 0], sizes = [32, 256], strides = [1, 1]} : vector<112x256xf32> to vector<32x256xf32>
    %14 = vector.extract_strided_slice %10 {offsets = [64, 0], sizes = [8, 256], strides = [1, 1]} : vector<112x256xf32> to vector<8x256xf32>
    %15 = arith.truncf %14 : vector<8x256xf32> to vector<8x256xbf16>
    %16 = vector.extract_strided_slice %10 {offsets = [72, 0], sizes = [32, 256], strides = [1, 1]} : vector<112x256xf32> to vector<32x256xf32>
    %17 = vector.extract_strided_slice %10 {offsets = [104, 0], sizes = [8, 256], strides = [1, 1]} : vector<112x256xf32> to vector<8x256xf32>
    %18 = arith.truncf %17 : vector<8x256xf32> to vector<8x256xbf16>
    %19 = tpu.concatenate %13, %16 in 1 : vector<32x256xf32>, vector<32x256xf32> -> vector<32x512xf32>
    %20 = arith.truncf %19 : vector<32x512xf32> to vector<32x512xbf16>
    %cst_10 = arith.constant dense<0.000000e+00> : vector<512x256xf32>
    %21 = tpu.matmul %20, %12, %cst_10 {dimension_numbers = #tpu.dot_dimension_numbers<[0], [0], [1], [1], [0, 1, 1, 1], [], []>} : vector<32x512xbf16>, vector<32x256xbf16>, vector<512x256xf32> -> vector<512x256xf32>
    %22 = vector.extract_strided_slice %21 {offsets = [0, 0], sizes = [256, 256], strides = [1, 1]} : vector<512x256xf32> to vector<256x256xf32>
    %cst_11 = arith.constant dense<0xFF800000> : vector<256xf32>
    %23 = vector.multi_reduction <maximumf>, %22, %cst_11 [0] : vector<256x256xf32> to vector<256xf32>
    %24 = vector.shape_cast %23 : vector<256xf32> to vector<1x256xf32>
    %25 = vector.broadcast %24 : vector<1x256xf32> to vector<256x256xf32>
    %26 = arith.subf %22, %25 : vector<256x256xf32>
    %27 = math.exp %26 : vector<256x256xf32>
    %cst_12 = arith.constant dense<0.000000e+00> : vector<256xf32>
    %28 = vector.multi_reduction <add>, %27, %cst_12 [0] : vector<256x256xf32> to vector<256xf32>
    %29 = vector.shape_cast %28 : vector<256xf32> to vector<1x256xf32>
    %30 = tpu.reciprocal %29 {approx = true} : vector<1x256xf32> -> vector<1x256xf32>
    %31 = vector.broadcast %30 : vector<1x256xf32> to vector<256x256xf32>
    %32 = arith.mulf %27, %31 : vector<256x256xf32>
    %33 = arith.truncf %32 : vector<256x256xf32> to vector<256x256xbf16>
    %34 = vector.extract_strided_slice %21 {offsets = [256, 0], sizes = [256, 256], strides = [1, 1]} : vector<512x256xf32> to vector<256x256xf32>
    %cst_13 = arith.constant dense<0xFF800000> : vector<256xf32>
    %35 = vector.multi_reduction <maximumf>, %34, %cst_13 [0] : vector<256x256xf32> to vector<256xf32>
    %36 = vector.shape_cast %35 : vector<256xf32> to vector<1x256xf32>
    %37 = vector.broadcast %36 : vector<1x256xf32> to vector<256x256xf32>
    %38 = arith.subf %34, %37 : vector<256x256xf32>
    %39 = math.exp %38 : vector<256x256xf32>
    %cst_14 = arith.constant dense<0.000000e+00> : vector<256xf32>
    %40 = vector.multi_reduction <add>, %39, %cst_14 [0] : vector<256x256xf32> to vector<256xf32>
    %41 = vector.shape_cast %40 : vector<256xf32> to vector<1x256xf32>
    %42 = tpu.reciprocal %41 {approx = true} : vector<1x256xf32> -> vector<1x256xf32>
    %43 = vector.broadcast %42 : vector<1x256xf32> to vector<256x256xf32>
    %44 = arith.mulf %39, %43 : vector<256x256xf32>
    %45 = arith.truncf %44 : vector<256x256xf32> to vector<256x256xbf16>
    %cst_15 = arith.constant dense<0.000000e+00> : vector<8x256xf32>
    %46 = tpu.matmul %15, %33, %cst_15 {dimension_numbers = #tpu.dot_dimension_numbers<[1], [0], [0], [1], [0, 0, 1, 1], [], []>} : vector<8x256xbf16>, vector<256x256xbf16>, vector<8x256xf32> -> vector<8x256xf32>
    %cst_16 = arith.constant dense<0.000000e+00> : vector<8x256xf32>
    %47 = tpu.matmul %18, %45, %cst_16 {dimension_numbers = #tpu.dot_dimension_numbers<[1], [0], [0], [1], [0, 0, 1, 1], [], []>} : vector<8x256xbf16>, vector<256x256xbf16>, vector<8x256xf32> -> vector<8x256xf32>
    %48 = tpu.concatenate %46, %47, %6 in 0 : vector<8x256xf32>, vector<8x256xf32>, vector<8x256xf32> -> vector<24x256xf32>
    %cst_17 = arith.constant dense<0.000000e+00> : vector<24x256xf32>
    %49 = tpu.matmul %2, %48, %cst_17 {dimension_numbers = #tpu.dot_dimension_numbers<[1], [0], [0], [1], [0, 0, 1, 1], [], []>} : vector<24x24xf32>, vector<24x256xf32>, vector<24x256xf32> -> vector<24x256xf32>
    %50 = vector.broadcast %3 : vector<24x1xf32> to vector<24x256xf32>
    %51 = arith.addf %49, %50 : vector<24x256xf32>
    %52 = vector.extract_strided_slice %51 {offsets = [0, 0], sizes = [8, 256], strides = [1, 1]} : vector<24x256xf32> to vector<8x256xf32>
    %53 = vector.extract_strided_slice %51 {offsets = [8, 0], sizes = [8, 256], strides = [1, 1]} : vector<24x256xf32> to vector<8x256xf32>
    %54 = vector.extract_strided_slice %51 {offsets = [16, 0], sizes = [8, 256], strides = [1, 1]} : vector<24x256xf32> to vector<8x256xf32>
    %55 = arith.negf %54 : vector<8x256xf32>
    %56 = math.exp %55 : vector<8x256xf32>
    %cst_18 = arith.constant 1.000000e+00 : f32
    %57 = vector.broadcast %cst_18 : f32 to vector<8x256xf32>
    %58 = arith.addf %57, %56 : vector<8x256xf32>
    %59 = arith.divf %57, %58 : vector<8x256xf32>
    %cst_19 = arith.constant 1.000000e+00 : f32
    %60 = vector.broadcast %cst_19 : f32 to vector<8x256xf32>
    %61 = arith.subf %60, %59 : vector<8x256xf32>
    %62 = arith.mulf %61, %7 : vector<8x256xf32>
    %63 = math.tanh %53 : vector<8x256xf32>
    %64 = arith.mulf %59, %63 : vector<8x256xf32>
    %65 = arith.addf %62, %64 : vector<8x256xf32>
    %66 = arith.negf %52 : vector<8x256xf32>
    %67 = math.exp %66 : vector<8x256xf32>
    %cst_20 = arith.constant 1.000000e+00 : f32
    %68 = vector.broadcast %cst_20 : f32 to vector<8x256xf32>
    %69 = arith.addf %68, %67 : vector<8x256xf32>
    %70 = arith.divf %68, %69 : vector<8x256xf32>
    %71 = arith.mulf %70, %65 : vector<8x256xf32>
    %72 = vector.extract_strided_slice %71 {offsets = [0, 0], sizes = [4, 256], strides = [1, 1]} : vector<8x256xf32> to vector<4x256xf32>
    %c0_21 = arith.constant 0 : index
    %c0_22 = arith.constant 0 : index
    %c0_23 = arith.constant 0 : index
    %73 = vector.load %arg6[%c0_21, %c0_22, %c0_23] : memref<2x4x256xf32, #tpu.memory_space<vmem>>, vector<1x4x256xf32>
    %74 = vector.shape_cast %73 : vector<1x4x256xf32> to vector<4x256xf32>
    %75 = vector.shape_cast %72 : vector<4x256xf32> to vector<1x4x256xf32>
    tpu.vector_store %arg6[%c0_21, %c0_22, %c0_23], %75 {strides = array<i32>} : memref<2x4x256xf32, #tpu.memory_space<vmem>>, vector<1x4x256xf32>,
    %76 = vector.extract_strided_slice %65 {offsets = [0, 0], sizes = [4, 256], strides = [1, 1]} : vector<8x256xf32> to vector<4x256xf32>
    %c0_24 = arith.constant 0 : index
    %c0_25 = arith.constant 0 : index
    %c0_26 = arith.constant 0 : index
    %77 = vector.load %arg7[%c0_24, %c0_25, %c0_26] : memref<2x4x256xf32, #tpu.memory_space<vmem>>, vector<1x4x256xf32>
    %78 = vector.shape_cast %77 : vector<1x4x256xf32> to vector<4x256xf32>
    %79 = vector.shape_cast %76 : vector<4x256xf32> to vector<1x4x256xf32>
    tpu.vector_store %arg7[%c0_24, %c0_25, %c0_26], %79 {strides = array<i32>} : memref<2x4x256xf32, #tpu.memory_space<vmem>>, vector<1x4x256xf32>,
    %c1 = arith.constant 1 : index
    %c0_27 = arith.constant 0 : index
    %c0_28 = arith.constant 0 : index
    %80 = vector.load %arg1[%c1, %c0_27, %c0_28] : memref<2x16x256xf32, #tpu.memory_space<vmem>>, vector<1x16x256xf32>
    %81 = vector.shape_cast %80 : vector<1x16x256xf32> to vector<16x256xf32>
    %82 = vector.extract_strided_slice %81 {offsets = [0, 0], sizes = [8, 256], strides = [1, 1]} : vector<16x256xf32> to vector<8x256xf32>
    %83 = vector.extract_strided_slice %81 {offsets = [8, 0], sizes = [8, 256], strides = [1, 1]} : vector<16x256xf32> to vector<8x256xf32>
    %cst_29 = arith.constant dense<0.000000e+00> : vector<112x256xf32>
    %84 = tpu.matmul %0, %81, %cst_29 {dimension_numbers = #tpu.dot_dimension_numbers<[1], [0], [0], [1], [0, 0, 1, 1], [], []>} : vector<112x16xf32>, vector<16x256xf32>, vector<112x256xf32> -> vector<112x256xf32>
    %85 = vector.broadcast %1 : vector<112x1xf32> to vector<112x256xf32>
    %86 = arith.addf %84, %85 : vector<112x256xf32>
    %87 = vector.extract_strided_slice %86 {offsets = [0, 0], sizes = [32, 256], strides = [1, 1]} : vector<112x256xf32> to vector<32x256xf32>
    %88 = arith.truncf %87 : vector<32x256xf32> to vector<32x256xbf16>
    %89 = vector.extract_strided_slice %86 {offsets = [32, 0], sizes = [32, 256], strides = [1, 1]} : vector<112x256xf32> to vector<32x256xf32>
    %90 = vector.extract_strided_slice %86 {offsets = [64, 0], sizes = [8, 256], strides = [1, 1]} : vector<112x256xf32> to vector<8x256xf32>
    %91 = arith.truncf %90 : vector<8x256xf32> to vector<8x256xbf16>
    %92 = vector.extract_strided_slice %86 {offsets = [72, 0], sizes = [32, 256], strides = [1, 1]} : vector<112x256xf32> to vector<32x256xf32>
    %93 = vector.extract_strided_slice %86 {offsets = [104, 0], sizes = [8, 256], strides = [1, 1]} : vector<112x256xf32> to vector<8x256xf32>
    %94 = arith.truncf %93 : vector<8x256xf32> to vector<8x256xbf16>
    %95 = tpu.concatenate %89, %92 in 1 : vector<32x256xf32>, vector<32x256xf32> -> vector<32x512xf32>
    %96 = arith.truncf %95 : vector<32x512xf32> to vector<32x512xbf16>
    %cst_30 = arith.constant dense<0.000000e+00> : vector<512x256xf32>
    %97 = tpu.matmul %96, %88, %cst_30 {dimension_numbers = #tpu.dot_dimension_numbers<[0], [0], [1], [1], [0, 1, 1, 1], [], []>} : vector<32x512xbf16>, vector<32x256xbf16>, vector<512x256xf32> -> vector<512x256xf32>
    %98 = vector.extract_strided_slice %97 {offsets = [0, 0], sizes = [256, 256], strides = [1, 1]} : vector<512x256xf32> to vector<256x256xf32>
    %cst_31 = arith.constant dense<0xFF800000> : vector<256xf32>
    %99 = vector.multi_reduction <maximumf>, %98, %cst_31 [0] : vector<256x256xf32> to vector<256xf32>
    %100 = vector.shape_cast %99 : vector<256xf32> to vector<1x256xf32>
    %101 = vector.broadcast %100 : vector<1x256xf32> to vector<256x256xf32>
    %102 = arith.subf %98, %101 : vector<256x256xf32>
    %103 = math.exp %102 : vector<256x256xf32>
    %cst_32 = arith.constant dense<0.000000e+00> : vector<256xf32>
    %104 = vector.multi_reduction <add>, %103, %cst_32 [0] : vector<256x256xf32> to vector<256xf32>
    %105 = vector.shape_cast %104 : vector<256xf32> to vector<1x256xf32>
    %106 = tpu.reciprocal %105 {approx = true} : vector<1x256xf32> -> vector<1x256xf32>
    %107 = vector.broadcast %106 : vector<1x256xf32> to vector<256x256xf32>
    %108 = arith.mulf %103, %107 : vector<256x256xf32>
    %109 = arith.truncf %108 : vector<256x256xf32> to vector<256x256xbf16>
    %110 = vector.extract_strided_slice %97 {offsets = [256, 0], sizes = [256, 256], strides = [1, 1]} : vector<512x256xf32> to vector<256x256xf32>
    %cst_33 = arith.constant dense<0xFF800000> : vector<256xf32>
    %111 = vector.multi_reduction <maximumf>, %110, %cst_33 [0] : vector<256x256xf32> to vector<256xf32>
    %112 = vector.shape_cast %111 : vector<256xf32> to vector<1x256xf32>
    %113 = vector.broadcast %112 : vector<1x256xf32> to vector<256x256xf32>
    %114 = arith.subf %110, %113 : vector<256x256xf32>
    %115 = math.exp %114 : vector<256x256xf32>
    %cst_34 = arith.constant dense<0.000000e+00> : vector<256xf32>
    %116 = vector.multi_reduction <add>, %115, %cst_34 [0] : vector<256x256xf32> to vector<256xf32>
    %117 = vector.shape_cast %116 : vector<256xf32> to vector<1x256xf32>
    %118 = tpu.reciprocal %117 {approx = true} : vector<1x256xf32> -> vector<1x256xf32>
    %119 = vector.broadcast %118 : vector<1x256xf32> to vector<256x256xf32>
    %120 = arith.mulf %115, %119 : vector<256x256xf32>
    %121 = arith.truncf %120 : vector<256x256xf32> to vector<256x256xbf16>
    %cst_35 = arith.constant dense<0.000000e+00> : vector<8x256xf32>
    %122 = tpu.matmul %91, %109, %cst_35 {dimension_numbers = #tpu.dot_dimension_numbers<[1], [0], [0], [1], [0, 0, 1, 1], [], []>} : vector<8x256xbf16>, vector<256x256xbf16>, vector<8x256xf32> -> vector<8x256xf32>
    %cst_36 = arith.constant dense<0.000000e+00> : vector<8x256xf32>
    %123 = tpu.matmul %94, %121, %cst_36 {dimension_numbers = #tpu.dot_dimension_numbers<[1], [0], [0], [1], [0, 0, 1, 1], [], []>} : vector<8x256xbf16>, vector<256x256xbf16>, vector<8x256xf32> -> vector<8x256xf32>
    %124 = tpu.concatenate %122, %123, %82 in 0 : vector<8x256xf32>, vector<8x256xf32>, vector<8x256xf32> -> vector<24x256xf32>
    %cst_37 = arith.constant dense<0.000000e+00> : vector<24x256xf32>
    %125 = tpu.matmul %2, %124, %cst_37 {dimension_numbers = #tpu.dot_dimension_numbers<[1], [0], [0], [1], [0, 0, 1, 1], [], []>} : vector<24x24xf32>, vector<24x256xf32>, vector<24x256xf32> -> vector<24x256xf32>
    %126 = vector.broadcast %3 : vector<24x1xf32> to vector<24x256xf32>
    %127 = arith.addf %125, %126 : vector<24x256xf32>
    %128 = vector.extract_strided_slice %127 {offsets = [0, 0], sizes = [8, 256], strides = [1, 1]} : vector<24x256xf32> to vector<8x256xf32>
    %129 = vector.extract_strided_slice %127 {offsets = [8, 0], sizes = [8, 256], strides = [1, 1]} : vector<24x256xf32> to vector<8x256xf32>
    %130 = vector.extract_strided_slice %127 {offsets = [16, 0], sizes = [8, 256], strides = [1, 1]} : vector<24x256xf32> to vector<8x256xf32>
    %131 = arith.negf %130 : vector<8x256xf32>
    %132 = math.exp %131 : vector<8x256xf32>
    %cst_38 = arith.constant 1.000000e+00 : f32
    %133 = vector.broadcast %cst_38 : f32 to vector<8x256xf32>
    %134 = arith.addf %133, %132 : vector<8x256xf32>
    %135 = arith.divf %133, %134 : vector<8x256xf32>
    %cst_39 = arith.constant 1.000000e+00 : f32
    %136 = vector.broadcast %cst_39 : f32 to vector<8x256xf32>
    %137 = arith.subf %136, %135 : vector<8x256xf32>
    %138 = arith.mulf %137, %83 : vector<8x256xf32>
    %139 = math.tanh %129 : vector<8x256xf32>
    %140 = arith.mulf %135, %139 : vector<8x256xf32>
    %141 = arith.addf %138, %140 : vector<8x256xf32>
    %142 = arith.negf %128 : vector<8x256xf32>
    %143 = math.exp %142 : vector<8x256xf32>
    %cst_40 = arith.constant 1.000000e+00 : f32
    %144 = vector.broadcast %cst_40 : f32 to vector<8x256xf32>
    %145 = arith.addf %144, %143 : vector<8x256xf32>
    %146 = arith.divf %144, %145 : vector<8x256xf32>
    %147 = arith.mulf %146, %141 : vector<8x256xf32>
    %148 = vector.extract_strided_slice %147 {offsets = [0, 0], sizes = [4, 256], strides = [1, 1]} : vector<8x256xf32> to vector<4x256xf32>
    %c1_41 = arith.constant 1 : index
    %c0_42 = arith.constant 0 : index
    %c0_43 = arith.constant 0 : index
    %149 = vector.load %arg6[%c1_41, %c0_42, %c0_43] : memref<2x4x256xf32, #tpu.memory_space<vmem>>, vector<1x4x256xf32>
    %150 = vector.shape_cast %149 : vector<1x4x256xf32> to vector<4x256xf32>
    %151 = vector.shape_cast %148 : vector<4x256xf32> to vector<1x4x256xf32>
    tpu.vector_store %arg6[%c1_41, %c0_42, %c0_43], %151 {strides = array<i32>} : memref<2x4x256xf32, #tpu.memory_space<vmem>>, vector<1x4x256xf32>,
    %152 = vector.extract_strided_slice %141 {offsets = [0, 0], sizes = [4, 256], strides = [1, 1]} : vector<8x256xf32> to vector<4x256xf32>
    %c1_44 = arith.constant 1 : index
    %c0_45 = arith.constant 0 : index
    %c0_46 = arith.constant 0 : index
    %153 = vector.load %arg7[%c1_44, %c0_45, %c0_46] : memref<2x4x256xf32, #tpu.memory_space<vmem>>, vector<1x4x256xf32>
    %154 = vector.shape_cast %153 : vector<1x4x256xf32> to vector<4x256xf32>
    %155 = vector.shape_cast %152 : vector<4x256xf32> to vector<1x4x256xf32>
    tpu.vector_store %arg7[%c1_44, %c0_45, %c0_46], %155 {strides = array<i32>} : memref<2x4x256xf32, #tpu.memory_space<vmem>>, vector<1x4x256xf32>,
    return
  }
  func.func @transform_0(%arg0: i32) -> (i32, i32, i32) {
    %c0_i32 = arith.constant 0 : i32
    %c0_i32_0 = arith.constant 0 : i32
    %c0_i32_1 = arith.constant 0 : i32
    return %arg0, %c0_i32, %c0_i32_0 : i32, i32, i32
  }
  func.func @transform_1(%arg0: i32) -> (i32, i32) {
    %c0_i32 = arith.constant 0 : i32
    %c0_i32_0 = arith.constant 0 : i32
    %c0_i32_1 = arith.constant 0 : i32
    return %c0_i32, %c0_i32_0 : i32, i32
  }
  func.func @transform_2(%arg0: i32) -> (i32, i32) {
    %c0_i32 = arith.constant 0 : i32
    %c0_i32_0 = arith.constant 0 : i32
    %c0_i32_1 = arith.constant 0 : i32
    return %c0_i32, %c0_i32_0 : i32, i32
  }
  func.func @transform_3(%arg0: i32) -> (i32, i32) {
    %c0_i32 = arith.constant 0 : i32
    %c0_i32_0 = arith.constant 0 : i32
    %c0_i32_1 = arith.constant 0 : i32
    return %c0_i32, %c0_i32_0 : i32, i32
  }
  func.func @transform_4(%arg0: i32) -> (i32, i32) {
    %c0_i32 = arith.constant 0 : i32
    %c0_i32_0 = arith.constant 0 : i32
    %c0_i32_1 = arith.constant 0 : i32
    return %c0_i32, %c0_i32_0 : i32, i32
  }
  func.func @transform_5(%arg0: i32) -> (i32, i32, i32) {
    %c0_i32 = arith.constant 0 : i32
    %c0_i32_0 = arith.constant 0 : i32
    %c0_i32_1 = arith.constant 0 : i32
    return %arg0, %c0_i32, %c0_i32_0 : i32, i32, i32
  }
  func.func @transform_6(%arg0: i32) -> (i32, i32, i32) {
    %c0_i32 = arith.constant 0 : i32
    %c0_i32_0 = arith.constant 0 : i32
    %c0_i32_1 = arith.constant 0 : i32
    return %arg0, %c0_i32, %c0_i32_0 : i32, i32, i32
  }
}

</mosaic_0001>

<bundles_post_ra>
// kernel: tpu_custom_call.1
= control target key start
LH: loop header
LB: loop body
LE: loop exit
PB: predicated region body
PF: predicated region fallthrough
CT: control target
= control target key end

     0   :  { %12 = vsyncpa [#allocation3], 0  ;;  %v4603_v3 = vmov 0   ;;  %vm133_vm0 = vcmask 130048   ;;  %s7998_s0 = inlined_call_operand.vmem [shape: f32[2,16,256], index: 0, kind: input, shape index: {}]   ;;  %s7999_s1 = inlined_call_operand.vmem [shape: f32[112,16], index: 1, kind: input, shape index: {}]   ;;  %s8000_s2 = inlined_call_operand.vmem [shape: f32[112,1], index: 2, kind: input, shape index: {}]   ;;  %s8001_s3 = inlined_call_operand.vmem [shape: f32[24,24], index: 3, kind: input, shape index: {}]   ;;  %s8002_s4 = inlined_call_operand.vmem [shape: f32[24,1], index: 4, kind: input, shape index: {}]   ;;  %s8003_s5 = inlined_call_operand.hbm [shape: f32[2,4,256], index: 5, kind: output, shape index: {0}]   ;;  %s8004_s6 = inlined_call_operand.hbm [shape: f32[2,4,256], index: 6, kind: output, shape index: {1}]  }
   0x1   :  { %v61_v0 = vld [vmem:[%s7998_s0 + $0x10] sm:$0xff]  ;;  %v62_v1 = vld [vmem:[%s7998_s0 + $0x18] sm:$0xff]  ;;  %v43_v2 = vld [vmem:[%s8000_s2 + $0x20] sm:$0xff]  ;;  %3955 = vset.pattern.permute.xlu0 %v4603_v3  ;;  %3956 = vset.pattern.permute.xlu1 %v4603_v3 }
   0x2   :  { %190 = vmatpush.msra.mxu0 %v61_v0  ;;  %v59_v4 = vld [vmem:[%s7998_s0] sm:$0xff]  ;;  %v60_v5 = vld [vmem:[%s7998_s0 + $0x8] sm:$0xff]  ;;  %249 = vmatpush.msra.mxu1 %v62_v1  ;;  %v45_v7 = vld [vmem:[%s8000_s2 + $0x30] sm:$0xff] }
   0x3   :  { %v25_v6 = vld [vmem:[%s7999_s1] sm:$0xff]  ;;  %85 = vperm.xlu0 %3955, %v43_v2   ;;  %95 = vperm.xlu1 %3956, %v45_v7  }
   0x4   :  { %191 = vmatpush.msra.mxu0 %v59_v4  ;;  %250 = vmatpush.msra.mxu1 %v60_v5 }
   0x5   :  { %3742 = vmatmul.msk.f32.vlgmr.msra.gmra.mxu0 %vm133_vm0, %v25_v6  ;;  %3756 = vmatmul.msk.f32.vlgmr.msra.gmra.mxu1 %vm133_vm0, %v25_v6 }
   0x6   :  { %3957 = vset.pattern.permute.xlu2 %v4603_v3 }
   0x7   :  { %13 = vsyncpa [#allocation5], 0  ;;  %v44_v8 = vld [vmem:[%s8000_s2 + $0x28] sm:$0xff]  ;;  %v46_v10 = vld [vmem:[%s8000_s2 + $0x38] sm:$0xff]  ;;  %vm358_vm1 = vcmask 261120   ;;  %vm1788_vm2 = vcmask 195584  }
   0x8   :  { %v26_v9 = vld [vmem:[%s7999_s1 + $0x8] sm:$0xff]  ;;  %v39_v11 = vld [vmem:[%s8000_s2] sm:$0xff]  ;;  %v27_v12 = vld [vmem:[%s7999_s1 + $0x10] sm:$0xff]  ;;  %s3725_s30 = sshll.u32 %s8004_s6, 4  ;;  %s4605_s7 = smov [#allocation2]   ;;  %s3726_s30 = int_to_ptr.hbm [resolvable:$true] %s3725_s30 }
   0x9   :  { %v40_v13 = vld [vmem:[%s8000_s2 + $0x8] sm:$0xff]  ;;  %v41_v14 = vld [vmem:[%s8000_s2 + $0x10] sm:$0xff]  ;;  %v28_v16 = vld [vmem:[%s7999_s1 + $0x18] sm:$0xff]  ;;  %s3710_s8 = sshll.u32 %s4605_s7, 4  ;;  %s3712_s11 = sshll.u32 %s8003_s5, 4  ;;  %s3711_s8 = int_to_ptr.vmem [resolvable:$true] %s3710_s8  ;;  %s3713_s11 = int_to_ptr.hbm [resolvable:$true] %s3712_s11 }
   0xa   :  { %75 = vperm.xlu2 %3957, %v41_v14   ;;  %v48_v15 = vld [vmem:[%s8000_s2 + $0x48] sm:$0xff]  ;;  %v49_v17 = vld [vmem:[%s8000_s2 + $0x50] sm:$0xff]  ;;  %v42_v18 = vld [vmem:[%s8000_s2 + $0x18] sm:$0xff]  ;;  %s4606_s6 = smov 128   ;;  %s4607_s12 = smov 8  }
   0xb   :  { %90 = vperm.xlu0 %3955, %v44_v8   ;;  %100 = vperm.xlu1 %3956, %v46_v10   ;;  %v50_v19 = vld [vmem:[%s8000_s2 + $0x58] sm:$0xff]  ;;  %v29_v20 = vld [vmem:[%s7999_s1 + $0x20] sm:$0xff]  ;;  %v30_v22 = vld [vmem:[%s7999_s1 + $0x28] sm:$0xff] }
   0xc   :  { %v51_v21 = vld [vmem:[%s8000_s2 + $0x60] sm:$0xff]  ;;  %v31_v24 = vld [vmem:[%s7999_s1 + $0x30] sm:$0xff]  ;;  %v52_v25 = vld [vmem:[%s8000_s2 + $0x68] sm:$0xff] }
   0xd   :  { %3743 = vmatmul.msk.f32.gmra.mxu0 %vm133_vm0, %v26_v9  ;;  %3757 = vmatmul.msk.f32.gmra.mxu1 %vm133_vm0, %v26_v9  ;;  %v47_v23 = vld [vmem:[%s8000_s2 + $0x40] sm:$0xff]  ;;  %v32_v26 = vld [vmem:[%s7999_s1 + $0x38] sm:$0xff]  ;;  %v34_v28 = vld [vmem:[%s7999_s1 + $0x48] sm:$0xff] }
   0xe   :  { %v33_v27 = vld [vmem:[%s7999_s1 + $0x40] sm:$0xff]  ;;  %v35_v29 = vld [vmem:[%s7999_s1 + $0x50] sm:$0xff]  ;;  %v36_v30 = vld [vmem:[%s7999_s1 + $0x58] sm:$0xff] }
   0xf   :  { %v37_v31 = vld [vmem:[%s7999_s1 + $0x60] sm:$0xff]  ;;  %v38_v32 = vld [vmem:[%s7999_s1 + $0x68] sm:$0xff] }
  0x12   :  { %80 = vperm.xlu2 %3957, %v42_v18  }
  0x13   :  { %65 = vperm.xlu0 %3955, %v39_v11   ;;  %70 = vperm.xlu1 %3956, %v40_v13  }
  0x15   :  { %3744 = vmatmul.msk.f32.gmra.mxu0 %vm133_vm0, %v27_v12  ;;  %3758 = vmatmul.msk.f32.gmra.mxu1 %vm133_vm0, %v27_v12 }
  0x1b   :  { %110 = vperm.xlu0 %3955, %v48_v15   ;;  %115 = vperm.xlu1 %3956, %v49_v17  }
  0x1d   :  { %3745 = vmatmul.msk.f32.gmra.mxu0 %vm133_vm0, %v28_v16  ;;  %3759 = vmatmul.msk.f32.gmra.mxu1 %vm133_vm0, %v28_v16 }
  0x23   :  { %120 = vperm.xlu0 %3955, %v50_v19   ;;  %125 = vperm.xlu1 %3956, %v51_v21  }
  0x25   :  { %3746 = vmatmul.msk.f32.gmra.mxu0 %vm133_vm0, %v29_v20  ;;  %3760 = vmatmul.msk.f32.gmra.mxu1 %vm133_vm0, %v29_v20 }
  0x2b   :  { %105 = vperm.xlu1 %3956, %v47_v23  }
  0x2d   :  { %3747 = vmatmul.msk.f32.gmra.mxu0 %vm133_vm0, %v30_v22  ;;  %3761 = vmatmul.msk.f32.gmra.mxu1 %vm133_vm0, %v30_v22 }
  0x33   :  { %130 = vperm.xlu1 %3956, %v52_v25  }
  0x35   :  { %3748 = vmatmul.msk.f32.gmra.mxu0 %vm133_vm0, %v31_v24  ;;  %3762 = vmatmul.msk.f32.gmra.mxu1 %vm133_vm0, %v31_v24 }
  0x3d   :  { %3749 = vmatmul.msk.f32.gmra.mxu0 %vm133_vm0, %v32_v26  ;;  %3763 = vmatmul.msk.f32.gmra.mxu1 %vm133_vm0, %v32_v26 }
  0x45   :  { %3750 = vmatmul.msk.f32.gmra.mxu0 %vm133_vm0, %v33_v27  ;;  %3764 = vmatmul.msk.f32.gmra.mxu1 %vm133_vm0, %v33_v27 }
  0x4d   :  { %3751 = vmatmul.msk.f32.gmra.mxu0 %vm133_vm0, %v34_v28  ;;  %3765 = vmatmul.msk.f32.gmra.mxu1 %vm133_vm0, %v34_v28 }
  0x55   :  { %3752 = vmatmul.msk.f32.gmra.mxu0 %vm133_vm0, %v35_v29  ;;  %3766 = vmatmul.msk.f32.gmra.mxu1 %vm133_vm0, %v35_v29 }
  0x5d   :  { %3753 = vmatmul.msk.f32.gmra.mxu0 %vm133_vm0, %v36_v30  ;;  %3767 = vmatmul.msk.f32.gmra.mxu1 %vm133_vm0, %v36_v30 }
  0x64   :  { %v4771_v39 = vpop.permute.xlu2 %75 }
  0x65   :  { %3754 = vmatmul.msk.f32.gmra.mxu0 %vm133_vm0, %v37_v31  ;;  %3768 = vmatmul.msk.f32.gmra.mxu1 %vm133_vm0, %v37_v31  ;;  %8200 = vst [vmem:[#allocation10_spill] sm:$0xff] %v4771_v39 }
  0x6c   :  { %v4777_v44 = vpop.permute.xlu2 %80 }
  0x6d   :  { %3755 = vmatmul.msk.f32.gmra.mxu0 %vm133_vm0, %v38_v32  ;;  %3769 = vmatmul.msk.f32.gmra.mxu1 %vm133_vm0, %v38_v32  ;;  %8203 = vst [vmem:[#allocation13_spill] sm:$0xff] %v4777_v44 }
  0x75   :  { %v4767_v35 = vpop.permute.xlu1 %95  ;;  %v4769_v36 = vpop.permute.xlu0 %85 }
  0x76   :  { %8198 = vst [vmem:[#allocation8_spill] sm:$0xff] %v4767_v35 }
  0x77   :  { %8199 = vst [vmem:[#allocation9_spill] sm:$0xff] %v4769_v36 }
  0x7d   :  { %v4773_v40 = vpop.permute.xlu1 %100  ;;  %v4775_v41 = vpop.permute.xlu0 %90 }
  0x7e   :  { %8201 = vst [vmem:[#allocation11_spill] sm:$0xff] %v4773_v40 }
  0x7f   :  { %8202 = vst [vmem:[#allocation12_spill] sm:$0xff] %v4775_v41 }
  0x82   :  { %v193_v33 = vpop.f32.mrf.mxu0  ;;  %v252_v34 = vpop.f32.mrf.mxu1 }
  0x85   :  { %v4779_v45 = vpop.permute.xlu1 %70  ;;  %v4783_v50 = vpop.permute.xlu0 %65 }
  0x86   :  { %8204 = vst [vmem:[#allocation14_spill] sm:$0xff] %v4779_v45  ;;  %v194_v57 = vadd.f32 %v193_v33, %v4783_v50  ;;  %v253_v58 = vadd.f32 %v252_v34, %v4783_v50 }
  0x87   :  { %8205 = vst [vmem:[#allocation15_spill] sm:$0xff] %v4783_v50 }
  0x8a   :  { %v196_v37 = vpop.f32.mrf.mxu0  ;;  %v255_v38 = vpop.f32.mrf.mxu1 }
  0x8b   :  { %v197_v53 = vadd.f32 %v196_v37, %v4779_v45  ;;  %v256_v55 = vadd.f32 %v255_v38, %v4779_v45 }
  0x8d   :  { %v294_v59 = vpack.c.bf16 %v197_v53, %v194_v57  ;;  %v295_v61 = vpack.c.bf16 %v256_v55, %v253_v58  ;;  %v4803_v21 = vpop.permute.xlu0 %110  ;;  %v4805_v22 = vpop.permute.xlu1 %115 }
  0x8e   :  { %8208 = vst [vmem:[#allocation18_spill] sm:$0xff] %v4803_v21 }
  0x8f   :  { %8209 = vst [vmem:[#allocation19_spill] sm:$0xff] %v4805_v22 }
  0x92   :  { %v199_v42 = vpop.f32.mrf.mxu0  ;;  %v258_v43 = vpop.f32.mrf.mxu1 }
  0x93   :  { %v200_v47 = vadd.f32 %v199_v42, %v4771_v39  ;;  %v259_v51 = vadd.f32 %v258_v43, %v4771_v39 }
  0x95   :  { %v4811_v33 = vpop.permute.xlu0 %120  ;;  %v4813_v34 = vpop.permute.xlu1 %125 }
  0x96   :  { %8210 = vst [vmem:[#allocation20_spill] sm:$0xff] %v4811_v33 }
  0x97   :  { %8211 = vst [vmem:[#allocation21_spill] sm:$0xff] %v4813_v34 }
  0x9a   :  { %v202_v46 = vpop.f32.mrf.mxu0  ;;  %v261_v49 = vpop.f32.mrf.mxu1 }
  0x9b   :  { %v203_v48 = vadd.f32 %v202_v46, %v4777_v44  ;;  %v262_v52 = vadd.f32 %v261_v49, %v4777_v44 }
  0x9d   :  { %v296_v54 = vpack.c.bf16 %v203_v48, %v200_v47  ;;  %v297_v56 = vpack.c.bf16 %v262_v52, %v259_v51 }
  0x9f   :  { %461 = vmatpush.bf16.msra.mxu2 %v296_v54  ;;  %630 = vmatpush.bf16.msra.mxu3 %v297_v56 }
  0xa2   :  { %v205_v60 = vpop.f32.mrf.mxu0  ;;  %v264_v62 = vpop.f32.mrf.mxu1 }
  0xa3   :  { %462 = vmatpush.bf16.msra.mxu2 %v294_v59  ;;  %631 = vmatpush.bf16.msra.mxu3 %v295_v61  ;;  %v206_v0 = vadd.f32 %v205_v60, %v4769_v36  ;;  %v265_v3 = vadd.f32 %v264_v62, %v4769_v36  ;;  %v3846_v59 = vld [vmem:[%s7998_s0 + $0x30] sm:$0xff]  ;;  %v3847_v60 = vld [vmem:[%s7998_s0 + $0x38] sm:$0xff] }
  0xa7   :  { %1970 = vmatpush.msrb.mxu2 %v3846_v59  ;;  %2029 = vmatpush.msrb.mxu3 %v3847_v60 }
  0xaa   :  { %v208_v63 = vpop.f32.mrf.mxu0  ;;  %v267_v2 = vpop.f32.mrf.mxu1 }
  0xab   :  { %v209_v1 = vadd.f32 %v208_v63, %v4775_v41  ;;  %v268_v4 = vadd.f32 %v267_v2, %v4775_v41  ;;  %v58_v2 = vld [vmem:[%s8002_s4 + $0x10] sm:$0xff] }
  0xad   :  { %v302_v5 = vpack.c.bf16 %v209_v1, %v206_v0  ;;  %v303_v6 = vpack.c.bf16 %v268_v4, %v265_v3 }
  0xaf   :  { %310 = vxpose.binary.xlu2.c.b16.start [1/4] (short) %v303_v6, %v302_v5, 128 }
  0xb2   :  { %v211_v7 = vpop.f32.mrf.mxu0  ;;  %v270_v8 = vpop.f32.mrf.mxu1 }
  0xb3   :  { %v212_v10 = vadd.f32 %v211_v7, %v4767_v35  ;;  %v271_v13 = vadd.f32 %v270_v8, %v4767_v35 }
  0xba   :  { %v214_v9 = vpop.f32.mrf.mxu0  ;;  %v273_v12 = vpop.f32.mrf.mxu1 }
  0xbb   :  { %v215_v11 = vadd.f32 %v214_v9, %v4773_v40  ;;  %v274_v14 = vadd.f32 %v273_v12, %v4773_v40 }
  0xbd   :  { %v306_v15 = vpack.c.bf16 %v215_v11, %v212_v10  ;;  %v307_v16 = vpack.c.bf16 %v274_v14, %v271_v13 }
  0xbf   :  { %311 = vxpose.binary.xlu2.c.b16.end [2/4] (short) %v307_v16, %v306_v15, 128 }
  0xc2   :  { %v4799_v17 = vpop.f32.mrf.mxu0  ;;  %v4801_v18 = vpop.f32.mrf.mxu1 }
  0xc3   :  { %8206 = vst [vmem:[#allocation16_spill] sm:$0xff] %v4799_v17 }
  0xc4   :  { %8207 = vst [vmem:[#allocation17_spill] sm:$0xff] %v4801_v18 }
  0xca   :  { %v220_v19 = vpop.f32.mrf.mxu0  ;;  %v279_v20 = vpop.f32.mrf.mxu1 }
  0xcb   :  { %v221_v24 = vadd.f32 %v220_v19, %v4803_v21  ;;  %v280_v27 = vadd.f32 %v279_v20, %v4803_v21  ;;  %v3845_v21 = vld [vmem:[%s7998_s0 + $0x28] sm:$0xff] }
  0xcc   :  { %2030 = vmatpush.msrb.mxu3 %v3845_v21 }
  0xd2   :  { %v223_v23 = vpop.f32.mrf.mxu0  ;;  %v282_v26 = vpop.f32.mrf.mxu1 }
  0xd3   :  { %v224_v25 = vadd.f32 %v223_v23, %v4805_v22  ;;  %v283_v28 = vadd.f32 %v282_v26, %v4805_v22  ;;  %v3844_v22 = vld [vmem:[%s7998_s0 + $0x20] sm:$0xff] }
  0xd4   :  { %1971 = vmatpush.msrb.mxu2 %v3844_v22 }
  0xd5   :  { %v304_v29 = vpack.c.bf16 %v224_v25, %v221_v24  ;;  %v305_v30 = vpack.c.bf16 %v283_v28, %v280_v27 }
  0xd7   :  { %334 = vxpose.binary.xlu0.c.b16.start [1/4] (short) %v305_v30, %v304_v29, 128 }
  0xda   :  { %v226_v31 = vpop.f32.mrf.mxu0  ;;  %v285_v32 = vpop.f32.mrf.mxu1 }
  0xdb   :  { %v227_v38 = vadd.f32 %v226_v31, %v4811_v33  ;;  %v286_v46 = vadd.f32 %v285_v32, %v4811_v33 }
  0xe2   :  { %v229_v37 = vpop.f32.mrf.mxu0  ;;  %v288_v43 = vpop.f32.mrf.mxu1 }
  0xe3   :  { %v230_v42 = vadd.f32 %v229_v37, %v4813_v34  ;;  %v289_v47 = vadd.f32 %v288_v43, %v4813_v34 }
  0xe5   :  { %v308_v48 = vpack.c.bf16 %v230_v42, %v227_v38  ;;  %v309_v49 = vpack.c.bf16 %v289_v47, %v286_v46 }
  0xe7   :  { %335 = vxpose.binary.xlu0.c.b16.end [2/4] (short) %v309_v49, %v308_v48, 128 }
 0x150   :  { %v318_v51 = vpop.trf.xlu2 }
 0x151   :  { %3770 = vmatmul.msk.bf16.vlgmr.msra.gmra.mxu2 %vm358_vm1, %v318_v51  ;;  %3802 = vmatmul.msk.bf16.vlgmr.msra.gmra.mxu3 %vm358_vm1, %v318_v51 }
 0x158   :  { %v319_v52 = vpop.trf.xlu2 }
 0x160   :  { %v320_v53 = vpop.trf.xlu2 }
 0x161   :  { %3771 = vmatmul.msk.bf16.gmra.mxu2 %vm358_vm1, %v320_v53  ;;  %3803 = vmatmul.msk.bf16.gmra.mxu3 %vm358_vm1, %v320_v53 }
 0x168   :  { %v321_v54 = vpop.trf.xlu2 }
 0x170   :  { %v322_v55 = vpop.trf.xlu2 }
 0x171   :  { %3772 = vmatmul.msk.bf16.gmra.mxu2 %vm358_vm1, %v322_v55  ;;  %3804 = vmatmul.msk.bf16.gmra.mxu3 %vm358_vm1, %v322_v55 }
 0x178   :  { %v323_v56 = vpop.trf.xlu2 }
 0x180   :  { %v324_v57 = vpop.trf.xlu2 }
 0x181   :  { %3773 = vmatmul.msk.bf16.gmra.mxu2 %vm358_vm1, %v324_v57  ;;  %3805 = vmatmul.msk.bf16.gmra.mxu3 %vm358_vm1, %v324_v57 }
 0x183   :  { %v342_v37 = vpop.trf.xlu0 }
 0x188   :  { %v325_v58 = vpop.trf.xlu2 }
 0x18b   :  { %v4914_v47 = vpop.trf.xlu0 }
 0x190   :  { %v326_v61 = vpop.trf.xlu2 }
 0x191   :  { %3774 = vmatmul.msk.bf16.gmra.mxu2 %vm358_vm1, %v326_v61  ;;  %3806 = vmatmul.msk.bf16.gmra.mxu3 %vm358_vm1, %v326_v61 }
 0x198   :  { %v327_v62 = vpop.trf.xlu2 }
 0x1a0   :  { %v328_v63 = vpop.trf.xlu2 }
 0x1a1   :  { %3775 = vmatmul.msk.bf16.gmra.mxu2 %vm358_vm1, %v328_v63  ;;  %3807 = vmatmul.msk.bf16.gmra.mxu3 %vm358_vm1, %v328_v63 }
 0x1a8   :  { %v329_v0 = vpop.trf.xlu2 }
 0x1b0   :  { %v330_v1 = vpop.trf.xlu2 }
 0x1b1   :  { %3776 = vmatmul.msk.bf16.gmra.mxu2 %vm358_vm1, %v330_v1  ;;  %3808 = vmatmul.msk.bf16.gmra.mxu3 %vm358_vm1, %v330_v1 }
 0x1b5   :  { %1785 = vperm.xlu0 %3955, %v58_v2  }
 0x1b8   :  { %v331_v3 = vpop.trf.xlu2 }
 0x1c0   :  { %v332_v4 = vpop.trf.xlu2 }
 0x1c1   :  { %3777 = vmatmul.msk.bf16.gmra.mxu2 %vm358_vm1, %v332_v4  ;;  %3809 = vmatmul.msk.bf16.gmra.mxu3 %vm358_vm1, %v332_v4 }
 0x1c8   :  { %v333_v48 = vpop.trf.xlu2 }
 0x1d1   :  { %3778 = vmatmul.msk.bf16.gmra.mxu2 %vm358_vm1, %v319_v52  ;;  %3810 = vmatmul.msk.bf16.gmra.mxu3 %vm358_vm1, %v319_v52  ;;  %v344_v52 = vpop.trf.xlu0 }
 0x1d4   :  { %v4846_v5 = vpop.f32.mrf.mxu2  ;;  %v4848_v6 = vpop.f32.mrf.mxu3 }
 0x1d9   :  { %v4926_v55 = vpop.trf.xlu0 }
 0x1da   :  { %8220 = vst [vmem:[#allocation30_spill] sm:$0xff] %v4926_v55 }
 0x1dc   :  { %v4850_v7 = vpop.f32.mrf.mxu2  ;;  %v4852_v8 = vpop.f32.mrf.mxu3 }
 0x1dd   :  { %8212 = vst [vmem:[#allocation22_spill] sm:$0xff] %v4850_v7 }
 0x1e1   :  { %3779 = vmatmul.msk.bf16.gmra.mxu2 %vm358_vm1, %v321_v54  ;;  %3811 = vmatmul.msk.bf16.gmra.mxu3 %vm358_vm1, %v321_v54 }
 0x1e4   :  { %v4856_v9 = vpop.f32.mrf.mxu2  ;;  %v4858_v10 = vpop.f32.mrf.mxu3 }
 0x1e5   :  { %8213 = vst [vmem:[#allocation23_spill] sm:$0xff] %v4856_v9  ;;  %v793_v17 = vmax.f32 %v4846_v5, %v4856_v9 }
 0x1ec   :  { %v4860_v11 = vpop.f32.mrf.mxu2  ;;  %v4862_v12 = vpop.f32.mrf.mxu3 }
 0x1ed   :  { %8214 = vst [vmem:[#allocation24_spill] sm:$0xff] %v4860_v11 }
 0x1ee   :  { %8215 = vst [vmem:[#allocation25_spill] sm:$0xff] %v4862_v12 }
 0x1f1   :  { %3780 = vmatmul.msk.bf16.gmra.mxu2 %vm358_vm1, %v323_v56  ;;  %3812 = vmatmul.msk.bf16.gmra.mxu3 %vm358_vm1, %v323_v56 }
 0x1f4   :  { %v4866_v13 = vpop.f32.mrf.mxu2  ;;  %v4868_v14 = vpop.f32.mrf.mxu3 }
 0x1f5   :  { %8216 = vst [vmem:[#allocation26_spill] sm:$0xff] %v4866_v13 }
 0x1fc   :  { %v4870_v15 = vpop.f32.mrf.mxu2  ;;  %v4872_v16 = vpop.f32.mrf.mxu3 }
 0x1fd   :  { %8217 = vst [vmem:[#allocation27_spill] sm:$0xff] %v4870_v15 }
 0x201   :  { %3781 = vmatmul.msk.bf16.gmra.mxu2 %vm358_vm1, %v325_v58  ;;  %3813 = vmatmul.msk.bf16.gmra.mxu3 %vm358_vm1, %v325_v58  ;;  %v346_v58 = vpop.trf.xlu0 }
 0x204   :  { %v4876_v19 = vpop.f32.mrf.mxu2  ;;  %v4878_v20 = vpop.f32.mrf.mxu3 }
 0x209   :  { %v4944_v63 = vpop.trf.xlu0 }
 0x20a   :  { %8222 = vst [vmem:[#allocation32_spill] sm:$0xff] %v4944_v63 }
 0x20c   :  { %v4880_v23 = vpop.f32.mrf.mxu2  ;;  %v4882_v24 = vpop.f32.mrf.mxu3 }
 0x20d   :  { %8218 = vst [vmem:[#allocation28_spill] sm:$0xff] %v4880_v23 }
 0x211   :  { %3782 = vmatmul.msk.bf16.gmra.mxu2 %vm358_vm1, %v327_v62  ;;  %3814 = vmatmul.msk.bf16.gmra.mxu3 %vm358_vm1, %v327_v62  ;;  %v348_v2 = vpop.trf.xlu0 }
 0x214   :  { %v4886_v25 = vpop.f32.mrf.mxu2  ;;  %v4888_v26 = vpop.f32.mrf.mxu3 }
 0x21c   :  { %v4890_v27 = vpop.f32.mrf.mxu2  ;;  %v4892_v28 = vpop.f32.mrf.mxu3 }
 0x221   :  { %3783 = vmatmul.msk.bf16.gmra.mxu2 %vm358_vm1, %v329_v0  ;;  %3815 = vmatmul.msk.bf16.gmra.mxu3 %vm358_vm1, %v329_v0 }
 0x224   :  { %v4896_v29 = vpop.f32.mrf.mxu2  ;;  %v4898_v30 = vpop.f32.mrf.mxu3 }
 0x22c   :  { %v4900_v31 = vpop.f32.mrf.mxu2  ;;  %v4902_v32 = vpop.f32.mrf.mxu3 }
 0x231   :  { %3784 = vmatmul.msk.bf16.gmra.mxu2 %vm358_vm1, %v331_v3  ;;  %3816 = vmatmul.msk.bf16.gmra.mxu3 %vm358_vm1, %v331_v3 }
 0x234   :  { %v4906_v38 = vpop.f32.mrf.mxu2  ;;  %v4908_v42 = vpop.f32.mrf.mxu3 }
 0x23c   :  { %v4910_v43 = vpop.f32.mrf.mxu2  ;;  %v4912_v46 = vpop.f32.mrf.mxu3 }
 0x241   :  { %3785 = vmatmul.msk.bf16.gmra.mxu2 %vm358_vm1, %v333_v48  ;;  %3817 = vmatmul.msk.bf16.gmra.mxu3 %vm358_vm1, %v333_v48 }
 0x244   :  { %v4918_v49 = vpop.f32.mrf.mxu2  ;;  %v4920_v51 = vpop.f32.mrf.mxu3 }
 0x24c   :  { %v4922_v53 = vpop.f32.mrf.mxu2  ;;  %v4924_v54 = vpop.f32.mrf.mxu3 }
 0x24d   :  { %8219 = vst [vmem:[#allocation29_spill] sm:$0xff] %v4924_v54 }
 0x251   :  { %3786 = vmatmul.msk.bf16.gmra.mxu2 %vm358_vm1, %v342_v37  ;;  %3818 = vmatmul.msk.bf16.gmra.mxu3 %vm358_vm1, %v342_v37  ;;  %v4956_v37 = vpop.trf.xlu0 }
 0x252   :  { %8225 = vst [vmem:[#allocation35_spill] sm:$0xff] %v4956_v37 }
 0x254   :  { %v4930_v56 = vpop.f32.mrf.mxu2  ;;  %v4932_v57 = vpop.f32.mrf.mxu3 }
 0x259   :  { %v350_v50 = vpop.trf.xlu0 }
 0x25c   :  { %v4934_v59 = vpop.f32.mrf.mxu2  ;;  %v4936_v60 = vpop.f32.mrf.mxu3 }
 0x25d   :  { %8221 = vst [vmem:[#allocation31_spill] sm:$0xff] %v4936_v60 }
 0x261   :  { %3787 = vmatmul.msk.bf16.gmra.mxu2 %vm358_vm1, %v344_v52  ;;  %3819 = vmatmul.msk.bf16.gmra.mxu3 %vm358_vm1, %v344_v52  ;;  %v4978_v40 = vpop.trf.xlu0 }
 0x262   :  { %8228 = vst [vmem:[#allocation38_spill] sm:$0xff] %v4978_v40  ;;  %v794_v40 = vmax.f32 %v4850_v7, %v4860_v11 }
 0x264   :  { %v4940_v61 = vpop.f32.mrf.mxu2  ;;  %v4942_v62 = vpop.f32.mrf.mxu3 }
 0x269   :  { %v352_v41 = vpop.trf.xlu0 }
 0x26c   :  { %v4946_v0 = vpop.f32.mrf.mxu2  ;;  %v4948_v1 = vpop.f32.mrf.mxu3 }
 0x26d   :  { %8223 = vst [vmem:[#allocation33_spill] sm:$0xff] %v4946_v0 }
 0x271   :  { %3788 = vmatmul.msk.bf16.gmra.mxu2 %vm358_vm1, %v346_v58  ;;  %3820 = vmatmul.msk.bf16.gmra.mxu3 %vm358_vm1, %v346_v58  ;;  %v4992_v39 = vpop.trf.xlu0 }
 0x272   :  { %8230 = vst [vmem:[#allocation40_spill] sm:$0xff] %v4992_v39  ;;  %v796_v39 = vmax.f32 %v794_v40, %v4870_v15 }
 0x274   :  { %v4952_v3 = vpop.f32.mrf.mxu2  ;;  %v4954_v4 = vpop.f32.mrf.mxu3 }
 0x275   :  { %8224 = vst [vmem:[#allocation34_spill] sm:$0xff] %v4952_v3 }
 0x27c   :  { %v4958_v48 = vpop.f32.mrf.mxu2  ;;  %v4960_v52 = vpop.f32.mrf.mxu3 }
 0x27d   :  { %8226 = vst [vmem:[#allocation36_spill] sm:$0xff] %v4958_v48 }
 0x27e   :  { %8227 = vst [vmem:[#allocation37_spill] sm:$0xff] %v4960_v52 }
 0x281   :  { %3789 = vmatmul.msk.bf16.gmra.mxu2 %vm358_vm1, %v348_v2  ;;  %3821 = vmatmul.msk.bf16.gmra.mxu3 %vm358_vm1, %v348_v2 }
 0x284   :  { %v4964_v45 = vpop.f32.mrf.mxu2  ;;  %v4966_v34 = vpop.f32.mrf.mxu3 }
 0x28c   :  { %v4968_v58 = vpop.f32.mrf.mxu2  ;;  %v4970_v33 = vpop.f32.mrf.mxu3 }
 0x291   :  { %3790 = vmatmul.msk.bf16.gmra.mxu2 %vm358_vm1, %v350_v50  ;;  %3822 = vmatmul.msk.bf16.gmra.mxu3 %vm358_vm1, %v350_v50  ;;  %v354_v50 = vpop.trf.xlu0 }
 0x294   :  { %v4982_v2 = vpop.f32.mrf.mxu2  ;;  %v4984_v35 = vpop.f32.mrf.mxu3 }
 0x295   :  { %8229 = vst [vmem:[#allocation39_spill] sm:$0xff] %v4982_v2 }
 0x299   :  { %v5014_v9 = vpop.trf.xlu0 }
 0x29a   :  { %8233 = vst [vmem:[#allocation43_spill] sm:$0xff] %v5014_v9 }
 0x29c   :  { %v4986_v36 = vpop.f32.mrf.mxu2  ;;  %v4988_v44 = vpop.f32.mrf.mxu3 }
 0x2a1   :  { %3791 = vmatmul.msk.bf16.gmra.mxu2 %vm358_vm1, %v352_v41  ;;  %3823 = vmatmul.msk.bf16.gmra.mxu3 %vm358_vm1, %v352_v41  ;;  %v795_v41 = vmax.f32 %v793_v17, %v4866_v13  ;;  %v356_v9 = vpop.trf.xlu0 }
 0x2a3   :  { %v797_v55 = vmax.f32 %v795_v41, %v4876_v19 }
 0x2a4   :  { %v4994_v21 = vpop.f32.mrf.mxu2  ;;  %v4996_v22 = vpop.f32.mrf.mxu3 }
 0x2a5   :  { %8231 = vst [vmem:[#allocation41_spill] sm:$0xff] %v4996_v22  ;;  %v798_v22 = vmax.f32 %v796_v39, %v4880_v23  ;;  %v799_v11 = vmax.f32 %v797_v55, %v4886_v25 }
 0x2a7   :  { %v800_v7 = vmax.f32 %v798_v22, %v4890_v27 }
 0x2a9   :  { %v802_v17 = vmax.f32 %v800_v7, %v4900_v31 }
 0x2ab   :  { %v804_v15 = vmax.f32 %v802_v17, %v4910_v43 }
 0x2ac   :  { %v4998_v18 = vpop.f32.mrf.mxu2  ;;  %v5008_v37 = vpop.f32.mrf.mxu3 }
 0x2ad   :  { %8232 = vst [vmem:[#allocation42_spill] sm:$0xff] %v4998_v18  ;;  %v806_v39 = vmax.f32 %v804_v15, %v4922_v53 }
 0x2af   :  { %v808_v22 = vmax.f32 %v806_v39, %v4934_v59 }
 0x2b1   :  { %3792 = vmatmul.msk.bf16.gmra.mxu2 %vm358_vm1, %v354_v50  ;;  %3824 = vmatmul.msk.bf16.gmra.mxu3 %vm358_vm1, %v354_v50  ;;  %v801_v50 = vmax.f32 %v799_v11, %v4896_v29  ;;  %v810_v7 = vmax.f32 %v808_v22, %v4946_v0 }
 0x2b3   :  { %v803_v40 = vmax.f32 %v801_v50, %v4906_v38  ;;  %v831_v50 = vmax.f32 %v4852_v8, %v4862_v12  ;;  %v812_v17 = vmax.f32 %v810_v7, %v4958_v48 }
 0x2b4   :  { %v5010_v63 = vpop.f32.mrf.mxu2  ;;  %v5026_v23 = vpop.f32.mrf.mxu3 }
 0x2b5   :  { %v805_v41 = vmax.f32 %v803_v40, %v4918_v49  ;;  %v833_v39 = vmax.f32 %v831_v50, %v4872_v16  ;;  %v814_v22 = vmax.f32 %v812_v17, %v4968_v58 }
 0x2b7   :  { %v807_v55 = vmax.f32 %v805_v41, %v4930_v56  ;;  %v830_v41 = vmax.f32 %v4848_v6, %v4858_v10  ;;  %v835_v0 = vmax.f32 %v833_v39, %v4882_v24 }
 0x2b9   :  { %v809_v11 = vmax.f32 %v807_v55, %v4940_v61 }
 0x2bb   :  { %v811_v15 = vmax.f32 %v809_v11, %v4952_v3  ;;  %v816_v11 = vmax.f32 %v814_v22, %v4986_v36  ;;  %v837_v3 = vmax.f32 %v835_v0, %v4892_v28 }
 0x2bc   :  { %v5022_v13 = vpop.f32.mrf.mxu2  ;;  %v5049_v7 = vpop.f32.mrf.mxu3 }
 0x2bd   :  { %v813_v55 = vmax.f32 %v811_v15, %v4964_v45  ;;  %8234 = vst [vmem:[#allocation44_spill] sm:$0xff] %v5049_v7  ;;  %v818_v15 = vmax.f32 %v816_v11, %v4998_v18 }
 0x2bf   :  { %v815_v12 = vmax.f32 %v813_v55, %v4982_v2  ;;  %v820_v55 = vmax.f32 %v818_v15, %v5022_v13 }
 0x2c1   :  { %3793 = vmatmul.msk.bf16.gmra.mxu2 %vm358_vm1, %v356_v9  ;;  %3825 = vmatmul.msk.bf16.gmra.mxu3 %vm358_vm1, %v356_v9  ;;  %v832_v9 = vmax.f32 %v830_v41, %v4868_v14  ;;  %v817_v50 = vmax.f32 %v815_v12, %v4994_v21  ;;  %v839_v41 = vmax.f32 %v837_v3, %v4902_v32 }
 0x2c3   :  { %v834_v48 = vmax.f32 %v832_v9, %v4878_v20  ;;  %v819_v39 = vmax.f32 %v817_v50, %v5010_v63  ;;  %v841_v9 = vmax.f32 %v839_v41, %v4912_v46 }
 0x2c4   :  { %v5038_v40 = vpop.f32.mrf.mxu2 }
 0x2c5   :  { %v836_v17 = vmax.f32 %v834_v48, %v4888_v26  ;;  %v821_v0 = vmax.f32 %v819_v39, %v5038_v40  ;;  %v843_v48 = vmax.f32 %v841_v9, %v4924_v54 }
 0x2c7   :  { %v838_v22 = vmax.f32 %v836_v17, %v4898_v30  ;;  %v845_v50 = vmax.f32 %v843_v48, %v4936_v60  ;;  %v5073_v17 = vpop.f32.mrf.mxu3 }
 0x2c8   :  { %8235 = vst [vmem:[#allocation45_spill] sm:$0xff] %v5073_v17 }
 0x2c9   :  { %v840_v11 = vmax.f32 %v838_v22, %v4908_v42  ;;  %v847_v39 = vmax.f32 %v845_v50, %v4948_v1 }
 0x2cb   :  { %v842_v3 = vmax.f32 %v840_v11, %v4920_v51  ;;  %v849_v9 = vmax.f32 %v847_v39, %v4960_v52 }
 0x2cc   :  { %v5059_v2 = vpop.f32.mrf.mxu2 }
 0x2cd   :  { %v822_v12 = vmax.f32 %v820_v55, %v5059_v2  ;;  %v844_v41 = vmax.f32 %v842_v3, %v4932_v57  ;;  %v851_v11 = vmax.f32 %v849_v9, %v4970_v33 }
 0x2cf   :  { %v823_v18 = vmax.f32 %v821_v0, %v822_v12  ;;  %v846_v22 = vmax.f32 %v844_v41, %v4942_v62 }
 0x2d1   :  { %v824_v15 = vrot.slane %v823_v18, 4  ;;  %3794 = vmatmul.msk.bf16.gmra.mxu2 %vm358_vm1, %v4914_v47  ;;  %3826 = vmatmul.msk.bf16.gmra.mxu3 %vm358_vm1, %v4914_v47  ;;  %v848_v12 = vmax.f32 %v846_v22, %v4954_v4  ;;  %v853_v47 = vmax.f32 %v851_v11, %v4988_v44  ;;  %v8239_v11 = vld [vmem:[#allocation30_spill] sm:$0xff] }
 0x2d3   :  { %v825_v55 = vmax.f32 %v823_v18, %v824_v15  ;;  %v850_v60 = vmax.f32 %v848_v12, %v4966_v34  ;;  %v855_v50 = vmax.f32 %v853_v47, %v5008_v37  ;;  %v5085_v18 = vpop.f32.mrf.mxu3  ;;  %v8237_v15 = vld [vmem:[#allocation41_spill] sm:$0xff]  ;;  %v8240_v47 = vld [vmem:[#allocation23_spill] sm:$0xff] }
 0x2d4   :  { %8236 = vst [vmem:[#allocation46_spill] sm:$0xff] %v5085_v18 }
 0x2d5   :  { %v826_v0 = vrot.slane %v825_v55, 2  ;;  %v852_v3 = vmax.f32 %v850_v60, %v4984_v35  ;;  %v857_v39 = vmax.f32 %v855_v50, %v5049_v7  ;;  %v8238_v60 = vld [vmem:[#allocation22_spill] sm:$0xff] }
 0x2d7   :  { %v827_v48 = vmax.f32 %v825_v55, %v826_v0  ;;  %v854_v41 = vmax.f32 %v852_v3, %v8237_v15  ;;  %v859_v55 = vmax.f32 %v857_v39, %v5085_v18 }
 0x2d9   :  { %v828_v54 = vrot.slane %v827_v48, 1  ;;  %v856_v22 = vmax.f32 %v854_v41, %v5026_v23 }
 0x2db   :  { %v5089_v52 = vmax.f32 %v827_v48, %v828_v54  ;;  %v858_v9 = vmax.f32 %v856_v22, %v5073_v17  ;;  %v8241_v48 = vld [vmem:[#allocation24_spill] sm:$0xff]  ;;  %v8243_v17 = vld [vmem:[#allocation27_spill] sm:$0xff] }
 0x2dd   :  { %v867_v0 = vsub.f32 %v4846_v5, %v5089_v52  ;;  %v869_v12 = vsub.f32 %v8238_v60, %v5089_v52  ;;  %v871_v3 = vsub.f32 %v8240_v47, %v5089_v52  ;;  %v860_v54 = vmax.f32 %v858_v9, %v859_v55  ;;  %v8242_v5 = vld [vmem:[#allocation26_spill] sm:$0xff] }
 0x2de   :  { %v873_v50 = vsub.f32 %v8241_v48, %v5089_v52  ;;  %v875_v22 = vsub.f32 %v8242_v5, %v5089_v52  ;;  %v877_v7 = vsub.f32 %v8243_v17, %v5089_v52  ;;  %v883_v17 = vsub.f32 %v4886_v25, %v5089_v52 }
 0x2df   :  { %v931_v41 = vmul.f32 1.442695, %v867_v0  ;;  %v935_v39 = vmul.f32 1.442695, %v869_v12  ;;  %v939_v18 = vmul.f32 1.442695, %v871_v3  ;;  %v887_v25 = vsub.f32 %v4896_v29, %v5089_v52 }
 0x2e0   :  { %v861_v60 = vrot.slane %v860_v54, 4  ;;  %v943_v47 = vmul.f32 1.442695, %v873_v50  ;;  %v947_v55 = vmul.f32 1.442695, %v875_v22  ;;  %v8244_v0 = vld [vmem:[#allocation28_spill] sm:$0xff]  ;;  %v891_v29 = vsub.f32 %v4906_v38, %v5089_v52 }
 0x2e1   :  { %3795 = vmatmul.msk.bf16.gmra.mxu2 %vm358_vm1, %v8239_v11  ;;  %3827 = vmatmul.msk.bf16.gmra.mxu3 %vm358_vm1, %v8239_v11  ;;  %3958 = vpow2.f32 %v931_v41  ;;  %v879_v11 = vsub.f32 %v4876_v19, %v5089_v52  ;;  %v881_v12 = vsub.f32 %v8244_v0, %v5089_v52  ;;  %v951_v48 = vmul.f32 1.442695, %v877_v7  ;;  %v8247_v22 = vld [vmem:[#allocation32_spill] sm:$0xff] }
 0x2e2   :  { %3960 = vpow2.f32 %v935_v39  ;;  %v862_v9 = vmax.f32 %v860_v54, %v861_v60  ;;  %v885_v54 = vsub.f32 %v4890_v27, %v5089_v52  ;;  %v889_v0 = vsub.f32 %v4900_v31, %v5089_v52 }
 0x2e3   :  { %3962 = vpow2.f32 %v939_v18  ;;  %v955_v50 = vmul.f32 1.442695, %v879_v11  ;;  %v959_v7 = vmul.f32 1.442695, %v881_v12  ;;  %v895_v38 = vsub.f32 %v4918_v49, %v5089_v52 }
 0x2e4   :  { %3964 = vpow2.f32 %v943_v47  ;;  %v863_v18 = vrot.slane %v862_v9, 2  ;;  %v963_v47 = vmul.f32 1.442695, %v883_v17  ;;  %v967_v12 = vmul.f32 1.442695, %v885_v54 }
 0x2e5   :  { %3966 = vpow2.f32 %v947_v55  ;;  %v971_v17 = vmul.f32 1.442695, %v887_v25  ;;  %v975_v31 = vmul.f32 1.442695, %v889_v0  ;;  %v979_v25 = vmul.f32 1.442695, %v891_v29 }
 0x2e6   :  { %3968 = vpow2.f32 %v951_v48  ;;  %v864_v27 = vmax.f32 %v862_v9, %v863_v18  ;;  %v893_v18 = vsub.f32 %v4910_v43, %v5089_v52  ;;  %v897_v0 = vsub.f32 %v4922_v53, %v5089_v52 }
 0x2e7   :  { %v5114_v5 = vpop.eup %3958  ;;  %3970 = vpow2.f32 %v955_v50  ;;  %v901_v49 = vsub.f32 %v4934_v59, %v5089_v52 }
 0x2e8   :  { %8245 = vst [vmem:[#allocation41_spill] sm:$0xff] %v5114_v5  ;;  %v5116_v3 = vpop.eup %3960  ;;  %3972 = vpow2.f32 %v959_v7  ;;  %v5151_v7 = vpop.f32.mrf.mxu2 }
 0x2e9   :  { %8246 = vst [vmem:[#allocation22_spill] sm:$0xff] %v5116_v3  ;;  %v1059_v19 = vadd.f32 %v5116_v3, %v5114_v5  ;;  %v5122_v41 = vpop.eup %3962  ;;  %3974 = vpow2.f32 %v963_v47 }
 0x2ea   :  { %v5129_v60 = vpop.eup %3964  ;;  %3976 = vpow2.f32 %v967_v12  ;;  %8248 = vst [vmem:[#allocation30_spill] sm:$0xff] %v5151_v7  ;;  %v983_v12 = vmul.f32 1.442695, %v893_v18  ;;  %v903_v18 = vsub.f32 %v4940_v61, %v5089_v52  ;;  %v8253_v61 = vld [vmem:[#allocation33_spill] sm:$0xff] }
 0x2eb   :  { %v1060_v39 = vadd.f32 %v5122_v41, %v1059_v19  ;;  %v5136_v55 = vpop.eup %3966  ;;  %3978 = vpow2.f32 %v971_v17 }
 0x2ec   :  { %v5141_v19 = vpop.eup %3968  ;;  %3980 = vpow2.f32 %v975_v31 }
 0x2ed   :  { %v1061_v11 = vadd.f32 %v5129_v60, %v1060_v39  ;;  %v865_v39 = vrot.slane %v864_v27, 1  ;;  %v5146_v9 = vpop.eup %3970  ;;  %3982 = vpow2.f32 %v979_v25  ;;  %v999_v25 = vmul.f32 1.442695, %v901_v49  ;;  %v8255_v49 = vld [vmem:[#allocation34_spill] sm:$0xff] }
 0x2ee   :  { %3984 = vpow2.f32 %v983_v12 }
 0x2ef   :  { %v1062_v48 = vadd.f32 %v5136_v55, %v1061_v11  ;;  %v5155_v11 = vpop.eup %3972 }
 0x2f0   :  { %v5162_v43 = vpop.eup %3974 }
 0x2f1   :  { %3796 = vmatmul.msk.bf16.gmra.mxu2 %vm358_vm1, %v8247_v22  ;;  %3828 = vmatmul.msk.bf16.gmra.mxu3 %vm358_vm1, %v8247_v22  ;;  %v1063_v50 = vadd.f32 %v5141_v19, %v1062_v48  ;;  %v5153_v22 = vpop.f32.mrf.mxu3  ;;  %v5160_v48 = vmax.f32 %v864_v27, %v865_v39  ;;  %v5169_v7 = vpop.eup %3976  ;;  %v987_v27 = vmul.f32 1.442695, %v895_v38  ;;  %v991_v39 = vmul.f32 1.442695, %v897_v0 }
 0x2f2   :  { %8249 = vst [vmem:[#allocation23_spill] sm:$0xff] %v5153_v22  ;;  %v5176_v53 = vpop.eup %3978 }
 0x2f3   :  { %v1064_v54 = vadd.f32 %v5146_v9, %v1063_v50  ;;  %v899_v50 = vsub.f32 %v4930_v56, %v5089_v52  ;;  %v868_v17 = vsub.f32 %v4848_v6, %v5160_v48  ;;  %v870_v56 = vsub.f32 %v4852_v8, %v5160_v48  ;;  %v5189_v6 = vpop.eup %3980 }
 0x2f4   :  { %3986 = vpow2.f32 %v987_v27  ;;  %v872_v8 = vsub.f32 %v4858_v10, %v5160_v48  ;;  %v1003_v10 = vmul.f32 1.442695, %v903_v18  ;;  %v878_v18 = vsub.f32 %v4872_v16, %v5160_v48 }
 0x2f5   :  { %v1065_v47 = vadd.f32 %v5155_v11, %v1064_v54  ;;  %v995_v31 = vmul.f32 1.442695, %v899_v50  ;;  %v5183_v54 = vpop.f32.mrf.mxu2  ;;  %v933_v12 = vmul.f32 1.442695, %v868_v17  ;;  %v5198_v50 = vpop.eup %3982  ;;  %3988 = vpow2.f32 %v991_v39  ;;  %v8256_v39 = vld [vmem:[#allocation36_spill] sm:$0xff] }
 0x2f6   :  { %8250 = vst [vmem:[#allocation24_spill] sm:$0xff] %v5183_v54  ;;  %v937_v27 = vmul.f32 1.442695, %v870_v56  ;;  %v907_v54 = vsub.f32 %v8255_v49, %v5089_v52  ;;  %v5205_v3 = vpop.eup %3984  ;;  %v876_v17 = vsub.f32 %v4868_v14, %v5160_v48 }
 0x2f7   :  { %v1066_v22 = vadd.f32 %v5162_v43, %v1065_v47  ;;  %v905_v47 = vsub.f32 %v8253_v61, %v5089_v52  ;;  %3990 = vpow2.f32 %v995_v31  ;;  %v909_v61 = vsub.f32 %v8256_v39, %v5089_v52 }
 0x2f8   :  { %3992 = vpow2.f32 %v999_v25  ;;  %v911_v25 = vsub.f32 %v4964_v45, %v5089_v52  ;;  %v1011_v14 = vmul.f32 1.442695, %v907_v54  ;;  %v949_v16 = vmul.f32 1.442695, %v876_v17 }
 0x2f9   :  { %v1067_v29 = vadd.f32 %v5169_v7, %v1066_v22  ;;  %v5185_v38 = vpop.f32.mrf.mxu3  ;;  %v8252_v22 = vld [vmem:[#allocation35_spill] sm:$0xff]  ;;  %v1007_v5 = vmul.f32 1.442695, %v905_v47  ;;  %3994 = vpow2.f32 %v933_v12  ;;  %v880_v12 = vsub.f32 %v4878_v20, %v5160_v48 }
 0x2fa   :  { %8251 = vst [vmem:[#allocation26_spill] sm:$0xff] %v5185_v38  ;;  %3996 = vpow2.f32 %v937_v27  ;;  %v913_v45 = vsub.f32 %v4968_v58, %v5089_v52  ;;  %v1015_v54 = vmul.f32 1.442695, %v909_v61  ;;  %v953_v39 = vmul.f32 1.442695, %v878_v18  ;;  %v8260_v20 = vld [vmem:[#allocation39_spill] sm:$0xff] }
 0x2fb   :  { %v1068_v59 = vadd.f32 %v5176_v53, %v1067_v29  ;;  %v8254_v29 = vld [vmem:[#allocation25_spill] sm:$0xff]  ;;  %3998 = vpow2.f32 %v1003_v10  ;;  %v915_v17 = vsub.f32 %v8260_v20, %v5089_v52  ;;  %v917_v61 = vsub.f32 %v4986_v36, %v5089_v52 }
 0x2fc   :  { %v874_v38 = vsub.f32 %v8254_v29, %v5160_v48  ;;  %v5212_v29 = vpop.eup %3986  ;;  %v886_v36 = vsub.f32 %v4892_v28, %v5160_v48  ;;  %v8267_v28 = vld [vmem:[#allocation42_spill] sm:$0xff] }
 0x2fd   :  { %v1069_v0 = vadd.f32 %v5189_v6, %v1068_v59  ;;  %v941_v59 = vmul.f32 1.442695, %v872_v8  ;;  %v5223_v49 = vpop.eup %3988 }
 0x2fe   :  { %v945_v31 = vmul.f32 1.442695, %v874_v38  ;;  %v5227_v27 = vpop.eup %3990 }
 0x2ff   :  { %4000 = vpow2.f32 %v941_v59  ;;  %v5232_v10 = vpop.eup %3992  ;;  %v1019_v59 = vmul.f32 1.442695, %v911_v25 }
 0x300   :  { %4002 = vpow2.f32 %v1007_v5 }
 0x301   :  { %3797 = vmatmul.msk.bf16.gmra.mxu2 %vm358_vm1, %v8252_v22  ;;  %3829 = vmatmul.msk.bf16.gmra.mxu3 %vm358_vm1, %v8252_v22  ;;  %v1070_v22 = vadd.f32 %v5198_v50, %v1069_v0  ;;  %v5219_v0 = vpop.f32.mrf.mxu2  ;;  %v5221_v47 = vpop.f32.mrf.mxu3  ;;  %4004 = vpow2.f32 %v945_v31  ;;  %v1023_v31 = vmul.f32 1.442695, %v913_v45 }
 0x302   :  { %8257 = vst [vmem:[#allocation27_spill] sm:$0xff] %v5219_v0  ;;  %4006 = vpow2.f32 %v1011_v14  ;;  %v8265_v0 = vld [vmem:[#allocation38_spill] sm:$0xff] }
 0x303   :  { %v1071_v56 = vadd.f32 %v5205_v3, %v1070_v22  ;;  %8258 = vst [vmem:[#allocation28_spill] sm:$0xff] %v5221_v47  ;;  %v882_v22 = vsub.f32 %v4882_v24, %v5160_v48  ;;  %4008 = vpow2.f32 %v949_v16  ;;  %v957_v24 = vmul.f32 1.442695, %v880_v12 }
 0x304   :  { %4010 = vpow2.f32 %v1015_v54  ;;  %v1027_v16 = vmul.f32 1.442695, %v915_v17 }
 0x305   :  { %v1072_v8 = vadd.f32 %v5212_v29, %v1071_v56  ;;  %v5236_v56 = vpop.eup %3994  ;;  %4012 = vpow2.f32 %v953_v39  ;;  %v888_v39 = vsub.f32 %v4898_v30, %v5160_v48  ;;  %v890_v30 = vsub.f32 %v4902_v32, %v5160_v48 }
 0x306   :  { %8259 = vst [vmem:[#allocation32_spill] sm:$0xff] %v5236_v56  ;;  %v5241_v5 = vpop.eup %3996  ;;  %4014 = vpow2.f32 %v1019_v59 }
 0x307   :  { %v1073_v38 = vadd.f32 %v5223_v49, %v1072_v8  ;;  %8261 = vst [vmem:[#allocation35_spill] sm:$0xff] %v5241_v5  ;;  %v884_v8 = vsub.f32 %v4888_v26, %v5160_v48  ;;  %v5247_v18 = vpop.eup %3998  ;;  %v1096_v25 = vadd.f32 %v5241_v5, %v5236_v56  ;;  %v961_v26 = vmul.f32 1.442695, %v882_v22 }
 0x308   :  { %v5252_v14 = vpop.eup %4000  ;;  %v921_v22 = vsub.f32 %v8267_v28, %v5089_v52  ;;  %4016 = vpow2.f32 %v957_v24  ;;  %v923_v28 = vsub.f32 %v5010_v63, %v5089_v52  ;;  %v892_v63 = vsub.f32 %v4908_v42, %v5160_v48 }
 0x309   :  { %v1074_v58 = vadd.f32 %v5227_v27, %v1073_v38  ;;  %8262 = vst [vmem:[#allocation33_spill] sm:$0xff] %v5252_v14  ;;  %v919_v38 = vsub.f32 %v4994_v21, %v5089_v52  ;;  %v5258_v12 = vpop.eup %4002  ;;  %v1097_v54 = vadd.f32 %v5252_v14, %v1096_v25  ;;  %v5264_v47 = vpop.f32.mrf.mxu3  ;;  %v965_v17 = vmul.f32 1.442695, %v884_v8 }
 0x30a   :  { %8264 = vst [vmem:[#allocation34_spill] sm:$0xff] %v5264_v47  ;;  %v5268_v21 = vpop.eup %4004  ;;  %4018 = vpow2.f32 %v1023_v31  ;;  %v969_v8 = vmul.f32 1.442695, %v886_v36  ;;  %v973_v32 = vmul.f32 1.442695, %v888_v39 }
 0x30b   :  { %v1075_v20 = vadd.f32 %v5232_v10, %v1074_v58  ;;  %v5262_v58 = vpop.f32.mrf.mxu2  ;;  %8266 = vst [vmem:[#allocation36_spill] sm:$0xff] %v5268_v21  ;;  %v5276_v59 = vpop.eup %4006  ;;  %v1098_v47 = vadd.f32 %v5268_v21, %v1097_v54  ;;  %4020 = vpow2.f32 %v961_v26  ;;  %v925_v54 = vsub.f32 %v5022_v13, %v5089_v52 }
 0x30c   :  { %8263 = vst [vmem:[#allocation25_spill] sm:$0xff] %v5262_v58  ;;  %v5280_v58 = vpop.eup %4008  ;;  %4022 = vpow2.f32 %v1027_v16  ;;  %v1039_v36 = vmul.f32 1.442695, %v921_v22  ;;  %v894_v13 = vsub.f32 %v4912_v46, %v5160_v48  ;;  %v977_v42 = vmul.f32 1.442695, %v890_v30 }
 0x30d   :  { %v1076_v45 = vadd.f32 %v5247_v18, %v1075_v20  ;;  %v1031_v20 = vmul.f32 1.442695, %v917_v61  ;;  %8268 = vst [vmem:[#allocation39_spill] sm:$0xff] %v5280_v58  ;;  %v5286_v24 = vpop.eup %4010  ;;  %v1099_v31 = vadd.f32 %v5280_v58, %v1098_v47  ;;  %4024 = vpow2.f32 %v965_v17 }
 0x30e   :  { %v927_v47 = vsub.f32 %v5038_v40, %v5089_v52  ;;  %v1043_v39 = vmul.f32 1.442695, %v923_v28  ;;  %v929_v40 = vsub.f32 %v5059_v2, %v5089_v52  ;;  %v896_v46 = vsub.f32 %v4920_v51, %v5160_v48 }
 0x30f   :  { %v1077_v25 = vadd.f32 %v5258_v12, %v1076_v45  ;;  %v5290_v45 = vpop.eup %4012  ;;  %4026 = vpow2.f32 %v1031_v20  ;;  %v981_v30 = vmul.f32 1.442695, %v892_v63  ;;  %v1047_v28 = vmul.f32 1.442695, %v925_v54 }
 0x310   :  { %8269 = vst [vmem:[#allocation38_spill] sm:$0xff] %v5290_v45  ;;  %v5296_v26 = vpop.eup %4014  ;;  %v1100_v16 = vadd.f32 %v5290_v45, %v1099_v31  ;;  %4028 = vpow2.f32 %v969_v8  ;;  %v985_v52 = vmul.f32 1.442695, %v894_v13  ;;  %v1051_v51 = vmul.f32 1.442695, %v927_v47 }
 0x311   :  { %3798 = vmatmul.msk.bf16.gmra.mxu2 %vm358_vm1, %v8265_v0  ;;  %3830 = vmatmul.msk.bf16.gmra.mxu3 %vm358_vm1, %v8265_v0  ;;  %v1035_v0 = vmul.f32 1.442695, %v919_v38  ;;  %v1078_v61 = vadd.f32 %v5276_v59, %v1077_v25  ;;  %v5300_v25 = vpop.eup %4016  ;;  %v5312_v31 = vpop.f32.mrf.mxu3 }
 0x312   :  { %8270 = vst [vmem:[#allocation42_spill] sm:$0xff] %v5300_v25  ;;  %v5306_v17 = vpop.eup %4018  ;;  %v1101_v20 = vadd.f32 %v5300_v25, %v1100_v16 }
 0x313   :  { %v1079_v38 = vadd.f32 %v5286_v24, %v1078_v61  ;;  %4030 = vpow2.f32 %v1035_v0  ;;  %v5310_v61 = vpop.f32.mrf.mxu2  ;;  %8272 = vst [vmem:[#allocation48_spill] sm:$0xff] %v5312_v31  ;;  %v5314_v5 = vpop.eup %4020  ;;  %v8274_v31 = vld [vmem:[#allocation29_spill] sm:$0xff] }
 0x314   :  { %8271 = vst [vmem:[#allocation47_spill] sm:$0xff] %v5310_v61  ;;  %4032 = vpow2.f32 %v973_v32  ;;  %v5320_v8 = vpop.eup %4022  ;;  %v898_v61 = vsub.f32 %v8274_v31, %v5160_v48  ;;  %v8275_v31 = vld [vmem:[#allocation31_spill] sm:$0xff] }
 0x315   :  { %v1080_v22 = vadd.f32 %v5296_v26, %v1079_v38  ;;  %8273 = vst [vmem:[#allocation49_spill] sm:$0xff] %v5314_v5  ;;  %4034 = vpow2.f32 %v1039_v36  ;;  %v1102_v38 = vadd.f32 %v5314_v5, %v1101_v20  ;;  %v5324_v16 = vpop.eup %4024  ;;  %v900_v36 = vsub.f32 %v4932_v57, %v5160_v48 }
 0x316   :  { %4036 = vpow2.f32 %v977_v42  ;;  %v5328_v2 = vpop.eup %4026  ;;  %v1055_v42 = vmul.f32 1.442695, %v929_v40 }
 0x317   :  { %v1081_v0 = vadd.f32 %v5306_v17, %v1080_v22  ;;  %4038 = vpow2.f32 %v1043_v39  ;;  %v1103_v32 = vadd.f32 %v5324_v16, %v1102_v38  ;;  %v5332_v54 = vpop.eup %4028  ;;  %v989_v22 = vmul.f32 1.442695, %v896_v46 }
 0x318   :  { %4040 = vpow2.f32 %v981_v30  ;;  %v993_v38 = vmul.f32 1.442695, %v898_v61  ;;  %v997_v61 = vmul.f32 1.442695, %v900_v36 }
 0x319   :  { %v1082_v63 = vadd.f32 %v5320_v8, %v1081_v0  ;;  %v5336_v20 = vpop.eup %4030  ;;  %4042 = vpow2.f32 %v1047_v28  ;;  %v1104_v39 = vadd.f32 %v5332_v54, %v1103_v32  ;;  %v902_v0 = vsub.f32 %v8275_v31, %v5160_v48  ;;  %v5350_v40 = vpop.f32.mrf.mxu3  ;;  %v8278_v28 = vld [vmem:[#allocation40_spill] sm:$0xff] }
 0x31a   :  { %v5340_v47 = vpop.eup %4032  ;;  %4044 = vpow2.f32 %v985_v52  ;;  %8277 = vst [vmem:[#allocation31_spill] sm:$0xff] %v5350_v40  ;;  %v904_v52 = vsub.f32 %v4942_v62, %v5160_v48  ;;  %v906_v31 = vsub.f32 %v4948_v1, %v5160_v48 }
 0x31b   :  { %v1083_v13 = vadd.f32 %v5328_v2, %v1082_v63  ;;  %v5344_v56 = vpop.eup %4034  ;;  %4046 = vpow2.f32 %v1051_v51  ;;  %v1105_v46 = vadd.f32 %v5340_v47, %v1104_v39  ;;  %v5348_v30 = vpop.f32.mrf.mxu2  ;;  %v1001_v40 = vmul.f32 1.442695, %v902_v0 }
 0x31c   :  { %8276 = vst [vmem:[#allocation29_spill] sm:$0xff] %v5348_v30  ;;  %v5354_v63 = vpop.eup %4036  ;;  %4048 = vpow2.f32 %v989_v22 }
 0x31d   :  { %v1084_v57 = vadd.f32 %v5336_v20, %v1083_v13  ;;  %v5360_v51 = vpop.eup %4038  ;;  %4050 = vpow2.f32 %v1055_v42  ;;  %v1106_v13 = vadd.f32 %v5354_v63, %v1105_v46  ;;  %v908_v42 = vsub.f32 %v4954_v4, %v5160_v48 }
 0x31e   :  { %v5364_v39 = vpop.eup %4040  ;;  %4052 = vpow2.f32 %v993_v38  ;;  %v8279_v38 = vld [vmem:[#allocation37_spill] sm:$0xff] }
 0x31f   :  { %v1085_v32 = vadd.f32 %v5344_v56, %v1084_v57  ;;  %v5368_v62 = vpop.eup %4042  ;;  %v1107_v22 = vadd.f32 %v5364_v39, %v1106_v13  ;;  %4054 = vpow2.f32 %v997_v61  ;;  %v1005_v57 = vmul.f32 1.442695, %v904_v52 }
 0x320   :  { %4056 = vpow2.f32 %v1001_v40  ;;  %v1009_v13 = vmul.f32 1.442695, %v906_v31  ;;  %v1013_v45 = vmul.f32 1.442695, %v908_v42 }
 0x321   :  { %3799 = vmatmul.msk.bf16.gmra.mxu2 %vm358_vm1, %v8278_v28  ;;  %3831 = vmatmul.msk.bf16.gmra.mxu3 %vm358_vm1, %v8278_v28  ;;  %v1086_v36 = vadd.f32 %v5360_v51, %v1085_v32  ;;  %v5372_v28 = vpop.eup %4044  ;;  %v910_v32 = vsub.f32 %v8279_v38, %v5160_v48  ;;  %v5390_v61 = vpop.f32.mrf.mxu3  ;;  %4058 = vpow2.f32 %v1005_v57 }
 0x322   :  { %v5376_v46 = vpop.eup %4046  ;;  %v1108_v1 = vadd.f32 %v5372_v28, %v1107_v22  ;;  %8281 = vst [vmem:[#allocation37_spill] sm:$0xff] %v5390_v61  ;;  %v912_v22 = vsub.f32 %v4966_v34, %v5160_v48  ;;  %4060 = vpow2.f32 %v1009_v13  ;;  %v916_v34 = vsub.f32 %v4984_v35, %v5160_v48  ;;  %v8285_v35 = vld [vmem:[#allocation43_spill] sm:$0xff] }
 0x323   :  { %v1087_v30 = vadd.f32 %v5368_v62, %v1086_v36  ;;  %v5380_v0 = vpop.eup %4048  ;;  %v5388_v52 = vpop.f32.mrf.mxu2  ;;  %4062 = vpow2.f32 %v1013_v45 }
 0x324   :  { %v5384_v21 = vpop.eup %4050  ;;  %v1109_v4 = vadd.f32 %v5380_v0, %v1108_v1  ;;  %8280 = vst [vmem:[#allocation40_spill] sm:$0xff] %v5388_v52  ;;  %v1017_v1 = vmul.f32 1.442695, %v910_v32  ;;  %v1021_v42 = vmul.f32 1.442695, %v912_v22 }
 0x325   :  { %v1088_v14 = vadd.f32 %v5376_v46, %v1087_v30  ;;  %v5392_v36 = vpop.eup %4052  ;;  %v914_v30 = vsub.f32 %v4970_v33, %v5160_v48  ;;  %v918_v33 = vsub.f32 %v4988_v44, %v5160_v48 }
 0x326   :  { %v1110_v31 = vadd.f32 %v5392_v36, %v1109_v4  ;;  %v5398_v38 = vpop.eup %4054  ;;  %4064 = vpow2.f32 %v1017_v1 }
 0x327   :  { %v1089_v40 = vadd.f32 %v5384_v21, %v1088_v14  ;;  %v5403_v58 = vpop.eup %4056  ;;  %v1025_v32 = vmul.f32 1.442695, %v914_v30  ;;  %4066 = vpow2.f32 %v1021_v42  ;;  %v922_v30 = vsub.f32 %v5008_v37, %v5160_v48 }
 0x328   :  { %v1111_v61 = vadd.f32 %v5398_v38, %v1110_v31  ;;  %8282 = vst [vmem:[#allocation50_spill] sm:$0xff] %v5403_v58  ;;  %v5408_v4 = vpop.eup %4058  ;;  %v1033_v1 = vmul.f32 1.442695, %v918_v33 }
 0x329   :  { %v1090_v52 = vrot.slane %v1089_v40, 4  ;;  %v5415_v25 = vpop.f32.mrf.mxu3  ;;  %v5419_v45 = vpop.eup %4060  ;;  %4068 = vpow2.f32 %v1025_v32  ;;  %v1041_v33 = vmul.f32 1.442695, %v922_v30  ;;  %v8287_v32 = vld [vmem:[#allocation45_spill] sm:$0xff] }
 0x32a   :  { %v1112_v57 = vadd.f32 %v5403_v58, %v1111_v61  ;;  %8284 = vst [vmem:[#allocation52_spill] sm:$0xff] %v5415_v25  ;;  %v1029_v61 = vmul.f32 1.442695, %v916_v34 }
 0x32b   :  { %v1091_v14 = vadd.f32 %v1090_v52, %v1089_v40  ;;  %v5413_v5 = vpop.f32.mrf.mxu2  ;;  %v920_v52 = vsub.f32 %v8237_v15, %v5160_v48  ;;  %v5426_v40 = vpop.eup %4062  ;;  %v924_v15 = vsub.f32 %v5026_v23, %v5160_v48 }
 0x32c   :  { %v1113_v31 = vadd.f32 %v5408_v4, %v1112_v57  ;;  %8283 = vst [vmem:[#allocation51_spill] sm:$0xff] %v5413_v5  ;;  %v5431_v5 = vpop.eup %4064  ;;  %4070 = vpow2.f32 %v1029_v61 }
 0x32d   :  { %v1092_v13 = vrot.slane %v1091_v14, 2  ;;  %v1037_v34 = vmul.f32 1.442695, %v920_v52  ;;  %4072 = vpow2.f32 %v1033_v1 }
 0x32e   :  { %v1114_v22 = vadd.f32 %v5419_v45, %v1113_v31  ;;  %v8286_v31 = vld [vmem:[#allocation44_spill] sm:$0xff] }
 0x32f   :  { %v1093_v44 = vadd.f32 %v1092_v13, %v1091_v14  ;;  %v5436_v13 = vpop.eup %4066  ;;  %v926_v37 = vsub.f32 %v8286_v31, %v5160_v48 }
 0x330   :  { %v1115_v25 = vadd.f32 %v5426_v40, %v1114_v22  ;;  %v5447_v52 = vpop.eup %4068 }
 0x331   :  { %3800 = vmatmul.msk.bf16.gmra.mxu2 %vm358_vm1, %v8285_v35  ;;  %3832 = vmatmul.msk.bf16.gmra.mxu3 %vm358_vm1, %v8285_v35  ;;  %v1094_v57 = vrot.slane %v1093_v44, 1  ;;  %v928_v35 = vsub.f32 %v8287_v32, %v5160_v48  ;;  %v5445_v23 = vpop.f32.mrf.mxu3 }
 0x332   :  { %v1116_v14 = vadd.f32 %v5431_v5, %v1115_v25  ;;  %8289 = vst [vmem:[#allocation44_spill] sm:$0xff] %v5445_v23  ;;  %v8290_v25 = vld [vmem:[#allocation46_spill] sm:$0xff]  ;;  %v5452_v30 = vpop.eup %4070 }
 0x333   :  { %v1095_v42 = vadd.f32 %v1094_v57, %v1093_v44  ;;  %v5443_v58 = vpop.f32.mrf.mxu2  ;;  %v930_v61 = vsub.f32 %v8290_v25, %v5160_v48  ;;  %v1045_v44 = vmul.f32 1.442695, %v924_v15  ;;  %v1049_v57 = vmul.f32 1.442695, %v926_v37  ;;  %v5455_v31 = vpop.eup %4072 }
 0x334   :  { %v1117_v22 = vadd.f32 %v5436_v13, %v1116_v14  ;;  %8288 = vst [vmem:[#allocation43_spill] sm:$0xff] %v5443_v58  ;;  %v357_v15 = vpop.trf.xlu0 }
 0x335   :  { %4074 = vrcp.f32 %v1095_v42  ;;  %v1053_v42 = vmul.f32 1.442695, %v928_v35  ;;  %v1057_v32 = vmul.f32 1.442695, %v930_v61 }
 0x336   :  { %4076 = vpow2.f32 %v1037_v34  ;;  %v1118_v1 = vadd.f32 %v5447_v52, %v1117_v22 }
 0x337   :  { %4078 = vpow2.f32 %v1041_v33 }
 0x338   :  { %v1119_v14 = vadd.f32 %v5452_v30, %v1118_v1  ;;  %4080 = vpow2.f32 %v1045_v44 }
 0x339   :  { %4082 = vpow2.f32 %v1049_v57  ;;  %v5465_v37 = vpop.f32.mrf.mxu3 }
 0x33a   :  { %v1120_v58 = vadd.f32 %v5455_v31, %v1119_v14  ;;  %4084 = vpow2.f32 %v1053_v42  ;;  %8291 = vst [vmem:[#allocation45_spill] sm:$0xff] %v5465_v37 }
 0x33b   :  { %v5457_v23 = vpop.eup %4074  ;;  %v5463_v33 = vpop.f32.mrf.mxu2  ;;  %4086 = vpow2.f32 %v1057_v32 }
 0x33c   :  { %v5460_v48 = vpop.eup %4076  ;;  %v1163_v22 = vmul.f32 %v5457_v23, %v5212_v29  ;;  %v1165_v25 = vmul.f32 %v5457_v23, %v5223_v49  ;;  %v1197_v44 = vmul.f32 %v5457_v23, %v5384_v21  ;;  %v1159_v1 = vmul.f32 %v5457_v23, %v5198_v50 }
 0x33d   :  { %v1121_v34 = vadd.f32 %v5460_v48, %v1120_v58  ;;  %v5468_v35 = vpop.eup %4078  ;;  %v1195_v58 = vmul.f32 %v5457_v23, %v5376_v46  ;;  %v1161_v29 = vmul.f32 %v5457_v23, %v5205_v3  ;;  %v1191_v49 = vmul.f32 %v5457_v23, %v5360_v51 }
 0x33e   :  { %v5482_v57 = vpop.eup %4080  ;;  %v1213_v42 = vpack.c.bf16 %v1165_v25, %v1163_v22  ;;  %v1193_v14 = vmul.f32 %v5457_v23, %v5368_v62 }
 0x33f   :  { %v1122_v61 = vadd.f32 %v5468_v35, %v1121_v34  ;;  %v1229_v32 = vpack.c.bf16 %v1197_v44, %v1195_v58  ;;  %v1211_v21 = vpack.c.bf16 %v1161_v29, %v1159_v1  ;;  %v1157_v58 = vmul.f32 %v5457_v23, %v5189_v6 }
 0x340   :  { %1669 = vmatpush.bf16.msrb.mxu0 %v1213_v42  ;;  %v1227_v50 = vpack.c.bf16 %v1193_v14, %v1191_v49  ;;  %v1187_v1 = vmul.f32 %v5457_v23, %v5336_v20  ;;  %v1189_v42 = vmul.f32 %v5457_v23, %v5344_v56  ;;  %v1151_v49 = vmul.f32 %v5457_v23, %v5162_v43 }
 0x341   :  { %3801 = vmatmul.msk.bf16.gmra.mxu2 %vm358_vm1, %v357_v15  ;;  %3833 = vmatmul.msk.bf16.gmra.mxu3 %vm358_vm1, %v357_v15  ;;  %v1123_v46 = vadd.f32 %v5482_v57, %v1122_v61  ;;  %v5491_v15 = vpop.eup %4082  ;;  %v5501_v62 = vpop.f32.mrf.mxu3  ;;  %v1155_v61 = vmul.f32 %v5457_v23, %v5176_v53  ;;  %v1153_v14 = vmul.f32 %v5457_v23, %v5169_v7  ;;  %v4526_v7 = vld [vmem:[%s7999_s1] sm:$0xff] }
 0x342   :  { %v5493_v34 = vpop.eup %4084  ;;  %1682 = vmatpush.bf16.msrb.mxu1 %v1229_v32  ;;  %v1183_v6 = vmul.f32 %v5457_v23, %v5320_v8  ;;  %v1185_v32 = vmul.f32 %v5457_v23, %v5328_v2  ;;  %v1147_v8 = vmul.f32 %v5457_v23, %v5146_v9  ;;  %v1149_v2 = vmul.f32 %v5457_v23, %v5155_v11 }
 0x343   :  { %v1124_v22 = vadd.f32 %v5491_v15, %v1123_v46  ;;  %v5496_v3 = vpop.eup %4086  ;;  %v5499_v25 = vpop.f32.mrf.mxu2  ;;  %v1209_v29 = vpack.c.bf16 %v1157_v58, %v1155_v61  ;;  %v1225_v46 = vpack.c.bf16 %v1189_v42, %v1187_v1  ;;  %v1179_v61 = vmul.f32 %v5457_v23, %v5296_v26 }
 0x344   :  { %1670 = vmatpush.bf16.msrb.mxu0 %v1211_v21  ;;  %v1207_v21 = vpack.c.bf16 %v1153_v14, %v1151_v49  ;;  %v1223_v43 = vpack.c.bf16 %v1185_v32, %v1183_v6  ;;  %v1181_v58 = vmul.f32 %v5457_v23, %v5306_v17  ;;  %v1205_v1 = vpack.c.bf16 %v1149_v2, %v1147_v8  ;;  %v8293_v32 = vld [vmem:[#allocation41_spill] sm:$0xff]  ;;  %v8296_v8 = vld [vmem:[#allocation16_spill] sm:$0xff] }
 0x345   :  { %v1125_v51 = vadd.f32 %v5493_v34, %v1124_v22  ;;  %v1145_v42 = vmul.f32 %v5457_v23, %v5141_v19  ;;  %v1175_v9 = vmul.f32 %v5457_v23, %v5276_v59  ;;  %v1177_v11 = vmul.f32 %v5457_v23, %v5286_v24  ;;  %v4527_v19 = vld [vmem:[%s7999_s1 + $0x8] sm:$0xff] }
 0x346   :  { %1683 = vmatpush.bf16.msrb.mxu1 %v1227_v50  ;;  %v1221_v26 = vpack.c.bf16 %v1181_v58, %v1179_v61  ;;  %v1139_v59 = vmul.f32 %v5457_v23, %v5122_v41  ;;  %v1141_v24 = vmul.f32 %v5457_v23, %v5129_v60  ;;  %v1173_v6 = vmul.f32 %v5457_v23, %v5258_v12 }
 0x347   :  { %v1126_v44 = vadd.f32 %v5496_v3, %v1125_v51  ;;  %v1219_v49 = vpack.c.bf16 %v1177_v11, %v1175_v9  ;;  %v1167_v60 = vmul.f32 %v5457_v23, %v5227_v27 }
 0x348   :  { %1671 = vmatpush.bf16.msrb.mxu0 %v1209_v29 }
 0x349   :  { %v1127_v53 = vrot.slane %v1126_v44, 4  ;;  %v5522_v22 = vpop.f32.mrf.mxu3 }
 0x34a   :  { %1684 = vmatpush.bf16.msrb.mxu1 %v1225_v46  ;;  %8292 = vst [vmem:[#allocation46_spill] sm:$0xff] %v5522_v22  ;;  %v1171_v46 = vmul.f32 %v5457_v23, %v5247_v18  ;;  %v5570_v18 = vpop.permute.xlu1 %105 }
 0x34b   :  { %v1128_v20 = vadd.f32 %v1127_v53, %v1126_v44  ;;  %v5520_v50 = vpop.f32.mrf.mxu2  ;;  %v1143_v44 = vmul.f32 %v5457_v23, %v5136_v55  ;;  %8295 = vst [vmem:[#allocation41_spill] sm:$0xff] %v5570_v18  ;;  %v218_v2 = vadd.f32 %v8296_v8, %v5570_v18 }
 0x34c   :  { %1672 = vmatpush.bf16.msrb.mxu0 %v1207_v21  ;;  %v8294_v21 = vld [vmem:[#allocation22_spill] sm:$0xff]  ;;  %v1217_v41 = vpack.c.bf16 %v1173_v6, %v1171_v46  ;;  %v4529_v46 = vld [vmem:[%s7999_s1 + $0x18] sm:$0xff] }
 0x34d   :  { %v1129_v56 = vrot.slane %v1128_v20, 2  ;;  %v1203_v14 = vpack.c.bf16 %v1145_v42, %v1143_v44 }
 0x34e   :  { %1685 = vmatpush.bf16.msrb.mxu1 %v1223_v43  ;;  %v1201_v43 = vpack.c.bf16 %v1141_v24, %v1139_v59 }
 0x34f   :  { %v1130_v51 = vadd.f32 %v1129_v56, %v1128_v20  ;;  %v1135_v20 = vmul.f32 %v5457_v23, %v8293_v32  ;;  %v1137_v56 = vmul.f32 %v5457_v23, %v8294_v21 }
 0x350   :  { %1673 = vmatpush.bf16.msrb.mxu0 %v1205_v1 }
 0x351   :  { %3848 = vmatmul.msk.f32.vlgmr.msrb.gmra.mxu2 %vm133_vm0, %v4526_v7  ;;  %3862 = vmatmul.msk.f32.vlgmr.msrb.gmra.mxu3 %vm133_vm0, %v4526_v7  ;;  %v1131_v29 = vrot.slane %v1130_v51, 1  ;;  %v5547_v53 = vpop.f32.mrf.mxu3  ;;  %v1169_v7 = vmul.f32 %v5457_v23, %v5232_v10  ;;  %v1199_v58 = vpack.c.bf16 %v1137_v56, %v1135_v20 }
 0x352   :  { %1686 = vmatpush.bf16.msrb.mxu1 %v1221_v26 }
 0x353   :  { %v1132_v17 = vadd.f32 %v1131_v29, %v1130_v51  ;;  %v5545_v55 = vpop.f32.mrf.mxu2  ;;  %v8297_v51 = vld [vmem:[#allocation17_spill] sm:$0xff]  ;;  %v1215_v9 = vpack.c.bf16 %v1169_v7, %v1167_v60  ;;  %v8302_v60 = vld [vmem:[#allocation50_spill] sm:$0xff] }
 0x354   :  { %1674 = vmatpush.bf16.msrb.mxu0 %v1203_v14  ;;  %v277_v61 = vadd.f32 %v8297_v51, %v5570_v18  ;;  %v8328_v18 = vld [vmem:[#allocation23_spill] sm:$0xff] }
 0x355   :  { %4088 = vrcp.f32 %v1132_v17 }
 0x356   :  { %1687 = vmatpush.bf16.msrb.mxu1 %v1219_v49  ;;  %v5602_v49 = vpack.c.bf16 %v218_v2, %v218_v2  ;;  %v5608_v14 = vpack.c.bf16 %v277_v61, %v277_v61 }
 0x358   :  { %1675 = vmatpush.bf16.msrb.mxu0 %v1201_v43  ;;  %v8301_v43 = vld [vmem:[#allocation49_spill] sm:$0xff] }
 0x359   :  { %3849 = vmatmul.msk.f32.gmra.mxu2 %vm133_vm0, %v4527_v19  ;;  %3863 = vmatmul.msk.f32.gmra.mxu3 %vm133_vm0, %v4527_v19  ;;  %v5588_v42 = vpop.f32.mrf.mxu3 }
 0x35a   :  { %1688 = vmatpush.bf16.msrb.mxu1 %v1217_v41  ;;  %8298 = vst [vmem:[#allocation22_spill] sm:$0xff] %v5588_v42 }
 0x35b   :  { %v5572_v12 = vpop.eup %4088  ;;  %v5586_v1 = vpop.f32.mrf.mxu2 }
 0x35c   :  { %v1164_v44 = vmul.f32 %v5572_v12, %v5380_v0  ;;  %v1166_v27 = vmul.f32 %v5572_v12, %v5392_v36  ;;  %v1196_v10 = vmul.f32 %v5572_v12, %v5493_v34  ;;  %v1198_v23 = vmul.f32 %v5572_v12, %v5496_v3  ;;  %v4528_v36 = vld [vmem:[%s7999_s1 + $0x10] sm:$0xff]  ;;  %1676 = vmatpush.bf16.msrb.mxu0 %v1199_v58  ;;  %v4530_v58 = vld [vmem:[%s7999_s1 + $0x20] sm:$0xff] }
 0x35d   :  { %v1160_v11 = vmul.f32 %v5572_v12, %v5364_v39  ;;  %v1162_v0 = vmul.f32 %v5572_v12, %v5372_v28  ;;  %v1192_v29 = vmul.f32 %v5572_v12, %v5482_v57  ;;  %v1194_v26 = vmul.f32 %v5572_v12, %v5491_v15 }
 0x35e   :  { %v1214_v34 = vpack.c.bf16 %v1166_v27, %v1164_v44  ;;  %v1230_v3 = vpack.c.bf16 %v1198_v23, %v1196_v10  ;;  %1689 = vmatpush.bf16.msrb.mxu1 %v1215_v9  ;;  %v1156_v28 = vmul.f32 %v5572_v12, %v5340_v47  ;;  %v1158_v17 = vmul.f32 %v5572_v12, %v5354_v63  ;;  %v8304_v10 = vld [vmem:[#allocation39_spill] sm:$0xff]  ;;  %v8305_v23 = vld [vmem:[#allocation38_spill] sm:$0xff] }
 0x35f   :  { %v1212_v39 = vpack.c.bf16 %v1162_v0, %v1160_v11  ;;  %1677 = vmatmul.bf16.vlgmr.msrb.gmra.mxu0 %v5602_v49  ;;  %v1228_v15 = vpack.c.bf16 %v1194_v26, %v1192_v29  ;;  %v1188_v19 = vmul.f32 %v5572_v12, %v5460_v48  ;;  %v1190_v47 = vmul.f32 %v5572_v12, %v5468_v35  ;;  %v8306_v11 = vld [vmem:[#allocation33_spill] sm:$0xff] }
 0x360   :  { %1695 = vmatpush.bf16.msra.mxu0 %v1214_v34  ;;  %v1210_v57 = vpack.c.bf16 %v1158_v17, %v1156_v28  ;;  %v1152_v24 = vmul.f32 %v5572_v12, %v5324_v16  ;;  %v1176_v48 = vmul.f32 %v5572_v12, %v5426_v40  ;;  %v1178_v35 = vmul.f32 %v5572_v12, %v5431_v5  ;;  %v4531_v26 = vld [vmem:[%s7999_s1 + $0x28] sm:$0xff]  ;;  %v8308_v28 = vld [vmem:[#allocation32_spill] sm:$0xff] }
 0x361   :  { %3850 = vmatmul.msk.f32.gmra.mxu2 %vm133_vm0, %v4528_v36  ;;  %3864 = vmatmul.msk.f32.gmra.mxu3 %vm133_vm0, %v4528_v36  ;;  %v5619_v59 = vpop.f32.mrf.mxu3  ;;  %v1226_v6 = vpack.c.bf16 %v1190_v47, %v1188_v19  ;;  %v1154_v32 = vmul.f32 %v5572_v12, %v5332_v54  ;;  %v1184_v20 = vmul.f32 %v5572_v12, %v5452_v30  ;;  %v8300_v54 = vld [vmem:[#allocation42_spill] sm:$0xff]  ;;  %v8307_v36 = vld [vmem:[#allocation36_spill] sm:$0xff] }
 0x362   :  { %1708 = vmatpush.bf16.msra.mxu1 %v1230_v3  ;;  %v1186_v16 = vmul.f32 %v5572_v12, %v5455_v31  ;;  %v1220_v21 = vpack.c.bf16 %v1178_v35, %v1176_v48  ;;  %v1172_v56 = vmul.f32 %v5572_v12, %v5408_v4  ;;  %v1174_v40 = vmul.f32 %v5572_v12, %v5419_v45  ;;  %v4533_v35 = vld [vmem:[%s7999_s1 + $0x38] sm:$0xff] }
 0x363   :  { %1690 = vmatmul.bf16.vlgmr.msrb.gmra.mxu1 %v5608_v14  ;;  %v5617_v63 = vpop.f32.mrf.mxu2  ;;  %v1168_v5 = vmul.f32 %v5572_v12, %v5398_v38  ;;  %v1148_v30 = vmul.f32 %v5572_v12, %v8300_v54  ;;  %v1150_v31 = vmul.f32 %v5572_v12, %v8301_v43  ;;  %v1170_v4 = vmul.f32 %v5572_v12, %v8302_v60 }
 0x364   :  { %1696 = vmatpush.bf16.msra.mxu0 %v1212_v39  ;;  %8299 = vst [vmem:[#allocation16_spill] sm:$0xff] %v5617_v63  ;;  %v1218_v41 = vpack.c.bf16 %v1174_v40, %v1172_v56  ;;  %v1208_v7 = vpack.c.bf16 %v1154_v32, %v1152_v24  ;;  %v1224_v8 = vpack.c.bf16 %v1186_v16, %v1184_v20  ;;  %v4535_v16 = vld [vmem:[%s7999_s1 + $0x48] sm:$0xff]  ;;  %v4536_v40 = vld [vmem:[%s7999_s1 + $0x50] sm:$0xff] }
 0x365   :  { %v1180_v45 = vmul.f32 %v5572_v12, %v5436_v13  ;;  %v1182_v38 = vmul.f32 %v5572_v12, %v5447_v52  ;;  %v1216_v2 = vpack.c.bf16 %v1170_v4, %v1168_v5  ;;  %v1206_v44 = vpack.c.bf16 %v1150_v31, %v1148_v30  ;;  %v4537_v30 = vld [vmem:[%s7999_s1 + $0x58] sm:$0xff]  ;;  %v4539_v4 = vld [vmem:[%s7999_s1 + $0x68] sm:$0xff] }
 0x366   :  { %1709 = vmatpush.bf16.msra.mxu1 %v1228_v15  ;;  %v1144_v13 = vmul.f32 %v5572_v12, %v8304_v10  ;;  %v1146_v52 = vmul.f32 %v5572_v12, %v8305_v23  ;;  %v1140_v0 = vmul.f32 %v5572_v12, %v8306_v11  ;;  %v1142_v34 = vmul.f32 %v5572_v12, %v8307_v36  ;;  %v8319_v23 = vld [vmem:[#allocation24_spill] sm:$0xff] }
 0x367   :  { %v1222_v27 = vpack.c.bf16 %v1182_v38, %v1180_v45  ;;  %v1136_v17 = vmul.f32 %v5572_v12, %v8308_v28 }
 0x368   :  { %1697 = vmatpush.bf16.msra.mxu0 %v1210_v57  ;;  %v1204_v9 = vpack.c.bf16 %v1146_v52, %v1144_v13  ;;  %v1202_v39 = vpack.c.bf16 %v1142_v34, %v1140_v0  ;;  %v8309_v57 = vld [vmem:[#allocation35_spill] sm:$0xff]  ;;  %v8318_v13 = vld [vmem:[#allocation25_spill] sm:$0xff] }
 0x369   :  { %3851 = vmatmul.msk.f32.gmra.mxu2 %vm133_vm0, %v4529_v46  ;;  %3865 = vmatmul.msk.f32.gmra.mxu3 %vm133_vm0, %v4529_v46  ;;  %v5656_v61 = vpop.f32.mrf.mxu3  ;;  %v1138_v15 = vmul.f32 %v5572_v12, %v8309_v57  ;;  %v4532_v46 = vld [vmem:[%s7999_s1 + $0x30] sm:$0xff]  ;;  %v1232_v52 = vmax.f32 %v8319_v23, %v8318_v13  ;;  %v8321_v0 = vld [vmem:[#allocation29_spill] sm:$0xff] }
 0x36a   :  { %1710 = vmatpush.bf16.msra.mxu1 %v1226_v6 }
 0x36b   :  { %v5654_v51 = vpop.f32.mrf.mxu2  ;;  %v1200_v19 = vpack.c.bf16 %v1138_v15, %v1136_v17  ;;  %v1234_v36 = vmax.f32 %v1232_v52, %v8321_v0  ;;  %v8323_v17 = vld [vmem:[#allocation51_spill] sm:$0xff] }
 0x36c   :  { %1698 = vmatpush.bf16.msra.mxu0 %v1208_v7  ;;  %8303 = vst [vmem:[#allocation17_spill] sm:$0xff] %v5654_v51  ;;  %v8324_v15 = vld [vmem:[#allocation43_spill] sm:$0xff] }
 0x36d   :  { %v1236_v57 = vmax.f32 %v1234_v36, %v8323_v17 }
 0x36e   :  { %1711 = vmatpush.bf16.msra.mxu1 %v1224_v8 }
 0x370   :  { %1699 = vmatpush.bf16.msra.mxu0 %v1206_v44  ;;  %v8316_v44 = vld [vmem:[#allocation27_spill] sm:$0xff] }
 0x371   :  { %3852 = vmatmul.msk.f32.gmra.mxu2 %vm133_vm0, %v4530_v58  ;;  %3866 = vmatmul.msk.f32.gmra.mxu3 %vm133_vm0, %v4530_v58  ;;  %v5673_v29 = vpop.f32.mrf.mxu3 }
 0x372   :  { %1712 = vmatpush.bf16.msra.mxu1 %v1222_v27  ;;  %v8317_v27 = vld [vmem:[#allocation30_spill] sm:$0xff] }
 0x373   :  { %v5671_v3 = vpop.f32.mrf.mxu2  ;;  %v1231_v10 = vmax.f32 %v8317_v27, %v8316_v44 }
 0x374   :  { %1700 = vmatpush.bf16.msra.mxu0 %v1204_v9  ;;  %v8320_v9 = vld [vmem:[#allocation47_spill] sm:$0xff] }
 0x375   :  { %v1233_v11 = vmax.f32 %v1231_v10, %v8320_v9 }
 0x376   :  { %1713 = vmatpush.bf16.msra.mxu1 %v1220_v21 }
 0x378   :  { %1701 = vmatpush.bf16.msra.mxu0 %v1202_v39  ;;  %v8322_v39 = vld [vmem:[#allocation40_spill] sm:$0xff] }
 0x379   :  { %3853 = vmatmul.msk.f32.gmra.mxu2 %vm133_vm0, %v4531_v26  ;;  %3867 = vmatmul.msk.f32.gmra.mxu3 %vm133_vm0, %v4531_v26  ;;  %v5686_v24 = vpop.f32.mrf.mxu3  ;;  %v1235_v28 = vmax.f32 %v1233_v11, %v8322_v39 }
 0x37a   :  { %1714 = vmatpush.bf16.msra.mxu1 %v1218_v41  ;;  %8311 = vst [vmem:[#allocation49_spill] sm:$0xff] %v5686_v24  ;;  %v4538_v41 = vld [vmem:[%s7999_s1 + $0x60] sm:$0xff] }
 0x37b   :  { %v5684_v47 = vpop.f32.mrf.mxu2 }
 0x37c   :  { %1702 = vmatpush.bf16.msra.mxu0 %v1200_v19  ;;  %8310 = vst [vmem:[#allocation42_spill] sm:$0xff] %v5684_v47  ;;  %v1237_v19 = vmax.f32 %v1235_v28, %v8324_v15 }
 0x37e   :  { %1715 = vmatpush.bf16.msra.mxu1 %v1216_v2 }
 0x37f   :  { %1703 = vmatmul.bf16.vlgmr.msra.gmra.mxu0 %v5602_v49  ;;  %v4534_v49 = vld [vmem:[%s7999_s1 + $0x40] sm:$0xff] }
 0x381   :  { %3854 = vmatmul.msk.f32.gmra.mxu2 %vm133_vm0, %v4532_v46  ;;  %1716 = vmatmul.bf16.vlgmr.msra.gmra.mxu1 %v5608_v14  ;;  %v5697_v48 = vpop.f32.mrf.mxu3 }
 0x382   :  { %3868 = vmatmul.msk.f32.gmra.mxu3 %vm133_vm0, %v4532_v46  ;;  %v1238_v46 = vmax.f32 %v1236_v57, %v5463_v33  ;;  %v8325_v57 = vld [vmem:[#allocation34_spill] sm:$0xff] }
 0x383   :  { %v5695_v12 = vpop.f32.mrf.mxu2 }
 0x384   :  { %8312 = vst [vmem:[#allocation50_spill] sm:$0xff] %v5695_v12 }
 0x389   :  { %3855 = vmatmul.msk.f32.gmra.mxu2 %vm133_vm0, %v4533_v35  ;;  %v5706_v32 = vpop.f32.mrf.mxu3 }
 0x38a   :  { %3869 = vmatmul.msk.f32.gmra.mxu3 %vm133_vm0, %v4533_v35  ;;  %v1239_v35 = vmax.f32 %v1237_v19, %v5499_v25  ;;  %v8326_v19 = vld [vmem:[#allocation26_spill] sm:$0xff] }
 0x38b   :  { %v5704_v6 = vpop.f32.mrf.mxu2 }
 0x38c   :  { %8313 = vst [vmem:[#allocation39_spill] sm:$0xff] %v5704_v6 }
 0x391   :  { %3856 = vmatmul.msk.f32.gmra.mxu2 %vm133_vm0, %v4534_v49  ;;  %v5715_v20 = vpop.f32.mrf.mxu3 }
 0x392   :  { %3870 = vmatmul.msk.f32.gmra.mxu3 %vm133_vm0, %v4534_v49  ;;  %v1240_v49 = vmax.f32 %v1238_v46, %v5520_v50  ;;  %v1269_v46 = vmax.f32 %v8326_v19, %v8325_v57 }
 0x393   :  { %v5713_v14 = vpop.f32.mrf.mxu2 }
 0x394   :  { %8314 = vst [vmem:[#allocation38_spill] sm:$0xff] %v5713_v14 }
 0x399   :  { %3857 = vmatmul.msk.f32.gmra.mxu2 %vm133_vm0, %v4535_v16  ;;  %v5724_v56 = vpop.f32.mrf.mxu3 }
 0x39a   :  { %3871 = vmatmul.msk.f32.gmra.mxu3 %vm133_vm0, %v4535_v16  ;;  %v1241_v16 = vmax.f32 %v1239_v35, %v5545_v55 }
 0x39b   :  { %v5722_v21 = vpop.f32.mrf.mxu2 }
 0x39c   :  { %8315 = vst [vmem:[#allocation33_spill] sm:$0xff] %v5722_v21 }
 0x3a1   :  { %3858 = vmatmul.msk.f32.gmra.mxu2 %vm133_vm0, %v4536_v40  ;;  %v5733_v54 = vpop.f32.mrf.mxu3 }
 0x3a2   :  { %3872 = vmatmul.msk.f32.gmra.mxu3 %vm133_vm0, %v4536_v40  ;;  %v1242_v40 = vmax.f32 %v1240_v49, %v5586_v1 }
 0x3a3   :  { %v5731_v5 = vpop.f32.mrf.mxu2 }
 0x3a9   :  { %3859 = vmatmul.msk.f32.gmra.mxu2 %vm133_vm0, %v4537_v30  ;;  %v5742_v31 = vpop.f32.mrf.mxu3 }
 0x3aa   :  { %3873 = vmatmul.msk.f32.gmra.mxu3 %vm133_vm0, %v4537_v30 }
 0x3ab   :  { %v5740_v43 = vpop.f32.mrf.mxu2 }
 0x3b1   :  { %3860 = vmatmul.msk.f32.gmra.mxu2 %vm133_vm0, %v4538_v41  ;;  %v5755_v7 = vpop.f32.mrf.mxu3 }
 0x3b2   :  { %3874 = vmatmul.msk.f32.gmra.mxu3 %vm133_vm0, %v4538_v41  ;;  %v1243_v41 = vmax.f32 %v1241_v16, %v5617_v63  ;;  %v8329_v63 = vld [vmem:[#allocation31_spill] sm:$0xff] }
 0x3b3   :  { %v5749_v60 = vpop.f32.mrf.mxu2 }
 0x3b4   :  { %v1245_v52 = vmax.f32 %v1243_v41, %v5671_v3  ;;  %v1271_v41 = vmax.f32 %v1269_v46, %v8329_v63  ;;  %v8333_v63 = vld [vmem:[#allocation44_spill] sm:$0xff] }
 0x3b6   :  { %v1247_v36 = vmax.f32 %v1245_v52, %v5695_v12  ;;  %v8330_v12 = vld [vmem:[#allocation48_spill] sm:$0xff] }
 0x3b8   :  { %v1249_v35 = vmax.f32 %v1247_v36, %v5713_v14 }
 0x3b9   :  { %3861 = vmatmul.msk.f32.gmra.mxu2 %vm133_vm0, %v4539_v4  ;;  %v5760_v45 = vpop.f32.mrf.mxu3 }
 0x3ba   :  { %3875 = vmatmul.msk.f32.gmra.mxu3 %vm133_vm0, %v4539_v4  ;;  %v1244_v4 = vmax.f32 %v1242_v40, %v5654_v51  ;;  %v8327_v40 = vld [vmem:[#allocation28_spill] sm:$0xff] }
 0x3bb   :  { %v5758_v8 = vpop.f32.mrf.mxu2  ;;  %v1268_v51 = vmax.f32 %v8328_v18, %v8327_v40 }
 0x3bc   :  { %v1246_v11 = vmax.f32 %v1244_v4, %v5684_v47  ;;  %v1251_v4 = vmax.f32 %v1249_v35, %v5731_v5 }
 0x3be   :  { %v1248_v28 = vmax.f32 %v1246_v11, %v5704_v6  ;;  %v1270_v11 = vmax.f32 %v1268_v51, %v8330_v12  ;;  %v8331_v6 = vld [vmem:[#allocation52_spill] sm:$0xff]  ;;  %v1253_v57 = vmax.f32 %v1251_v4, %v5749_v60 }
 0x3bf   :  { %v1273_v47 = vmax.f32 %v1271_v41, %v8331_v6 }
 0x3c0   :  { %v1250_v49 = vmax.f32 %v1248_v28, %v5722_v21  ;;  %v8332_v21 = vld [vmem:[#allocation37_spill] sm:$0xff] }
 0x3c1   :  { %v5764_v2 = vpop.f32.mrf.mxu3  ;;  %v1272_v14 = vmax.f32 %v1270_v11, %v8332_v21  ;;  %v1275_v40 = vmax.f32 %v1273_v47, %v5465_v37 }
 0x3c2   :  { %v1252_v52 = vmax.f32 %v1250_v49, %v5740_v43 }
 0x3c3   :  { %v5762_v38 = vpop.f32.mrf.mxu2  ;;  %v1274_v49 = vmax.f32 %v1272_v14, %v8333_v63  ;;  %v1277_v51 = vmax.f32 %v1275_v40, %v5522_v22 }
 0x3c4   :  { %v1254_v36 = vmax.f32 %v1252_v52, %v5758_v8  ;;  %v1255_v46 = vmax.f32 %v1253_v57, %v5762_v38 }
 0x3c5   :  { %v1276_v52 = vmax.f32 %v1274_v49, %v5501_v62  ;;  %v1279_v11 = vmax.f32 %v1277_v51, %v5588_v42 }
 0x3c7   :  { %v1281_v14 = vmax.f32 %v1279_v11, %v5656_v61 }
 0x3c9   :  { %v5774_v34 = vpop.f32.mrf.mxu3 }
 0x3cb   :  { %v5766_v58 = vpop.f32.mrf.mxu2 }
 0x3cc   :  { %v1256_v35 = vmax.f32 %v1254_v36, %v5766_v58  ;;  %v1278_v36 = vmax.f32 %v1276_v52, %v5547_v53 }
 0x3ce   :  { %v1280_v40 = vmax.f32 %v1278_v36, %v5619_v59 }
 0x3d0   :  { %v1282_v49 = vmax.f32 %v1280_v40, %v5673_v29 }
 0x3d1   :  { %v5790_v10 = vpop.f32.mrf.mxu3 }
 0x3d3   :  { %v5776_v26 = vpop.f32.mrf.mxu2 }
 0x3d4   :  { %v1257_v41 = vmax.f32 %v1255_v46, %v5776_v26  ;;  %v1283_v46 = vmax.f32 %v1281_v14, %v5686_v24 }
 0x3d6   :  { %v1285_v51 = vmax.f32 %v1283_v46, %v5706_v32 }
 0x3d9   :  { %v5811_v28 = vpop.f32.mrf.mxu3 }
 0x3db   :  { %v5786_v30 = vpop.f32.mrf.mxu2 }
 0x3dc   :  { %v1258_v4 = vmax.f32 %v1256_v35, %v5786_v30 }
 0x3e1   :  { %v5831_v22 = vpop.f32.mrf.mxu3 }
 0x3e3   :  { %v5800_v16 = vpop.f32.mrf.mxu2 }
 0x3e4   :  { %v1259_v47 = vmax.f32 %v1257_v41, %v5800_v16  ;;  %v1284_v41 = vmax.f32 %v1282_v49, %v5697_v48 }
 0x3e6   :  { %v1286_v11 = vmax.f32 %v1284_v41, %v5715_v20 }
 0x3e8   :  { %v1288_v36 = vmax.f32 %v1286_v11, %v5733_v54 }
 0x3ea   :  { %v1290_v40 = vmax.f32 %v1288_v36, %v5755_v7 }
 0x3eb   :  { %v5821_v6 = vpop.f32.mrf.mxu2 }
 0x3ec   :  { %v1260_v57 = vmax.f32 %v1258_v4, %v5821_v6  ;;  %v1287_v4 = vmax.f32 %v1285_v51, %v5724_v56 }
 0x3ee   :  { %v1261_v37 = vmax.f32 %v1259_v47, %v1260_v57  ;;  %v1289_v47 = vmax.f32 %v1287_v4, %v5742_v31 }
 0x3f0   :  { %v1262_v35 = vrot.slane %v1261_v37, 4  ;;  %v1291_v14 = vmax.f32 %v1289_v47, %v5760_v45 }
 0x3f2   :  { %v1263_v42 = vmax.f32 %v1261_v37, %v1262_v35  ;;  %v1293_v46 = vmax.f32 %v1291_v14, %v5774_v34  ;;  %v5843_v37 = vpop.f32.mrf.mxu3  ;;  %v1292_v35 = vmax.f32 %v1290_v40, %v5764_v2 }
 0x3f4   :  { %v1264_v52 = vrot.slane %v1263_v42, 2  ;;  %v1295_v49 = vmax.f32 %v1293_v46, %v5811_v28  ;;  %v1294_v41 = vmax.f32 %v1292_v35, %v5790_v10 }
 0x3f6   :  { %v1265_v57 = vmax.f32 %v1263_v42, %v1264_v52  ;;  %v1297_v42 = vmax.f32 %v1295_v49, %v5843_v37  ;;  %v1296_v4 = vmax.f32 %v1294_v41, %v5831_v22 }
 0x3f8   :  { %v1266_v24 = vrot.slane %v1265_v57, 1  ;;  %v1298_v36 = vmax.f32 %v1296_v4, %v1297_v42 }
 0x3fa   :  { %v5847_v51 = vmax.f32 %v1265_v57, %v1266_v24  ;;  %v1299_v35 = vrot.slane %v1298_v36, 4 }
 0x3fc   :  { %v1305_v52 = vsub.f32 %v8317_v27, %v5847_v51  ;;  %v1307_v11 = vsub.f32 %v8319_v23, %v5847_v51  ;;  %v1309_v47 = vsub.f32 %v8316_v44, %v5847_v51  ;;  %v1311_v24 = vsub.f32 %v8318_v13, %v5847_v51 }
 0x3fd   :  { %v1313_v40 = vsub.f32 %v8320_v9, %v5847_v51  ;;  %v1315_v27 = vsub.f32 %v8321_v0, %v5847_v51  ;;  %v1317_v44 = vsub.f32 %v8322_v39, %v5847_v51  ;;  %v1300_v41 = vmax.f32 %v1298_v36, %v1299_v35 }
 0x3fe   :  { %v1369_v57 = vmul.f32 1.442695, %v1305_v52  ;;  %v1373_v14 = vmul.f32 1.442695, %v1307_v11  ;;  %v1377_v46 = vmul.f32 1.442695, %v1309_v47  ;;  %v1319_v13 = vsub.f32 %v8323_v17, %v5847_v51 }
 0x3ff   :  { %v1381_v23 = vmul.f32 1.442695, %v1311_v24  ;;  %v1385_v49 = vmul.f32 1.442695, %v1313_v40  ;;  %v1389_v42 = vmul.f32 1.442695, %v1315_v27  ;;  %v1321_v0 = vsub.f32 %v8324_v15, %v5847_v51 }
 0x400   :  { %4090 = vpow2.f32 %v1369_v57  ;;  %v1393_v52 = vmul.f32 1.442695, %v1317_v44  ;;  %v1301_v11 = vrot.slane %v1300_v41, 2  ;;  %v1323_v17 = vsub.f32 %v5463_v33, %v5847_v51 }
 0x401   :  { %4092 = vpow2.f32 %v1373_v14  ;;  %v1397_v36 = vmul.f32 1.442695, %v1319_v13  ;;  %v1325_v15 = vsub.f32 %v5499_v25, %v5847_v51  ;;  %v1401_v14 = vmul.f32 1.442695, %v1321_v0  ;;  %v5895_v13 = vpop.f32.mrf.mxu1 }
 0x402   :  { %4094 = vpow2.f32 %v1377_v46  ;;  %v1302_v46 = vmax.f32 %v1300_v41, %v1301_v11  ;;  %v1327_v27 = vsub.f32 %v5520_v50, %v5847_v51  ;;  %v1405_v33 = vmul.f32 1.442695, %v1323_v17  ;;  %8341 = vst [vmem:[#allocation47_spill] sm:$0xff] %v5895_v13  ;;  %v8342_v11 = vld [vmem:[#allocation16_spill] sm:$0xff]  ;;  %v8347_v13 = vld [vmem:[#allocation50_spill] sm:$0xff] }
 0x403   :  { %4096 = vpow2.f32 %v1381_v23  ;;  %v1329_v25 = vsub.f32 %v5545_v55, %v5847_v51  ;;  %v1409_v41 = vmul.f32 1.442695, %v1325_v15  ;;  %v1331_v50 = vsub.f32 %v5586_v1, %v5847_v51  ;;  %v5909_v55 = vpop.f32.mrf.mxu3 }
 0x404   :  { %4098 = vpow2.f32 %v1385_v49  ;;  %v5893_v49 = vpop.f32.mrf.mxu0  ;;  %v1303_v0 = vrot.slane %v1302_v46, 1  ;;  %v1333_v17 = vsub.f32 %v8342_v11, %v5847_v51  ;;  %8344 = vst [vmem:[#allocation40_spill] sm:$0xff] %v5909_v55  ;;  %v1337_v1 = vsub.f32 %v5671_v3, %v5847_v51  ;;  %v8348_v3 = vld [vmem:[#allocation39_spill] sm:$0xff] }
 0x405   :  { %4100 = vpow2.f32 %v1389_v42  ;;  %8340 = vst [vmem:[#allocation24_spill] sm:$0xff] %v5893_v49  ;;  %v1421_v55 = vmul.f32 1.442695, %v1331_v50  ;;  %v1341_v49 = vsub.f32 %v8347_v13, %v5847_v51 }
 0x406   :  { %v5868_v9 = vpop.eup %4090  ;;  %4102 = vpow2.f32 %v1393_v52 }
 0x407   :  { %8334 = vst [vmem:[#allocation36_spill] sm:$0xff] %v5868_v9  ;;  %v5870_v4 = vpop.eup %4092  ;;  %4104 = vpow2.f32 %v1397_v36 }
 0x408   :  { %8335 = vst [vmem:[#allocation32_spill] sm:$0xff] %v5870_v4  ;;  %v1497_v39 = vadd.f32 %v5870_v4, %v5868_v9  ;;  %v5876_v47 = vpop.eup %4094  ;;  %4106 = vpow2.f32 %v1401_v14  ;;  %v8345_v14 = vld [vmem:[#allocation17_spill] sm:$0xff] }
 0x409   :  { %8336 = vst [vmem:[#allocation35_spill] sm:$0xff] %v5876_v47  ;;  %v5881_v57 = vpop.eup %4096  ;;  %4108 = vpow2.f32 %v1405_v33  ;;  %v5918_v33 = vmax.f32 %v1302_v46, %v1303_v0  ;;  %v5933_v4 = vpop.f32.mrf.mxu1 }
 0x40a   :  { %v1498_v24 = vadd.f32 %v5876_v47, %v1497_v39  ;;  %8337 = vst [vmem:[#allocation27_spill] sm:$0xff] %v5881_v57  ;;  %v5886_v35 = vpop.eup %4098  ;;  %v1413_v39 = vmul.f32 1.442695, %v1327_v27  ;;  %4110 = vpow2.f32 %v1409_v41  ;;  %v1361_v47 = vsub.f32 %v5776_v26, %v5847_v51 }
 0x40b   :  { %8338 = vst [vmem:[#allocation30_spill] sm:$0xff] %v5886_v35  ;;  %v5891_v44 = vpop.eup %4100  ;;  %v1306_v13 = vsub.f32 %v8328_v18, %v5918_v33 }
 0x40c   :  { %v1499_v40 = vadd.f32 %v5881_v57, %v1498_v24  ;;  %8339 = vst [vmem:[#allocation25_spill] sm:$0xff] %v5891_v44  ;;  %v5900_v52 = vpop.eup %4102  ;;  %v5907_v24 = vpop.f32.mrf.mxu2  ;;  %4112 = vpow2.f32 %v1413_v39 }
 0x40d   :  { %8343 = vst [vmem:[#allocation29_spill] sm:$0xff] %v5907_v24  ;;  %v5911_v15 = vpop.eup %4104  ;;  %v5931_v0 = vpop.f32.mrf.mxu0 }
 0x40e   :  { %v1500_v23 = vadd.f32 %v5886_v35, %v1499_v40  ;;  %v1335_v40 = vsub.f32 %v8345_v14, %v5847_v51  ;;  %v5920_v11 = vpop.eup %4106  ;;  %v1425_v14 = vmul.f32 1.442695, %v1333_v17  ;;  %8349 = vst [vmem:[#allocation51_spill] sm:$0xff] %v5931_v0 }
 0x40f   :  { %v5927_v41 = vpop.eup %4108  ;;  %8350 = vst [vmem:[#allocation43_spill] sm:$0xff] %v5933_v4 }
 0x410   :  { %v1501_v42 = vadd.f32 %v5891_v44, %v1500_v23  ;;  %v1417_v23 = vmul.f32 1.442695, %v1329_v25  ;;  %v1429_v46 = vmul.f32 1.442695, %v1335_v40  ;;  %v5938_v39 = vpop.eup %4110 }
 0x412   :  { %v1502_v36 = vadd.f32 %v5900_v52, %v1501_v42  ;;  %v8346_v42 = vld [vmem:[#allocation42_spill] sm:$0xff]  ;;  %4114 = vpow2.f32 %v1417_v23  ;;  %v5949_v0 = vpop.eup %4112 }
 0x413   :  { %v1339_v24 = vsub.f32 %v8346_v42, %v5847_v51  ;;  %v1433_v42 = vmul.f32 1.442695, %v1337_v1  ;;  %4116 = vpow2.f32 %v1421_v55  ;;  %v8351_v23 = vld [vmem:[#allocation38_spill] sm:$0xff] }
 0x414   :  { %v1503_v27 = vadd.f32 %v5911_v15, %v1502_v36  ;;  %v1343_v36 = vsub.f32 %v8348_v3, %v5847_v51  ;;  %v1345_v40 = vsub.f32 %v8351_v23, %v5847_v51  ;;  %4118 = vpow2.f32 %v1425_v14  ;;  %v5945_v1 = vpop.f32.mrf.mxu2 }
 0x415   :  { %v1437_v17 = vmul.f32 1.442695, %v1339_v24  ;;  %v1441_v3 = vmul.f32 1.442695, %v1341_v49  ;;  %8352 = vst [vmem:[#allocation26_spill] sm:$0xff] %v5945_v1  ;;  %4120 = vpow2.f32 %v1429_v46  ;;  %v8354_v24 = vld [vmem:[#allocation28_spill] sm:$0xff] }
 0x416   :  { %v1504_v25 = vadd.f32 %v5920_v11, %v1503_v27  ;;  %v1308_v27 = vsub.f32 %v8326_v19, %v5918_v33  ;;  %v1445_v18 = vmul.f32 1.442695, %v1343_v36  ;;  %v1310_v55 = vsub.f32 %v8354_v24, %v5918_v33  ;;  %v8355_v19 = vld [vmem:[#allocation33_spill] sm:$0xff] }
 0x417   :  { %v1347_v9 = vsub.f32 %v8355_v19, %v5847_v51  ;;  %4122 = vpow2.f32 %v1433_v42  ;;  %v1371_v49 = vmul.f32 1.442695, %v1306_v13  ;;  %v1349_v36 = vsub.f32 %v5731_v5, %v5847_v51  ;;  %v1680_v13 = vpop.f32.mrf.mxu0 }
 0x418   :  { %v1505_v50 = vadd.f32 %v5927_v41, %v1504_v25  ;;  %v5947_v25 = vpop.f32.mrf.mxu3  ;;  %v5956_v23 = vpop.eup %4114  ;;  %4124 = vpow2.f32 %v1437_v17  ;;  %v1375_v1 = vmul.f32 1.442695, %v1308_v27  ;;  %v1449_v46 = vmul.f32 1.442695, %v1345_v40 }
 0x419   :  { %8353 = vst [vmem:[#allocation23_spill] sm:$0xff] %v5947_v25  ;;  %4126 = vpow2.f32 %v1441_v3  ;;  %v5963_v57 = vpop.eup %4116  ;;  %v1379_v42 = vmul.f32 1.442695, %v1310_v55  ;;  %v1693_v17 = vpop.f32.mrf.mxu1  ;;  %v1351_v27 = vsub.f32 %v5740_v43, %v5847_v51  ;;  %v1353_v3 = vsub.f32 %v5749_v60, %v5847_v51 }
 0x41a   :  { %v1506_v4 = vadd.f32 %v5938_v39, %v1505_v50  ;;  %v8356_v50 = vld [vmem:[#allocation34_spill] sm:$0xff]  ;;  %4128 = vpow2.f32 %v1445_v18  ;;  %v5967_v19 = vpop.eup %4118  ;;  %v8357_v18 = vld [vmem:[#allocation31_spill] sm:$0xff]  ;;  %v1457_v13 = vmul.f32 1.442695, %v1349_v36  ;;  %v1355_v60 = vsub.f32 %v5758_v8, %v5847_v51  ;;  %v8360_v8 = vld [vmem:[#allocation52_spill] sm:$0xff] }
 0x41b   :  { %v1312_v25 = vsub.f32 %v8356_v50, %v5918_v33  ;;  %v1453_v50 = vmul.f32 1.442695, %v1347_v9  ;;  %4130 = vpow2.f32 %v1371_v49  ;;  %v5972_v40 = vpop.eup %4120  ;;  %v1318_v9 = vsub.f32 %v8332_v21, %v5918_v33 }
 0x41c   :  { %v1507_v14 = vadd.f32 %v5949_v0, %v1506_v4  ;;  %v1314_v4 = vsub.f32 %v8330_v12, %v5918_v33  ;;  %v1316_v12 = vsub.f32 %v8357_v18, %v5918_v33  ;;  %4132 = vpow2.f32 %v1375_v1  ;;  %v1979_v49 = vpop.f32.mrf.mxu2 }
 0x41d   :  { %v1383_v55 = vmul.f32 1.442695, %v1312_v25  ;;  %4134 = vpow2.f32 %v1449_v46  ;;  %v1357_v1 = vsub.f32 %v5762_v38, %v5847_v51  ;;  %v1359_v36 = vsub.f32 %v5766_v58, %v5847_v51 }
 0x41e   :  { %v1508_v24 = vadd.f32 %v5956_v23, %v1507_v14  ;;  %v5978_v14 = vpop.eup %4122  ;;  %4136 = vpow2.f32 %v1379_v42  ;;  %v1387_v25 = vmul.f32 1.442695, %v1314_v4  ;;  %v1461_v46 = vmul.f32 1.442695, %v1351_v27 }
 0x41f   :  { %8358 = vst [vmem:[#allocation48_spill] sm:$0xff] %v5978_v14  ;;  %v5983_v17 = vpop.eup %4124  ;;  %4138 = vpow2.f32 %v1453_v50  ;;  %v1320_v44 = vsub.f32 %v8360_v8, %v5918_v33  ;;  %v1391_v38 = vmul.f32 1.442695, %v1316_v12  ;;  %v1322_v58 = vsub.f32 %v8333_v63, %v5918_v33  ;;  %v8364_v63 = vld [vmem:[#allocation45_spill] sm:$0xff] }
 0x420   :  { %v1509_v5 = vadd.f32 %v5963_v57, %v1508_v24  ;;  %v2038_v24 = vpop.f32.mrf.mxu3  ;;  %8359 = vst [vmem:[#allocation37_spill] sm:$0xff] %v5983_v17  ;;  %v5989_v18 = vpop.eup %4126  ;;  %4140 = vpow2.f32 %v1383_v55  ;;  %v1395_v27 = vmul.f32 1.442695, %v1318_v9  ;;  %v1465_v26 = vmul.f32 1.442695, %v1353_v3 }
 0x421   :  { %4142 = vpow2.f32 %v1457_v13  ;;  %v1469_v35 = vmul.f32 1.442695, %v1355_v60  ;;  %v1473_v12 = vmul.f32 1.442695, %v1357_v1  ;;  %v1324_v9 = vsub.f32 %v8364_v63, %v5918_v33 }
 0x422   :  { %v1510_v43 = vadd.f32 %v5967_v19, %v1509_v5  ;;  %v5994_v5 = vpop.eup %4128  ;;  %4144 = vpow2.f32 %v1387_v25  ;;  %v1399_v3 = vmul.f32 1.442695, %v1320_v44  ;;  %v1403_v1 = vmul.f32 1.442695, %v1322_v58 }
 0x423   :  { %v6000_v4 = vpop.eup %4130  ;;  %4146 = vpow2.f32 %v1461_v46 }
 0x424   :  { %v1511_v21 = vadd.f32 %v5972_v40, %v1510_v43  ;;  %8361 = vst [vmem:[#allocation44_spill] sm:$0xff] %v6000_v4  ;;  %v6005_v50 = vpop.eup %4132  ;;  %v1363_v43 = vsub.f32 %v5786_v30, %v5847_v51  ;;  %v1326_v30 = vsub.f32 %v5501_v62, %v5918_v33  ;;  %4148 = vpow2.f32 %v1391_v38  ;;  %v8369_v62 = vld [vmem:[#allocation13_spill] sm:$0xff] }
 0x425   :  { %8362 = vst [vmem:[#allocation16_spill] sm:$0xff] %v6005_v50  ;;  %v6009_v8 = vpop.eup %4134  ;;  %v1534_v13 = vadd.f32 %v6005_v50, %v6000_v4  ;;  %4150 = vpow2.f32 %v1395_v27 }
 0x426   :  { %v1512_v42 = vadd.f32 %v5978_v14, %v1511_v21  ;;  %v6014_v21 = vpop.eup %4136  ;;  %4152 = vpow2.f32 %v1465_v26  ;;  %v1477_v26 = vmul.f32 1.442695, %v1359_v36 }
 0x427   :  { %8363 = vst [vmem:[#allocation17_spill] sm:$0xff] %v6014_v21  ;;  %v6020_v60 = vpop.eup %4138  ;;  %v1535_v46 = vadd.f32 %v6014_v21, %v1534_v13  ;;  %4154 = vpow2.f32 %v1399_v3  ;;  %v1365_v3 = vsub.f32 %v5800_v16, %v5847_v51 }
 0x428   :  { %v1513_v55 = vadd.f32 %v5983_v17, %v1512_v42  ;;  %v1982_v42 = vpop.f32.mrf.mxu2  ;;  %v2041_v50 = vpop.f32.mrf.mxu3  ;;  %v8366_v17 = vld [vmem:[#allocation10_spill] sm:$0xff]  ;;  %4156 = vpow2.f32 %v1469_v35 }
 0x429   :  { %v6024_v4 = vpop.eup %4140  ;;  %v6027_v14 = vadd.f32 %v1979_v49, %v8366_v17  ;;  %v6030_v63 = vadd.f32 %v2038_v24, %v8366_v17  ;;  %v6033_v44 = vadd.f32 %v1982_v42, %v8369_v62  ;;  %v6036_v38 = vadd.f32 %v2041_v50, %v8369_v62 }
 0x42a   :  { %v1514_v25 = vadd.f32 %v5989_v18, %v1513_v55  ;;  %8365 = vst [vmem:[#allocation42_spill] sm:$0xff] %v6024_v4  ;;  %v6038_v27 = vpop.eup %4142  ;;  %v8372_v55 = vld [vmem:[#allocation46_spill] sm:$0xff]  ;;  %v1536_v49 = vadd.f32 %v6024_v4, %v1535_v46  ;;  %v1407_v24 = vmul.f32 1.442695, %v1324_v9  ;;  %v1330_v9 = vsub.f32 %v5547_v53, %v5918_v33 }
 0x42b   :  { %8367 = vst [vmem:[#allocation50_spill] sm:$0xff] %v6027_v14  ;;  %v1328_v13 = vsub.f32 %v8372_v55, %v5918_v33  ;;  %v6044_v21 = vpop.eup %4144  ;;  %4158 = vpow2.f32 %v1403_v1  ;;  %v1411_v46 = vmul.f32 1.442695, %v1326_v30  ;;  %v1481_v50 = vmul.f32 1.442695, %v1361_v47 }
 0x42c   :  { %8368 = vst [vmem:[#allocation39_spill] sm:$0xff] %v6030_v63  ;;  %v1515_v58 = vadd.f32 %v5994_v5, %v1514_v25  ;;  %v6050_v42 = vpop.eup %4146  ;;  %v1537_v62 = vadd.f32 %v6044_v21, %v1536_v49  ;;  %4160 = vpow2.f32 %v1473_v12  ;;  %v8376_v49 = vld [vmem:[#allocation22_spill] sm:$0xff]  ;;  %v1334_v30 = vsub.f32 %v5619_v59, %v5918_v33  ;;  %v6080_v59 = vpop.f32.mrf.mxu0 }
 0x42d   :  { %8370 = vst [vmem:[#allocation38_spill] sm:$0xff] %v6033_v44  ;;  %v6054_v55 = vpop.eup %4148  ;;  %v1332_v63 = vsub.f32 %v8376_v49, %v5918_v33  ;;  %4162 = vpow2.f32 %v1407_v24  ;;  %v1419_v24 = vmul.f32 1.442695, %v1330_v9  ;;  %v1336_v14 = vsub.f32 %v5656_v61, %v5918_v33  ;;  %v8381_v44 = vld [vmem:[#allocation9_spill] sm:$0xff] }
 0x42e   :  { %8371 = vst [vmem:[#allocation28_spill] sm:$0xff] %v6036_v38  ;;  %v1516_v25 = vadd.f32 %v6009_v8, %v1515_v58  ;;  %v6060_v17 = vpop.eup %4150  ;;  %v1538_v36 = vadd.f32 %v6054_v55, %v1537_v62  ;;  %v1485_v58 = vmul.f32 1.442695, %v1363_v43  ;;  %v1415_v38 = vmul.f32 1.442695, %v1328_v13 }
 0x42f   :  { %8373 = vst [vmem:[#allocation33_spill] sm:$0xff] %v6044_v21  ;;  %v6066_v16 = vpop.eup %4152  ;;  %4164 = vpow2.f32 %v1477_v26  ;;  %v1367_v43 = vsub.f32 %v5821_v6, %v5847_v51  ;;  %v1489_v26 = vmul.f32 1.442695, %v1365_v3  ;;  %v1338_v6 = vsub.f32 %v5673_v29, %v5918_v33 }
 0x430   :  { %8374 = vst [vmem:[#allocation34_spill] sm:$0xff] %v6054_v55  ;;  %v1517_v35 = vadd.f32 %v6020_v60, %v1516_v25  ;;  %v1539_v47 = vadd.f32 %v6060_v17, %v1538_v36  ;;  %v1985_v12 = vpop.f32.mrf.mxu2  ;;  %v2044_v1 = vpop.f32.mrf.mxu3  ;;  %4166 = vpow2.f32 %v1411_v46  ;;  %v1423_v51 = vmul.f32 1.442695, %v1332_v63  ;;  %v8382_v55 = vld [vmem:[#allocation12_spill] sm:$0xff] }
 0x431   :  { %8375 = vst [vmem:[#allocation31_spill] sm:$0xff] %v6060_v17  ;;  %v6072_v25 = vpop.eup %4154  ;;  %4168 = vpow2.f32 %v1481_v50  ;;  %v6082_v36 = vpop.f32.mrf.mxu1  ;;  %v1427_v9 = vmul.f32 1.442695, %v1334_v30  ;;  %v1493_v61 = vmul.f32 1.442695, %v1367_v43  ;;  %v1342_v30 = vsub.f32 %v5697_v48, %v5918_v33  ;;  %v8387_v17 = vld [vmem:[#allocation11_spill] sm:$0xff] }
 0x432   :  { %v1518_v53 = vadd.f32 %v6038_v27, %v1517_v35  ;;  %8377 = vst [vmem:[#allocation52_spill] sm:$0xff] %v6072_v25  ;;  %v6076_v13 = vpop.eup %4156  ;;  %v1540_v35 = vadd.f32 %v6072_v25, %v1539_v47  ;;  %4170 = vpow2.f32 %v1415_v38  ;;  %v8380_v38 = vld [vmem:[#allocation49_spill] sm:$0xff]  ;;  %v1435_v43 = vmul.f32 1.442695, %v1338_v6 }
 0x433   :  { %8378 = vst [vmem:[#allocation45_spill] sm:$0xff] %v6080_v59  ;;  %v6084_v49 = vpop.eup %4158  ;;  %4172 = vpow2.f32 %v1485_v58  ;;  %v1340_v58 = vsub.f32 %v8380_v38, %v5918_v33  ;;  %v1986_v4 = vadd.f32 %v1985_v12, %v8381_v44  ;;  %v2045_v38 = vadd.f32 %v2044_v1, %v8381_v44 }
 0x434   :  { %v1519_v62 = vadd.f32 %v6050_v42, %v1518_v53  ;;  %8379 = vst [vmem:[#allocation10_spill] sm:$0xff] %v6082_v36  ;;  %v6090_v50 = vpop.eup %4160  ;;  %v1541_v46 = vadd.f32 %v6084_v49, %v1540_v35  ;;  %4174 = vpow2.f32 %v1419_v24  ;;  %v1344_v6 = vsub.f32 %v5706_v32, %v5918_v33 }
 0x435   :  { %v6094_v53 = vpop.eup %4162  ;;  %4176 = vpow2.f32 %v1489_v26  ;;  %v1439_v44 = vmul.f32 1.442695, %v1340_v58  ;;  %v1346_v32 = vsub.f32 %v5715_v20, %v5918_v33  ;;  %v1350_v20 = vsub.f32 %v5733_v54, %v5918_v33 }
 0x436   :  { %v1520_v3 = vadd.f32 %v6066_v16, %v1519_v62  ;;  %v6096_v47 = vpop.eup %4164  ;;  %v1542_v29 = vadd.f32 %v6094_v53, %v1541_v46  ;;  %4178 = vpow2.f32 %v1423_v51  ;;  %v1431_v62 = vmul.f32 1.442695, %v1336_v14 }
 0x437   :  { %v6100_v63 = vpop.eup %4166  ;;  %4180 = vpow2.f32 %v1427_v9 }
 0x438   :  { %v1521_v36 = vadd.f32 %v6076_v13, %v1520_v3  ;;  %v6106_v35 = vpop.eup %4168  ;;  %v1543_v26 = vadd.f32 %v6100_v63, %v1542_v29  ;;  %v1988_v3 = vpop.f32.mrf.mxu2  ;;  %4182 = vpow2.f32 %v1493_v61 }
 0x439   :  { %v2047_v46 = vpop.f32.mrf.mxu3  ;;  %v6110_v59 = vpop.eup %4170  ;;  %v1989_v48 = vadd.f32 %v1988_v3, %v8382_v55  ;;  %4184 = vpow2.f32 %v1431_v62  ;;  %v1348_v62 = vsub.f32 %v5724_v56, %v5918_v33 }
 0x43a   :  { %v1522_v24 = vadd.f32 %v6090_v50, %v1521_v36  ;;  %v2048_v14 = vadd.f32 %v2047_v46, %v8382_v55  ;;  %v6116_v51 = vpop.eup %4172  ;;  %v1544_v9 = vadd.f32 %v6110_v59, %v1543_v26  ;;  %v1706_v29 = vpop.f32.mrf.mxu0  ;;  %4186 = vpow2.f32 %v1435_v43 }
 0x43b   :  { %v1719_v21 = vpop.f32.mrf.mxu1  ;;  %v6122_v25 = vpop.eup %4174  ;;  %v2082_v12 = vpack.c.bf16 %v1989_v48, %v1986_v4  ;;  %v1443_v26 = vmul.f32 1.442695, %v1342_v30  ;;  %4188 = vpow2.f32 %v1439_v44  ;;  %v1447_v46 = vmul.f32 1.442695, %v1344_v6 }
 0x43c   :  { %v1523_v36 = vadd.f32 %v6096_v47, %v1522_v24  ;;  %v2083_v1 = vpack.c.bf16 %v2048_v14, %v2045_v38  ;;  %v6124_v3 = vpop.eup %4176  ;;  %v1545_v61 = vadd.f32 %v6122_v25, %v1544_v9  ;;  %v1451_v9 = vmul.f32 1.442695, %v1346_v32 }
 0x43d   :  { %v6128_v24 = vpop.eup %4178  ;;  %4190 = vpow2.f32 %v1443_v26  ;;  %v1352_v44 = vsub.f32 %v5742_v31, %v5918_v33  ;;  %v1356_v31 = vsub.f32 %v5760_v45, %v5918_v33 }
 0x43e   :  { %v1524_v55 = vadd.f32 %v6106_v35, %v1523_v36  ;;  %2090 = vxpose.binary.xlu1.c.b16.start [1/4] (short) %v2083_v1, %v2082_v12, 128  ;;  %v6132_v21 = vpop.eup %4180  ;;  %v1546_v4 = vadd.f32 %v6128_v24, %v1545_v61  ;;  %4192 = vpow2.f32 %v1447_v46  ;;  %v1455_v12 = vmul.f32 1.442695, %v1348_v62 }
 0x43f   :  { %v6138_v38 = vpop.eup %4182  ;;  %v1354_v1 = vsub.f32 %v5755_v7, %v5918_v33  ;;  %4194 = vpow2.f32 %v1451_v9  ;;  %v1358_v62 = vsub.f32 %v5764_v2, %v5918_v33  ;;  %v1463_v46 = vmul.f32 1.442695, %v1352_v44 }
 0x440   :  { %v1525_v58 = vadd.f32 %v6116_v51, %v1524_v55  ;;  %v1547_v30 = vadd.f32 %v6132_v21, %v1546_v4  ;;  %v1991_v43 = vpop.f32.mrf.mxu2  ;;  %v6144_v36 = vpop.eup %4184  ;;  %v1459_v55 = vmul.f32 1.442695, %v1350_v20  ;;  %4196 = vpow2.f32 %v1455_v12 }
 0x441   :  { %v2050_v14 = vpop.f32.mrf.mxu3  ;;  %v6148_v6 = vpop.eup %4186  ;;  %v1360_v44 = vsub.f32 %v5774_v34, %v5918_v33 }
 0x442   :  { %v1526_v48 = vadd.f32 %v6124_v3, %v1525_v58  ;;  %v1548_v56 = vadd.f32 %v6144_v36, %v1547_v30  ;;  %8383 = vst [vmem:[#allocation13_spill] sm:$0xff] %v6148_v6  ;;  %v6155_v26 = vpop.eup %4188  ;;  %4198 = vpow2.f32 %v1459_v55  ;;  %v1471_v55 = vmul.f32 1.442695, %v1356_v31 }
 0x443   :  { %8384 = vst [vmem:[#allocation46_spill] sm:$0xff] %v6155_v26  ;;  %v6158_v4 = vpop.eup %4190  ;;  %4200 = vpow2.f32 %v1463_v46  ;;  %v1364_v31 = vsub.f32 %v5811_v28, %v5918_v33 }
 0x444   :  { %v1527_v29 = vadd.f32 %v6138_v38, %v1526_v48  ;;  %v1549_v61 = vadd.f32 %v6148_v6, %v1548_v56  ;;  %8385 = vst [vmem:[#allocation22_spill] sm:$0xff] %v6158_v4  ;;  %v1467_v48 = vmul.f32 1.442695, %v1354_v1  ;;  %v8386_v56 = vld [vmem:[#allocation8_spill] sm:$0xff] }
 0x446   :  { %v1528_v54 = vrot.slane %v1527_v29, 4  ;;  %v1550_v58 = vadd.f32 %v6155_v26, %v1549_v61  ;;  %v2051_v61 = vadd.f32 %v2050_v14, %v8386_v56  ;;  %4202 = vpow2.f32 %v1467_v48 }
 0x447   :  { %4204 = vpow2.f32 %v1471_v55 }
 0x448   :  { %v1529_v32 = vadd.f32 %v1528_v54, %v1527_v29  ;;  %v1551_v20 = vadd.f32 %v6158_v4, %v1550_v58  ;;  %v1994_v30 = vpop.f32.mrf.mxu2  ;;  %v6165_v29 = vpop.eup %4192  ;;  %v1992_v54 = vadd.f32 %v1991_v43, %v8386_v56  ;;  %v1487_v56 = vmul.f32 1.442695, %v1364_v31 }
 0x449   :  { %v2053_v9 = vpop.f32.mrf.mxu3  ;;  %v1995_v45 = vadd.f32 %v1994_v30, %v8387_v17  ;;  %v6174_v1 = vpop.eup %4194 }
 0x44a   :  { %v1530_v7 = vrot.slane %v1529_v32, 2  ;;  %v2054_v26 = vadd.f32 %v2053_v9, %v8387_v17  ;;  %v1552_v12 = vadd.f32 %v6165_v29, %v1551_v20  ;;  %v6177_v14 = vpop.eup %4196  ;;  %v1362_v17 = vsub.f32 %v5790_v10, %v5918_v33 }
 0x44b   :  { %v2086_v58 = vpack.c.bf16 %v1995_v45, %v1992_v54  ;;  %v6181_v34 = vpop.eup %4198 }
 0x44c   :  { %v1531_v2 = vadd.f32 %v1530_v7, %v1529_v32  ;;  %v2087_v6 = vpack.c.bf16 %v2054_v26, %v2051_v61  ;;  %v1553_v43 = vadd.f32 %v6174_v1, %v1552_v12  ;;  %v1475_v32 = vmul.f32 1.442695, %v1358_v62  ;;  %v6191_v10 = vpop.eup %4200 }
 0x44d   :  { %v1479_v26 = vmul.f32 1.442695, %v1360_v44  ;;  %v1368_v62 = vsub.f32 %v5843_v37, %v5918_v33  ;;  %v6198_v48 = vpop.eup %4202 }
 0x44e   :  { %v1532_v4 = vrot.slane %v1531_v2, 1  ;;  %2091 = vxpose.binary.xlu1.c.b16.end [2/4] (short) %v2087_v6, %v2086_v58, 128  ;;  %v1554_v20 = vadd.f32 %v6177_v14, %v1553_v43  ;;  %v1366_v6 = vsub.f32 %v5831_v22, %v5918_v33  ;;  %4206 = vpow2.f32 %v1475_v32  ;;  %v6201_v61 = vpop.eup %4204 }
 0x450   :  { %v1533_v7 = vadd.f32 %v1532_v4, %v1531_v2  ;;  %v1555_v46 = vadd.f32 %v6181_v34, %v1554_v20  ;;  %v6187_v30 = vpop.f32.mrf.mxu2  ;;  %v1483_v4 = vmul.f32 1.442695, %v1362_v17  ;;  %v1491_v45 = vmul.f32 1.442695, %v1366_v6 }
 0x451   :  { %8388 = vst [vmem:[#allocation49_spill] sm:$0xff] %v6187_v30  ;;  %v6189_v9 = vpop.f32.mrf.mxu3  ;;  %v1495_v2 = vmul.f32 1.442695, %v1368_v62 }
 0x452   :  { %8389 = vst [vmem:[#allocation9_spill] sm:$0xff] %v6189_v9  ;;  %4208 = vrcp.f32 %v1533_v7  ;;  %v1556_v28 = vadd.f32 %v6191_v10, %v1555_v46 }
 0x453   :  { %4210 = vpow2.f32 %v1479_v26 }
 0x454   :  { %v1557_v54 = vadd.f32 %v6198_v48, %v1556_v28  ;;  %4212 = vpow2.f32 %v1483_v4  ;;  %v6204_v44 = vpop.eup %4206 }
 0x455   :  { %4214 = vpow2.f32 %v1487_v56 }
 0x456   :  { %v1558_v22 = vadd.f32 %v6201_v61, %v1557_v54  ;;  %4216 = vpow2.f32 %v1491_v45 }
 0x457   :  { %4218 = vpow2.f32 %v1495_v2  ;;  %v8390_v2 = vld [vmem:[#allocation18_spill] sm:$0xff] }
 0x458   :  { %v6206_v12 = vpop.eup %4208  ;;  %v1559_v37 = vadd.f32 %v6204_v44, %v1558_v22  ;;  %v2000_v33 = vpop.f32.mrf.mxu2 }
 0x459   :  { %v2059_v55 = vpop.f32.mrf.mxu3  ;;  %v6209_v58 = vpop.eup %4210  ;;  %v1601_v32 = vmul.f32 %v6206_v12, %v5967_v19  ;;  %v1603_v7 = vmul.f32 %v6206_v12, %v5972_v40  ;;  %v1633_v20 = vmul.f32 %v6206_v12, %v6124_v3  ;;  %v1635_v31 = vmul.f32 %v6206_v12, %v6138_v38 }
 0x45a   :  { %v1560_v43 = vadd.f32 %v6209_v58, %v1559_v37  ;;  %v6212_v17 = vpop.eup %4212  ;;  %v1597_v46 = vmul.f32 %v6206_v12, %v5956_v23  ;;  %v1599_v6 = vmul.f32 %v6206_v12, %v5963_v57  ;;  %v1629_v19 = vmul.f32 %v6206_v12, %v6106_v35 }
 0x45b   :  { %v6229_v4 = vpop.eup %4214  ;;  %v1651_v40 = vpack.c.bf16 %v1603_v7, %v1601_v32  ;;  %v1667_v62 = vpack.c.bf16 %v1635_v31, %v1633_v20  ;;  %v1631_v3 = vmul.f32 %v6206_v12, %v6116_v51  ;;  %v1625_v56 = vmul.f32 %v6206_v12, %v6090_v50  ;;  %v8391_v7 = vld [vmem:[#allocation19_spill] sm:$0xff] }
 0x45c   :  { %v1561_v26 = vadd.f32 %v6212_v17, %v1560_v43  ;;  %v1649_v28 = vpack.c.bf16 %v1599_v6, %v1597_v46  ;;  %v6236_v23 = vpop.eup %4216  ;;  %v1627_v35 = vmul.f32 %v6206_v12, %v6096_v47  ;;  %v2001_v51 = vadd.f32 %v2000_v33, %v8390_v2 }
 0x45d   :  { %1721 = vmatpush.bf16.msrb.mxu0 %v1651_v40  ;;  %1734 = vmatpush.bf16.msrb.mxu1 %v1667_v62  ;;  %v1665_v57 = vpack.c.bf16 %v1631_v3, %v1629_v19  ;;  %v6240_v54 = vpop.eup %4218  ;;  %v1593_v43 = vmul.f32 %v6206_v12, %v5938_v39  ;;  %v1595_v50 = vmul.f32 %v6206_v12, %v5949_v0 }
 0x45e   :  { %v1562_v38 = vadd.f32 %v6229_v4, %v1561_v26  ;;  %v2060_v32 = vadd.f32 %v2059_v55, %v8390_v2  ;;  %v1663_v31 = vpack.c.bf16 %v1627_v35, %v1625_v56  ;;  %v1589_v33 = vmul.f32 %v6206_v12, %v5920_v11 }
 0x45f   :  { %v1591_v39 = vmul.f32 %v6206_v12, %v5927_v41  ;;  %v1647_v19 = vpack.c.bf16 %v1595_v50, %v1593_v43  ;;  %v1621_v55 = vmul.f32 %v6206_v12, %v6066_v16  ;;  %v1623_v40 = vmul.f32 %v6206_v12, %v6076_v13  ;;  %v8393_v43 = vld [vmem:[#allocation25_spill] sm:$0xff] }
 0x460   :  { %v1563_v45 = vadd.f32 %v6236_v23, %v1562_v38  ;;  %v2003_v22 = vpop.f32.mrf.mxu2  ;;  %v1613_v62 = vmul.f32 %v6206_v12, %v6009_v8  ;;  %v1615_v3 = vmul.f32 %v6206_v12, %v6020_v60  ;;  %v1609_v41 = vmul.f32 %v6206_v12, %v5989_v18 }
 0x461   :  { %v2062_v37 = vpop.f32.mrf.mxu3  ;;  %v2004_v20 = vadd.f32 %v2003_v22, %v8391_v7  ;;  %1722 = vmatpush.bf16.msrb.mxu0 %v1649_v28  ;;  %1735 = vmatpush.bf16.msrb.mxu1 %v1665_v57  ;;  %v1645_v38 = vpack.c.bf16 %v1591_v39, %v1589_v33  ;;  %v1585_v16 = vmul.f32 %v6206_v12, %v5900_v52  ;;  %v8392_v52 = vld [vmem:[#allocation30_spill] sm:$0xff]  ;;  %v8396_v33 = vld [vmem:[#allocation20_spill] sm:$0xff]  ;;  %v8397_v39 = vld [vmem:[#allocation21_spill] sm:$0xff] }
 0x462   :  { %v2063_v47 = vadd.f32 %v2062_v37, %v8391_v7  ;;  %v1564_v26 = vadd.f32 %v6240_v54, %v1563_v45  ;;  %v1657_v13 = vpack.c.bf16 %v1615_v3, %v1613_v62  ;;  %v1611_v8 = vmul.f32 %v6206_v12, %v5994_v5 }
 0x463   :  { %v2084_v46 = vpack.c.bf16 %v2004_v20, %v2001_v51  ;;  %v1661_v35 = vpack.c.bf16 %v1623_v40, %v1621_v55  ;;  %v1587_v60 = vmul.f32 %v6206_v12, %v5911_v15  ;;  %v1617_v45 = vmul.f32 %v6206_v12, %v6038_v27  ;;  %v8394_v20 = vld [vmem:[#allocation35_spill] sm:$0xff] }
 0x464   :  { %v2085_v6 = vpack.c.bf16 %v2063_v47, %v2060_v32  ;;  %v1565_v0 = vrot.slane %v1564_v26, 4  ;;  %v1619_v18 = vmul.f32 %v6206_v12, %v6050_v42  ;;  %v1655_v51 = vpack.c.bf16 %v1611_v8, %v1609_v41  ;;  %v8400_v41 = vld [vmem:[#allocation32_spill] sm:$0xff] }
 0x465   :  { %1723 = vmatpush.bf16.msrb.mxu0 %v1647_v19  ;;  %1736 = vmatpush.bf16.msrb.mxu1 %v1663_v31  ;;  %v1581_v37 = vmul.f32 %v6206_v12, %v8392_v52  ;;  %v1583_v5 = vmul.f32 %v6206_v12, %v8393_v43  ;;  %v1643_v50 = vpack.c.bf16 %v1587_v60, %v1585_v16  ;;  %v8395_v31 = vld [vmem:[#allocation27_spill] sm:$0xff]  ;;  %v8402_v16 = vld [vmem:[#allocation37_spill] sm:$0xff] }
 0x466   :  { %2114 = vxpose.binary.xlu2.c.b16.start [1/4] (short) %v2085_v6, %v2084_v46, 128  ;;  %v1566_v11 = vadd.f32 %v1565_v0, %v1564_v26  ;;  %v1659_v32 = vpack.c.bf16 %v1619_v18, %v1617_v45  ;;  %v1577_v47 = vmul.f32 %v6206_v12, %v8394_v20 }
 0x467   :  { %v1641_v42 = vpack.c.bf16 %v1583_v5, %v1581_v37  ;;  %v1579_v26 = vmul.f32 %v6206_v12, %v8395_v31  ;;  %v1607_v8 = vmul.f32 %v6206_v12, %v8402_v16  ;;  %v8405_v31 = vld [vmem:[#allocation22_spill] sm:$0xff] }
 0x468   :  { %v1567_v28 = vrot.slane %v1566_v11, 2  ;;  %v2006_v56 = vpop.f32.mrf.mxu2 }
 0x469   :  { %v2065_v57 = vpop.f32.mrf.mxu3  ;;  %1724 = vmatpush.bf16.msrb.mxu0 %v1645_v38  ;;  %1737 = vmatpush.bf16.msrb.mxu1 %v1661_v35  ;;  %v2007_v46 = vadd.f32 %v2006_v56, %v8396_v33  ;;  %v1639_v62 = vpack.c.bf16 %v1579_v26, %v1577_v47  ;;  %v6290_v38 = vpop.permute.xlu1 %130  ;;  %v8401_v56 = vld [vmem:[#allocation48_spill] sm:$0xff] }
 0x46a   :  { %v1568_v2 = vadd.f32 %v1567_v28, %v1566_v11  ;;  %v2066_v6 = vadd.f32 %v2065_v57, %v8396_v33  ;;  %v8398_v11 = vld [vmem:[#allocation36_spill] sm:$0xff]  ;;  %8399 = vst [vmem:[#allocation12_spill] sm:$0xff] %v6290_v38  ;;  %v1575_v28 = vmul.f32 %v6206_v12, %v8400_v41  ;;  %v1605_v57 = vmul.f32 %v6206_v12, %v8401_v56  ;;  %v8406_v33 = vld [vmem:[#allocation13_spill] sm:$0xff]  ;;  %v8411_v56 = vld [vmem:[#allocation34_spill] sm:$0xff] }
 0x46b   :  { %v1573_v3 = vmul.f32 %v6206_v12, %v8398_v11  ;;  %v8410_v41 = vld [vmem:[#allocation33_spill] sm:$0xff] }
 0x46c   :  { %v1569_v22 = vrot.slane %v1568_v2, 1 }
 0x46d   :  { %1725 = vmatpush.bf16.msrb.mxu0 %v1643_v50  ;;  %1738 = vmatpush.bf16.msrb.mxu1 %v1659_v32  ;;  %v1637_v43 = vpack.c.bf16 %v1575_v28, %v1573_v3 }
 0x46e   :  { %v1570_v15 = vadd.f32 %v1569_v22, %v1568_v2  ;;  %v8404_v22 = vld [vmem:[#allocation47_spill] sm:$0xff] }
 0x46f   :  { %v292_v52 = vadd.f32 %v8404_v22, %v6290_v38 }
 0x470   :  { %4220 = vrcp.f32 %v1570_v15  ;;  %v2009_v27 = vpop.f32.mrf.mxu2 }
 0x471   :  { %v2068_v7 = vpop.f32.mrf.mxu3  ;;  %v2010_v0 = vadd.f32 %v2009_v27, %v8397_v39  ;;  %1726 = vmatpush.bf16.msrb.mxu0 %v1641_v42  ;;  %1739 = vmatpush.bf16.msrb.mxu1 %v1657_v13  ;;  %v8403_v13 = vld [vmem:[#allocation24_spill] sm:$0xff] }
 0x472   :  { %v2069_v19 = vadd.f32 %v2068_v7, %v8397_v39  ;;  %v233_v60 = vadd.f32 %v8403_v13, %v6290_v38  ;;  %v8408_v39 = vld [vmem:[#allocation31_spill] sm:$0xff]  ;;  %v8413_v13 = vld [vmem:[#allocation42_spill] sm:$0xff] }
 0x473   :  { %v2088_v55 = vpack.c.bf16 %v2010_v0, %v2007_v46  ;;  %v8407_v46 = vld [vmem:[#allocation46_spill] sm:$0xff]  ;;  %v8409_v0 = vld [vmem:[#allocation52_spill] sm:$0xff] }
 0x474   :  { %v2089_v40 = vpack.c.bf16 %v2069_v19, %v2066_v6  ;;  %v300_v15 = vpack.c.bf16 %v233_v60, %v233_v60 }
 0x475   :  { %1727 = vmatpush.bf16.msrb.mxu0 %v1639_v62  ;;  %1740 = vmatpush.bf16.msrb.mxu1 %v1655_v51 }
 0x476   :  { %2115 = vxpose.binary.xlu2.c.b16.end [2/4] (short) %v2089_v40, %v2088_v55, 128  ;;  %v6298_v35 = vpop.eup %4220 }
 0x477   :  { %v1602_v45 = vmul.f32 %v6298_v35, %v6132_v21  ;;  %v1604_v18 = vmul.f32 %v6298_v35, %v6144_v36  ;;  %v1634_v2 = vmul.f32 %v6298_v35, %v6236_v23  ;;  %v1636_v12 = vmul.f32 %v6298_v35, %v6240_v54 }
 0x478   :  { %v1598_v37 = vmul.f32 %v6298_v35, %v6122_v25  ;;  %v1600_v51 = vmul.f32 %v6298_v35, %v6128_v24  ;;  %v1653_v21 = vpack.c.bf16 %v1607_v8, %v1605_v57  ;;  %v1630_v36 = vmul.f32 %v6298_v35, %v6212_v17  ;;  %v8412_v8 = vld [vmem:[#allocation17_spill] sm:$0xff] }
 0x479   :  { %v1652_v5 = vpack.c.bf16 %v1604_v18, %v1602_v45  ;;  %v1668_v50 = vpack.c.bf16 %v1636_v12, %v1634_v2  ;;  %v1632_v32 = vmul.f32 %v6298_v35, %v6229_v4  ;;  %1728 = vmatpush.bf16.msrb.mxu0 %v1637_v43  ;;  %v301_v54 = vpack.c.bf16 %v292_v52, %v292_v52  ;;  %v8414_v45 = vld [vmem:[#allocation44_spill] sm:$0xff] }
 0x47a   :  { %v1650_v23 = vpack.c.bf16 %v1600_v51, %v1598_v37  ;;  %1741 = vmatpush.bf16.msrb.mxu1 %v1653_v21  ;;  %v1594_v25 = vmul.f32 %v6298_v35, %v6100_v63  ;;  %v1596_v24 = vmul.f32 %v6298_v35, %v6110_v59  ;;  %v1626_v27 = vmul.f32 %v6298_v35, %v6204_v44  ;;  %v8415_v2 = vld [vmem:[#allocation16_spill] sm:$0xff]  ;;  %v4541_v37 = vld [vmem:[%s7998_s0 + $0x8] sm:$0xff] }
 0x47b   :  { %v1666_v17 = vpack.c.bf16 %v1632_v32, %v1630_v36  ;;  %v1628_v4 = vmul.f32 %v6298_v35, %v6209_v58  ;;  %v1590_v42 = vmul.f32 %v6298_v35, %v6084_v49  ;;  %v1592_v63 = vmul.f32 %v6298_v35, %v6094_v53  ;;  %v4540_v12 = vld [vmem:[%s7998_s0] sm:$0xff]  ;;  %v8416_v36 = vld [vmem:[#allocation51_spill] sm:$0xff]  ;;  %v8418_v32 = vld [vmem:[#allocation14_spill] sm:$0xff] }
 0x47c   :  { %1729 = vmatmul.bf16.vlgmr.msrb.gmra.mxu0 %v300_v15  ;;  %v1648_v7 = vpack.c.bf16 %v1596_v24, %v1594_v25  ;;  %v1622_v59 = vmul.f32 %v6298_v35, %v6198_v48  ;;  %v1614_v20 = vmul.f32 %v6298_v35, %v6174_v1  ;;  %v1616_v44 = vmul.f32 %v6298_v35, %v6177_v14  ;;  %v8419_v25 = vld [vmem:[#allocation26_spill] sm:$0xff] }
 0x47d   :  { %1747 = vmatpush.bf16.msra.mxu0 %v1652_v5  ;;  %1742 = vmatmul.bf16.vlgmr.msrb.gmra.mxu1 %v301_v54  ;;  %v1664_v47 = vpack.c.bf16 %v1628_v4, %v1626_v27  ;;  %v1624_v58 = vmul.f32 %v6298_v35, %v6201_v61  ;;  %v1610_v26 = vmul.f32 %v6298_v35, %v8405_v31  ;;  %v8417_v5 = vld [vmem:[#allocation43_spill] sm:$0xff]  ;;  %v8422_v27 = vld [vmem:[#allocation38_spill] sm:$0xff] }
 0x47e   :  { %1760 = vmatpush.bf16.msra.mxu1 %v1668_v50  ;;  %v1612_v49 = vmul.f32 %v6298_v35, %v6165_v29  ;;  %v1658_v53 = vpack.c.bf16 %v1616_v44, %v1614_v20  ;;  %v1606_v48 = vmul.f32 %v6298_v35, %v8406_v33  ;;  %v1608_v14 = vmul.f32 %v6298_v35, %v8407_v46  ;;  %v8423_v4 = vld [vmem:[#allocation50_spill] sm:$0xff]  ;;  %v56_v20 = vld [vmem:[%s8002_s4] sm:$0xff] }
 0x47f   :  { %v1646_v6 = vpack.c.bf16 %v1592_v63, %v1590_v42  ;;  %v1586_v61 = vmul.f32 %v6298_v35, %v8408_v39  ;;  %v1588_v19 = vmul.f32 %v6298_v35, %v8409_v0  ;;  %v1662_v55 = vpack.c.bf16 %v1624_v58, %v1622_v59  ;;  %v55_v58 = vld [vmem:[%s8001_s3 + $0x10] sm:$0xff]  ;;  %v8428_v39 = vld [vmem:[#allocation40_spill] sm:$0xff] }
 0x480   :  { %v1656_v1 = vpack.c.bf16 %v1612_v49, %v1610_v26  ;;  %v1618_v29 = vmul.f32 %v6298_v35, %v6181_v34  ;;  %v1620_v40 = vmul.f32 %v6298_v35, %v6191_v10  ;;  %v1654_v62 = vpack.c.bf16 %v1608_v14, %v1606_v48  ;;  %v8425_v48 = vld [vmem:[#allocation45_spill] sm:$0xff]  ;;  %v8427_v14 = vld [vmem:[#allocation23_spill] sm:$0xff]  ;;  %v8429_v0 = vld [vmem:[#allocation28_spill] sm:$0xff] }
 0x481   :  { %1748 = vmatpush.bf16.msra.mxu0 %v1650_v23  ;;  %v1644_v11 = vpack.c.bf16 %v1588_v19, %v1586_v61  ;;  %v1582_v28 = vmul.f32 %v6298_v35, %v8410_v41  ;;  %v1584_v57 = vmul.f32 %v6298_v35, %v8411_v56  ;;  %v1578_v34 = vmul.f32 %v6298_v35, %v8412_v8  ;;  %v53_v23 = vld [vmem:[%s8001_s3] sm:$0xff]  ;;  %v8430_v19 = vld [vmem:[#allocation39_spill] sm:$0xff]  ;;  %v57_v56 = vld [vmem:[%s8002_s4 + $0x8] sm:$0xff] }
 0x482   :  { %1761 = vmatpush.bf16.msra.mxu1 %v1666_v17  ;;  %v1660_v3 = vpack.c.bf16 %v1620_v40, %v1618_v29  ;;  %v1580_v10 = vmul.f32 %v6298_v35, %v8413_v13  ;;  %v1574_v18 = vmul.f32 %v6298_v35, %v8414_v45  ;;  %v1576_v22 = vmul.f32 %v6298_v35, %v8415_v2 }
 0x483   :  { %v1642_v16 = vpack.c.bf16 %v1584_v57, %v1582_v28  ;;  %v1692_v50 = vadd.f32 %v8417_v5, %v8416_v36  ;;  %v1977_v24 = vadd.f32 %v8419_v25, %v8418_v32 }
 0x484   :  { %v1640_v60 = vpack.c.bf16 %v1580_v10, %v1578_v34  ;;  %v1638_v52 = vpack.c.bf16 %v1576_v22, %v1574_v18 }
 0x485   :  { %1749 = vmatpush.bf16.msra.mxu0 %v1648_v7  ;;  %v8424_v7 = vpack.c.bf16 %v8422_v27, %v8423_v4  ;;  %v6481_v27 = vpop.permute.xlu0 %1785 }
 0x486   :  { %1762 = vmatpush.bf16.msra.mxu1 %v1664_v47  ;;  %v54_v47 = vld [vmem:[%s8001_s3 + $0x8] sm:$0xff]  ;;  %8436 = vst [vmem:[#allocation30_spill] sm:$0xff] %v6481_v27 }
 0x489   :  { %1750 = vmatpush.bf16.msra.mxu0 %v1646_v6  ;;  %v2036_v6 = vadd.f32 %v8427_v14, %v8418_v32 }
 0x48a   :  { %1763 = vmatpush.bf16.msra.mxu1 %v1662_v55  ;;  %v8431_v55 = vpack.c.bf16 %v8429_v0, %v8430_v19 }
 0x48d   :  { %1751 = vmatpush.bf16.msra.mxu0 %v1644_v11 }
 0x48e   :  { %1764 = vmatpush.bf16.msra.mxu1 %v1660_v3 }
 0x491   :  { %1752 = vmatpush.bf16.msra.mxu0 %v1642_v16 }
 0x492   :  { %1765 = vmatpush.bf16.msra.mxu1 %v1658_v53 }
 0x495   :  { %1753 = vmatpush.bf16.msra.mxu0 %v1640_v60 }
 0x496   :  { %1766 = vmatpush.bf16.msra.mxu1 %v1656_v1  ;;  %v8426_v1 = vld [vmem:[#allocation10_spill] sm:$0xff] }
 0x497   :  { %v1718_v46 = vadd.f32 %v8426_v1, %v8425_v48 }
 0x499   :  { %1754 = vmatpush.bf16.msra.mxu0 %v1638_v52 }
 0x49a   :  { %1767 = vmatpush.bf16.msra.mxu1 %v1654_v62 }
 0x49c   :  { %1755 = vmatmul.bf16.vlgmr.msra.gmra.mxu0 %v300_v15  ;;  %v8420_v15 = vld [vmem:[#allocation15_spill] sm:$0xff] }
 0x49d   :  { %1811 = vmatpush.msrb.mxu0 %v4540_v12  ;;  %1768 = vmatmul.bf16.vlgmr.msra.gmra.mxu1 %v301_v54  ;;  %v8421_v54 = vld [vmem:[#allocation29_spill] sm:$0xff]  ;;  %v2033_v61 = vadd.f32 %v8428_v39, %v8420_v15 }
 0x49e   :  { %1837 = vmatpush.msrb.mxu1 %v4541_v37  ;;  %v1974_v17 = vadd.f32 %v8421_v54, %v8420_v15 }
 0x49f   :  { %v2075_v62 = vpack.c.bf16 %v2036_v6, %v2033_v61 }
 0x4a0   :  { %v2074_v59 = vpack.c.bf16 %v1977_v24, %v1974_v17 }
 0x4ea   :  { %v2098_v35 = vpop.trf.xlu1 }
 0x4f2   :  { %v6390_v44 = vpop.trf.xlu1 }
 0x4f9   :  { %v1730_v51 = vpop.f32.mrf.mxu0 }
 0x4fa   :  { %v1743_v43 = vpop.f32.mrf.mxu1  ;;  %v2100_v31 = vpop.trf.xlu1 }
 0x4fb   :  { %v1744_v21 = vadd.f32 %v1743_v43, %v1730_v51 }
 0x4fd   :  { %1812 = vmatpush.msrb.mxu0 %v1744_v21 }
 0x4ff   :  { %1813 = vmatpush.msrb.mxu0 %v1692_v50 }
 0x500   :  { %3834 = vmatmul.msk.f32.vlgmr.msrb.gmra.mxu0 %vm1788_vm2, %v53_v23 }
 0x501   :  { %2240 = vmatpush.bf16.msra.mxu0 %v8424_v7  ;;  %v1732_v42 = vpop.f32.mrf.mxu0 }
 0x502   :  { %v1745_v63 = vpop.f32.mrf.mxu1  ;;  %v6401_v33 = vpop.trf.xlu1 }
 0x505   :  { %2241 = vmatpush.bf16.msra.mxu0 %v2074_v59 }
 0x507   :  { %v6418_v41 = vpop.trf.xlu2 }
 0x508   :  { %1775 = vperm.xlu1 %3956, %v56_v20   ;;  %3835 = vmatmul.msk.f32.gmra.mxu0 %vm1788_vm2, %v54_v47 }
 0x50a   :  { %v2102_v11 = vpop.trf.xlu1 }
 0x50f   :  { %v6425_v57 = vpop.trf.xlu2 }
 0x510   :  { %3836 = vmatmul.msk.f32.gmra.mxu0 %vm1788_vm2, %v55_v58 }
 0x512   :  { %v6415_v3 = vpop.trf.xlu1 }
 0x517   :  { %v6429_v8 = vpop.trf.xlu2 }
 0x518   :  { %3876 = vmatmul.msk.bf16.vlgmr.msra.gmra.mxu0 %vm358_vm1, %v2098_v35 }
 0x519   :  { %v1756_v26 = vpop.f32.mrf.mxu0 }
 0x51a   :  { %v1769_v49 = vpop.f32.mrf.mxu1  ;;  %v2104_v28 = vpop.trf.xlu1 }
 0x51b   :  { %v1770_v53 = vadd.f32 %v1769_v49, %v1756_v26 }
 0x51d   :  { %1838 = vmatpush.msrb.mxu1 %v1770_v53 }
 0x51f   :  { %1839 = vmatpush.msrb.mxu1 %v1718_v46  ;;  %v6433_v13 = vpop.trf.xlu2 }
 0x520   :  { %3837 = vmatmul.msk.f32.vlgmr.msrb.gmra.mxu1 %vm1788_vm2, %v53_v23 }
 0x521   :  { %2409 = vmatpush.bf16.msra.mxu1 %v8431_v55  ;;  %v1758_v29 = vpop.f32.mrf.mxu0 }
 0x522   :  { %v1771_v40 = vpop.f32.mrf.mxu1  ;;  %v6427_v16 = vpop.trf.xlu1 }
 0x525   :  { %2410 = vmatpush.bf16.msra.mxu1 %v2075_v62 }
 0x527   :  { %v6439_v60 = vpop.trf.xlu2 }
 0x528   :  { %3838 = vmatmul.msk.f32.gmra.mxu1 %vm1788_vm2, %v54_v47  ;;  %3877 = vmatmul.msk.bf16.gmra.mxu0 %vm358_vm1, %v2100_v31 }
 0x52a   :  { %v2106_v34 = vpop.trf.xlu1 }
 0x52f   :  { %v6441_v18 = vpop.trf.xlu2 }
 0x530   :  { %3839 = vmatmul.msk.f32.gmra.mxu1 %vm1788_vm2, %v55_v58  ;;  %8432 = vst [vmem:[#allocation8_spill] sm:$0xff] %v6441_v18 }
 0x532   :  { %v6435_v10 = vpop.trf.xlu1 }
 0x537   :  { %v6447_v22 = vpop.trf.xlu2 }
 0x538   :  { %3908 = vmatmul.msk.bf16.vlgmr.msra.gmra.mxu1 %vm358_vm1, %v2098_v35  ;;  %3878 = vmatmul.msk.bf16.gmra.mxu0 %vm358_vm1, %v2102_v11 }
 0x53a   :  { %v2108_v45 = vpop.trf.xlu1 }
 0x53f   :  { %1780 = vperm.xlu2 %3957, %v57_v56   ;;  %v6450_v12 = vpop.trf.xlu2 }
 0x540   :  { %8433 = vst [vmem:[#allocation11_spill] sm:$0xff] %v6450_v12 }
 0x542   :  { %v6445_v2 = vpop.trf.xlu1 }
 0x547   :  { %v6455_v43 = vpop.trf.xlu2 }
 0x548   :  { %3909 = vmatmul.msk.bf16.gmra.mxu1 %vm358_vm1, %v2100_v31  ;;  %3879 = vmatmul.msk.bf16.gmra.mxu0 %vm358_vm1, %v2104_v28 }
 0x54a   :  { %v2110_v52 = vpop.trf.xlu1 }
 0x54f   :  { %v6461_v36 = vpop.trf.xlu2 }
 0x550   :  { %8434 = vst [vmem:[#allocation18_spill] sm:$0xff] %v6461_v36 }
 0x552   :  { %v6453_v37 = vpop.trf.xlu1 }
 0x557   :  { %v6463_v50 = vpop.trf.xlu2 }
 0x558   :  { %3910 = vmatmul.msk.bf16.gmra.mxu1 %vm358_vm1, %v2102_v11  ;;  %3880 = vmatmul.msk.bf16.gmra.mxu0 %vm358_vm1, %v2106_v34 }
 0x55a   :  { %v2112_v21 = vpop.trf.xlu1 }
 0x55f   :  { %v6472_v24 = vpop.trf.xlu2 }
 0x560   :  { %8435 = vst [vmem:[#allocation19_spill] sm:$0xff] %v6472_v24 }
 0x562   :  { %v6476_v54 = vpop.trf.xlu1 }
 0x567   :  { %v6485_v4 = vpop.trf.xlu2 }
 0x568   :  { %3911 = vmatmul.msk.bf16.gmra.mxu1 %vm358_vm1, %v2104_v28  ;;  %3881 = vmatmul.msk.bf16.gmra.mxu0 %vm358_vm1, %v2108_v45 }
 0x56f   :  { %v6495_v31 = vpop.trf.xlu2 }
 0x570   :  { %8438 = vst [vmem:[#allocation35_spill] sm:$0xff] %v6495_v31 }
 0x577   :  { %v6505_v14 = vpop.trf.xlu2 }
 0x578   :  { %3912 = vmatmul.msk.bf16.gmra.mxu1 %vm358_vm1, %v2106_v34  ;;  %3882 = vmatmul.msk.bf16.gmra.mxu0 %vm358_vm1, %v2110_v52 }
 0x57a   :  { %v6490_v20 = vpop.permute.xlu1 %1775 }
 0x57b   :  { %8437 = vst [vmem:[#allocation25_spill] sm:$0xff] %v6490_v20 }
 0x57d   :  { %v1815_v51 = vpop.f32.mrf.mxu0 }
 0x57e   :  { %v1816_v47 = vadd.f32 %v1815_v51, %v6490_v20 }
 0x57f   :  { %v6516_v55 = vpop.trf.xlu2 }
 0x580   :  { %v3842_v26 = vmul.f32 -1.442695, %v1816_v47  ;;  %8439 = vst [vmem:[#allocation27_spill] sm:$0xff] %v6516_v55 }
 0x585   :  { %v6457_v35 = vpop.f32.mrf.mxu0 }
 0x588   :  { %3913 = vmatmul.msk.bf16.gmra.mxu1 %vm358_vm1, %v2108_v45  ;;  %3883 = vmatmul.msk.bf16.gmra.mxu0 %vm358_vm1, %v2112_v21 }
 0x58d   :  { %v1821_v5 = vpop.f32.mrf.mxu0 }
 0x58e   :  { %v1822_v7 = vadd.f32 %v1821_v5, %v6481_v27 }
 0x590   :  { %v3840_v63 = vmul.f32 -1.442695, %v1822_v7 }
 0x592   :  { %4222 = vpow2.f32 %v3840_v63 }
 0x593   :  { %4224 = vpow2.f32 %v3842_v26 }
 0x595   :  { %v6465_v23 = vpop.f32.mrf.mxu0 }
 0x598   :  { %3914 = vmatmul.msk.bf16.gmra.mxu1 %vm358_vm1, %v2110_v52  ;;  %3884 = vmatmul.msk.bf16.gmra.mxu0 %vm358_vm1, %v6390_v44  ;;  %v4223_v53 = vpop.eup %4222 }
 0x599   :  { %v1856_v48 = vadd.f32 1.0, %v4223_v53  ;;  %v4225_v46 = vpop.eup %4224  ;;  %v6525_v51 = vpop.permute.xlu2 %1780 }
 0x59a   :  { %v1904_v39 = vadd.f32 1.0, %v4225_v46  ;;  %8440 = vst [vmem:[#allocation20_spill] sm:$0xff] %v6525_v51  ;;  %v1819_v5 = vadd.f32 %v6457_v35, %v6525_v51 }
 0x59b   :  { %4226 = vrcp.f32 %v1856_v48  ;;  %v1869_v47 = vand.u32 2147483648, %v1856_v48  ;;  %vm1863_vm4 = vweird.f32 %v1856_v48  ;;  %v1867_v26 = vand.u32 2147483647, %v1856_v48 }
 0x59c   :  { %4228 = vrcp.f32 %v1904_v39  ;;  %vm1911_vm8 = vweird.f32 %v1904_v39 }
 0x59d   :  { %v1841_v32 = vpop.f32.mrf.mxu1  ;;  %v6470_v25 = vpop.f32.mrf.mxu0  ;;  %v1870_v35 = vor.u32 1.1754944e-38, %v1869_v47  ;;  %vm1868_vm7 = vcmp.eq.f32.partialorder %v1867_v26, 8.507059e+37 }
 0x59e   :  { %v1842_v56 = vadd.f32 %v1841_v32, %v6490_v20 }
 0x5a0   :  { %v3843_v52 = vmul.f32 -1.442695, %v1842_v56 }
 0x5a1   :  { %v4227_v0 = vpop.eup %4226 }
 0x5a2   :  { %v1859_v29 = vmul.f32 %v4227_v0, %v1856_v48  ;;  %v4229_v40 = vpop.eup %4228  ;;  %vm1864_vm3 = vweird.f32 %v4227_v0 }
 0x5a3   :  { %v1907_v34 = vmul.f32 %v4229_v40, %v1904_v39  ;;  %vm1865_vm5 = vmor %vm1863_vm4, %vm1864_vm3  ;;  %vm1912_vm6 = vweird.f32 %v4229_v40 }
 0x5a4   :  { %v1860_v28 = vsub.f32 1.0, %v1859_v29  ;;  %vm1913_vm9 = vmor %vm1911_vm8, %vm1912_vm6 }
 0x5a5   :  { %v6474_v15 = vpop.f32.mrf.mxu1  ;;  %v6478_v17 = vpop.f32.mrf.mxu0 }
 0x5a8   :  { %3915 = vmatmul.msk.bf16.gmra.mxu1 %vm358_vm1, %v2112_v21  ;;  %3885 = vmatmul.msk.bf16.gmra.mxu0 %vm358_vm1, %v6401_v33  ;;  %v1908_v21 = vsub.f32 1.0, %v1907_v34 }
 0x5aa   :  { %v1909_v32 = vmul.f32 %v4229_v40, %v1908_v21  ;;  %v4542_v21 = vld [vmem:[%s7998_s0 + $0x10] sm:$0xff] }
 0x5ac   :  { %v1910_v29 = vadd.f32 %v4229_v40, %v1909_v32 }
 0x5ad   :  { %v1847_v42 = vpop.f32.mrf.mxu1  ;;  %v6488_v59 = vpop.f32.mrf.mxu0 }
 0x5ae   :  { %v1848_v19 = vadd.f32 %v1847_v42, %v6481_v27  ;;  %v2573_v31 = vmax.f32 %v6470_v25, %v6488_v59 }
 0x5b0   :  { %v3841_v62 = vmul.f32 -1.442695, %v1848_v19 }
 0x5b2   :  { %4230 = vpow2.f32 %v3841_v62 }
 0x5b3   :  { %4232 = vpow2.f32 %v3843_v52 }
 0x5b4   :  { %4234 = vtanh.f32 %v1819_v5 }
 0x5b5   :  { %v6493_v58 = vpop.f32.mrf.mxu1  ;;  %v6497_v49 = vpop.f32.mrf.mxu0 }
 0x5b8   :  { %3916 = vmatmul.msk.bf16.gmra.mxu1 %vm358_vm1, %v6390_v44  ;;  %3886 = vmatmul.msk.bf16.gmra.mxu0 %vm358_vm1, %v6415_v3  ;;  %v4231_v63 = vpop.eup %4230 }
 0x5b9   :  { %v1857_v19 = vadd.f32 1.0, %v4231_v63  ;;  %v4233_v62 = vpop.eup %4232  ;;  %v1914_v63 = vsel %vm1913_vm9, %v4229_v40, %v1910_v29 }
 0x5bb   :  { %4236 = vrcp.f32 %v1857_v19  ;;  %vm1878_vm12 = vweird.f32 %v1857_v19 }
 0x5bd   :  { %v6503_v1 = vpop.f32.mrf.mxu1  ;;  %v6507_v6 = vpop.f32.mrf.mxu0 }
 0x5be   :  { %v2575_v36 = vmax.f32 %v2573_v31, %v6507_v6 }
 0x5c5   :  { %v6509_v61 = vpop.f32.mrf.mxu1  ;;  %v6511_v44 = vpop.f32.mrf.mxu0 }
 0x5c8   :  { %3917 = vmatmul.msk.bf16.gmra.mxu1 %vm358_vm1, %v6401_v33  ;;  %3887 = vmatmul.msk.bf16.gmra.mxu0 %vm358_vm1, %v6427_v16  ;;  %v1861_v33 = vmul.f32 %v4227_v0, %v1860_v28  ;;  %v1917_v28 = vand.u32 2147483648, %v1904_v39 }
 0x5ca   :  { %v1862_v42 = vadd.f32 %v4227_v0, %v1861_v33  ;;  %v4235_v33 = vpop.eup %4234  ;;  %v1918_v47 = vor.u32 1.1754944e-38, %v1917_v28 }
 0x5cc   :  { %v1866_v46 = vsel %vm1865_vm5, %v4227_v0, %v1862_v42  ;;  %v1905_v0 = vadd.f32 1.0, %v4233_v62  ;;  %vm1941_vm5 = vcmask 1043456  }
 0x5cd   :  { %v6520_v11 = vpop.f32.mrf.mxu1  ;;  %v6523_v45 = vpop.f32.mrf.mxu0  ;;  %v1871_v48 = vsel %vm1868_vm7, %v1870_v35, %v1866_v46 }
 0x5ce   :  { %v1888_v34 = vsub.f32 1.0, %v1871_v48  ;;  %v1894_v42 = vmul.f32 %v4235_v33, %v1871_v48  ;;  %v4237_v46 = vpop.eup %4236  ;;  %4238 = vrcp.f32 %v1905_v0  ;;  %vm1926_vm0 = vweird.f32 %v1905_v0 }
 0x5cf   :  { %v1874_v20 = vmul.f32 %v4237_v46, %v1857_v19  ;;  %vm1879_vm11 = vweird.f32 %v4237_v46 }
 0x5d0   :  { %v1890_v5 = vmul.f32 %v4542_v21, %v1888_v34  ;;  %v1884_v21 = vand.u32 2147483648, %v1857_v19  ;;  %vm1880_vm13 = vmor %vm1878_vm12, %vm1879_vm11 }
 0x5d1   :  { %v1875_v38 = vsub.f32 1.0, %v1874_v20 }
 0x5d2   :  { %v1896_v32 = vadd.f32 %v1894_v42, %v1890_v5 }
 0x5d3   :  { %v1876_v28 = vmul.f32 %v4237_v46, %v1875_v38 }
 0x5d4   :  { %v4239_v27 = vpop.eup %4238 }
 0x5d5   :  { %v6529_v7 = vpop.f32.mrf.mxu1  ;;  %v6531_v53 = vpop.f32.mrf.mxu0  ;;  %v1922_v40 = vmul.f32 %v4239_v27, %v1905_v0  ;;  %v1877_v33 = vadd.f32 %v4237_v46, %v1876_v28  ;;  %vm1927_vm14 = vweird.f32 %v4239_v27 }
 0x5d6   :  { %vm1928_vm3 = vmor %vm1926_vm0, %vm1927_vm14 }
 0x5d7   :  { %v1923_v34 = vsub.f32 1.0, %v1922_v40  ;;  %v1881_v42 = vsel %vm1880_vm13, %v4237_v46, %v1877_v33  ;;  %v1930_v40 = vand.u32 2147483647, %v1905_v0 }
 0x5d8   :  { %3918 = vmatmul.msk.bf16.gmra.mxu1 %vm358_vm1, %v6415_v3  ;;  %3888 = vmatmul.msk.bf16.gmra.mxu0 %vm358_vm1, %v6435_v10  ;;  %v1915_v3 = vand.u32 2147483647, %v1904_v39 }
 0x5d9   :  { %v1924_v5 = vmul.f32 %v4239_v27, %v1923_v34  ;;  %v4543_v34 = vld [vmem:[%s7998_s0 + $0x18] sm:$0xff]  ;;  %vm1931_vm4 = vcmp.eq.f32.partialorder %v1930_v40, 8.507059e+37 }
 0x5da   :  { %vm1916_vm10 = vcmp.eq.f32.partialorder %v1915_v3, 8.507059e+37  ;;  %v1845_v3 = vadd.f32 %v6474_v15, %v6525_v51  ;;  %v1932_v15 = vand.u32 2147483648, %v1905_v0 }
 0x5db   :  { %v1919_v26 = vsel %vm1916_vm10, %v1918_v47, %v1914_v63  ;;  %v1885_v63 = vor.u32 1.1754944e-38, %v1884_v21  ;;  %v1925_v38 = vadd.f32 %v4239_v27, %v1924_v5 }
 0x5dc   :  { %v1936_v35 = vmul.f32 %v1919_v26, %v1896_v32  ;;  %4240 = vtanh.f32 %v1845_v3  ;;  %v1933_v21 = vor.u32 1.1754944e-38, %v1932_v15 }
 0x5dd   :  { %v6537_v56 = vpop.f32.mrf.mxu1  ;;  %v6539_v52 = vpop.f32.mrf.mxu0  ;;  %v1929_v33 = vsel %vm1928_vm3, %v4239_v27, %v1925_v38 }
 0x5de   :  { %v1934_v0 = vsel %vm1931_vm4, %v1933_v21, %v1929_v33 }
 0x5e2   :  { %v4241_v28 = vpop.eup %4240 }
 0x5e5   :  { %v6544_v39 = vpop.f32.mrf.mxu1  ;;  %v6546_v62 = vpop.f32.mrf.mxu0 }
 0x5e8   :  { %3919 = vmatmul.msk.bf16.gmra.mxu1 %vm358_vm1, %v6427_v16  ;;  %3889 = vmatmul.msk.bf16.gmra.mxu0 %vm358_vm1, %v6445_v2  ;;  %v1882_v16 = vand.u32 2147483647, %v1857_v19 }
 0x5ea   :  { %vm1883_vm15 = vcmp.eq.f32.partialorder %v1882_v16, 8.507059e+37 }
 0x5eb   :  { %v1886_v26 = vsel %vm1883_vm15, %v1885_v63, %v1881_v42 }
 0x5ec   :  { %v1889_v19 = vsub.f32 1.0, %v1886_v26  ;;  %v1895_v3 = vmul.f32 %v4241_v28, %v1886_v26 }
 0x5ed   :  { %v6552_v29 = vpop.f32.mrf.mxu1  ;;  %v6554_v48 = vpop.f32.mrf.mxu0 }
 0x5f5   :  { %v6558_v20 = vpop.f32.mrf.mxu1  ;;  %v6560_v47 = vpop.f32.mrf.mxu0 }
 0x5f6   :  { %8441 = vst [vmem:[#allocation21_spill] sm:$0xff] %v6560_v47 }
 0x5f8   :  { %3920 = vmatmul.msk.bf16.gmra.mxu1 %vm358_vm1, %v6435_v10  ;;  %3890 = vmatmul.msk.bf16.gmra.mxu0 %vm358_vm1, %v6453_v37  ;;  %v1891_v10 = vmul.f32 %v4543_v34, %v1889_v19 }
 0x5fa   :  { %v1897_v5 = vadd.f32 %v1895_v3, %v1891_v10 }
 0x5fc   :  { %v1937_v42 = vmul.f32 %v1934_v0, %v1897_v5  ;;  %v1947_v63 = vrot.slane %v1897_v5, 4 }
 0x5fd   :  { %v6566_v46 = vpop.f32.mrf.mxu1  ;;  %v6571_v16 = vpop.f32.mrf.mxu0 }
 0x5fe   :  { %v1940_v51 = vrot.slane %v1937_v42, 4  ;;  %v1948_v9 = vsel %vm1941_vm5, %v1896_v32, %v1947_v63  ;;  %v2572_v63 = vmax.f32 %v6465_v23, %v6478_v17 }
 0x5ff   :  { %1950 = vst [vmem:[#allocation4] sm:$0xff] %v1948_v9 }
 0x600   :  { %v1942_v55 = vsel %vm1941_vm5, %v1936_v35, %v1940_v51  ;;  %v2574_v24 = vmax.f32 %v2572_v63, %v6497_v49 }
 0x601   :  { %1944 = vst [vmem:[#allocation2] sm:$0xff] %v1942_v55 }
 0x602   :  { %v2576_v12 = vmax.f32 %v2574_v24, %v6511_v44 }
 0x605   :  { %v6574_v30 = vpop.f32.mrf.mxu1  ;;  %v6577_v26 = vpop.f32.mrf.mxu0 }
 0x608   :  { %3921 = vmatmul.msk.bf16.gmra.mxu1 %vm358_vm1, %v6445_v2  ;;  %3891 = vmatmul.msk.bf16.gmra.mxu0 %vm358_vm1, %v6476_v54 }
 0x60d   :  { %v6583_v27 = vpop.f32.mrf.mxu1  ;;  %v6585_v38 = vpop.f32.mrf.mxu0 }
 0x615   :  { %v6587_v15 = vpop.f32.mrf.mxu1  ;;  %v6589_v9 = vpop.f32.mrf.mxu0 }
 0x618   :  { %3922 = vmatmul.msk.bf16.gmra.mxu1 %vm358_vm1, %v6453_v37  ;;  %3892 = vmatmul.msk.bf16.gmra.mxu0 %vm358_vm1, %v6418_v41 }
 0x61d   :  { %v6595_v55 = vpop.f32.mrf.mxu1  ;;  %v6597_v2 = vpop.f32.mrf.mxu0 }
 0x625   :  { %v6599_v51 = vpop.f32.mrf.mxu1  ;;  %v6601_v32 = vpop.f32.mrf.mxu0 }
 0x628   :  { %3923 = vmatmul.msk.bf16.gmra.mxu1 %vm358_vm1, %v6476_v54  ;;  %3893 = vmatmul.msk.bf16.gmra.mxu0 %vm358_vm1, %v6429_v8 }
 0x62d   :  { %v6607_v35 = vpop.f32.mrf.mxu1  ;;  %v6609_v37 = vpop.f32.mrf.mxu0 }
 0x635   :  { %v6611_v40 = vpop.f32.mrf.mxu1  ;;  %v6613_v19 = vpop.f32.mrf.mxu0 }
 0x638   :  { %3924 = vmatmul.msk.bf16.gmra.mxu1 %vm358_vm1, %v6418_v41  ;;  %3894 = vmatmul.msk.bf16.gmra.mxu0 %vm358_vm1, %v6439_v60 }
 0x63d   :  { %v6619_v28 = vpop.f32.mrf.mxu0  ;;  %v6621_v54 = vpop.f32.mrf.mxu1 }
 0x645   :  { %v6623_v34 = vpop.f32.mrf.mxu0  ;;  %v6627_v10 = vpop.f32.mrf.mxu1 }
 0x646   :  { %8442 = vst [vmem:[#allocation36_spill] sm:$0xff] %v6627_v10 }
 0x648   :  { %3925 = vmatmul.msk.bf16.gmra.mxu1 %vm358_vm1, %v6429_v8  ;;  %3895 = vmatmul.msk.bf16.gmra.mxu0 %vm358_vm1, %v6447_v22 }
 0x64d   :  { %v6631_v3 = vpop.f32.mrf.mxu0  ;;  %v6633_v41 = vpop.f32.mrf.mxu1 }
 0x64e   :  { %8443 = vst [vmem:[#allocation32_spill] sm:$0xff] %v6633_v41 }
 0x655   :  { %v6635_v33 = vpop.f32.mrf.mxu0  ;;  %v6641_v21 = vpop.f32.mrf.mxu1 }
 0x656   :  { %8444 = vst [vmem:[#allocation48_spill] sm:$0xff] %v6635_v33 }
 0x657   :  { %8445 = vst [vmem:[#allocation37_spill] sm:$0xff] %v6641_v21 }
 0x658   :  { %3926 = vmatmul.msk.bf16.gmra.mxu1 %vm358_vm1, %v6439_v60  ;;  %3896 = vmatmul.msk.bf16.gmra.mxu0 %vm358_vm1, %v6455_v43 }
 0x65d   :  { %v6643_v8 = vpop.f32.mrf.mxu0  ;;  %v6649_v0 = vpop.f32.mrf.mxu1 }
 0x65e   :  { %8446 = vst [vmem:[#allocation24_spill] sm:$0xff] %v6643_v8 }
 0x65f   :  { %8447 = vst [vmem:[#allocation47_spill] sm:$0xff] %v6649_v0  ;;  %v2577_v0 = vmax.f32 %v2575_v36, %v6523_v45 }
 0x661   :  { %v2579_v21 = vmax.f32 %v2577_v0, %v6539_v52 }
 0x663   :  { %v2581_v31 = vmax.f32 %v2579_v21, %v6554_v48 }
 0x665   :  { %v6645_v5 = vpop.f32.mrf.mxu0  ;;  %v6655_v60 = vpop.f32.mrf.mxu1 }
 0x666   :  { %8448 = vst [vmem:[#allocation22_spill] sm:$0xff] %v6655_v60  ;;  %v2578_v60 = vmax.f32 %v2576_v12, %v6531_v53 }
 0x668   :  { %3927 = vmatmul.msk.bf16.gmra.mxu1 %vm358_vm1, %v6447_v22  ;;  %3897 = vmatmul.msk.bf16.gmra.mxu0 %vm358_vm1, %v6463_v50  ;;  %v2580_v63 = vmax.f32 %v2578_v60, %v6546_v62 }
 0x66a   :  { %v2582_v18 = vmax.f32 %v2580_v63, %v6560_v47 }
 0x66c   :  { %v2584_v36 = vmax.f32 %v2582_v18, %v6577_v26 }
 0x66d   :  { %v6653_v42 = vpop.f32.mrf.mxu0  ;;  %v6675_v41 = vpop.f32.mrf.mxu1 }
 0x66e   :  { %8450 = vst [vmem:[#allocation46_spill] sm:$0xff] %v6675_v41  ;;  %v2586_v0 = vmax.f32 %v2584_v36, %v6589_v9 }
 0x670   :  { %v2588_v60 = vmax.f32 %v2586_v0, %v6601_v32 }
 0x672   :  { %v2590_v41 = vmax.f32 %v2588_v60, %v6613_v19 }
 0x674   :  { %v2592_v18 = vmax.f32 %v2590_v41, %v6623_v34 }
 0x675   :  { %v6663_v22 = vpop.f32.mrf.mxu0  ;;  %v6689_v47 = vpop.f32.mrf.mxu1 }
 0x676   :  { %8449 = vst [vmem:[#allocation13_spill] sm:$0xff] %v6663_v22  ;;  %v2594_v36 = vmax.f32 %v2592_v18, %v6635_v33 }
 0x678   :  { %3928 = vmatmul.msk.bf16.gmra.mxu1 %vm358_vm1, %v6455_v43  ;;  %3898 = vmatmul.msk.bf16.gmra.mxu0 %vm358_vm1, %v6485_v4  ;;  %v2583_v43 = vmax.f32 %v2581_v31, %v6571_v16 }
 0x67a   :  { %v2585_v12 = vmax.f32 %v2583_v43, %v6585_v38 }
 0x67c   :  { %v2587_v10 = vmax.f32 %v2585_v12, %v6597_v2 }
 0x67d   :  { %v6679_v24 = vpop.f32.mrf.mxu0  ;;  %v6707_v41 = vpop.f32.mrf.mxu1 }
 0x67e   :  { %8451 = vst [vmem:[#allocation31_spill] sm:$0xff] %v6679_v24  ;;  %v2589_v21 = vmax.f32 %v2587_v10, %v6609_v37  ;;  %v2596_v10 = vmax.f32 %v2594_v36, %v6645_v5 }
 0x680   :  { %v2591_v63 = vmax.f32 %v2589_v21, %v6619_v28  ;;  %v2598_v60 = vmax.f32 %v2596_v10, %v6663_v22 }
 0x682   :  { %v2593_v43 = vmax.f32 %v2591_v63, %v6631_v3 }
 0x684   :  { %v2595_v12 = vmax.f32 %v2593_v43, %v6643_v8 }
 0x685   :  { %v6691_v31 = vpop.f32.mrf.mxu0 }
 0x686   :  { %v2597_v0 = vmax.f32 %v2595_v12, %v6653_v42  ;;  %v2600_v63 = vmax.f32 %v2598_v60, %v6691_v31  ;;  %v6713_v12 = vpop.f32.mrf.mxu1 }
 0x688   :  { %3929 = vmatmul.msk.bf16.gmra.mxu1 %vm358_vm1, %v6463_v50  ;;  %3899 = vmatmul.msk.bf16.gmra.mxu0 %vm358_vm1, %v6505_v14  ;;  %v2599_v21 = vmax.f32 %v2597_v0, %v6679_v24 }
 0x68d   :  { %v6705_v50 = vpop.f32.mrf.mxu0 }
 0x68e   :  { %v2601_v18 = vmax.f32 %v2599_v21, %v6705_v50  ;;  %v6719_v22 = vpop.f32.mrf.mxu1 }
 0x690   :  { %v2602_v43 = vmax.f32 %v2600_v63, %v2601_v18 }
 0x692   :  { %v2603_v8 = vrot.slane %v2602_v43, 4 }
 0x694   :  { %v2604_v33 = vmax.f32 %v2602_v43, %v2603_v8 }
 0x696   :  { %v2605_v36 = vrot.slane %v2604_v33, 2 }
 0x698   :  { %3930 = vmatmul.msk.bf16.gmra.mxu1 %vm358_vm1, %v6485_v4  ;;  %v2606_v10 = vmax.f32 %v2604_v33, %v2605_v36  ;;  %3900 = vmatmul.msk.bf16.gmra.mxu0 %vm358_vm1, %v6425_v57 }
 0x69a   :  { %v2607_v0 = vrot.slane %v2606_v10, 1 }
 0x69c   :  { %v6717_v24 = vmax.f32 %v2606_v10, %v2607_v0 }
 0x69e   :  { %v2646_v60 = vsub.f32 %v6465_v23, %v6717_v24  ;;  %v2648_v8 = vsub.f32 %v6470_v25, %v6717_v24  ;;  %v2650_v4 = vsub.f32 %v6478_v17, %v6717_v24  ;;  %v2652_v33 = vsub.f32 %v6488_v59, %v6717_v24 }
 0x69f   :  { %v2654_v18 = vsub.f32 %v6497_v49, %v6717_v24  ;;  %v2609_v23 = vmax.f32 %v6493_v58, %v6509_v61  ;;  %v2610_v25 = vmax.f32 %v6503_v1, %v6520_v11  ;;  %v2656_v17 = vsub.f32 %v6507_v6, %v6717_v24 }
 0x6a0   :  { %v2710_v21 = vmul.f32 1.442695, %v2646_v60  ;;  %v2714_v63 = vmul.f32 1.442695, %v2648_v8  ;;  %v2718_v43 = vmul.f32 1.442695, %v2650_v4  ;;  %v2658_v36 = vsub.f32 %v6511_v44, %v6717_v24  ;;  %v6746_v60 = vpop.f32.mrf.mxu1 }
 0x6a1   :  { %v2722_v59 = vmul.f32 1.442695, %v2652_v33  ;;  %v2612_v49 = vmax.f32 %v2610_v25, %v6537_v56  ;;  %v2726_v10 = vmul.f32 1.442695, %v2654_v18  ;;  %v2660_v6 = vsub.f32 %v6523_v45, %v6717_v24  ;;  %v6762_v25 = vpop.f32.mrf.mxu0 }
 0x6a2   :  { %4242 = vpow2.f32 %v2710_v21  ;;  %v2730_v4 = vmul.f32 1.442695, %v2656_v17  ;;  %v2662_v18 = vsub.f32 %v6531_v53, %v6717_v24  ;;  %8454 = vst [vmem:[#allocation34_spill] sm:$0xff] %v6762_v25 }
 0x6a3   :  { %4244 = vpow2.f32 %v2714_v63  ;;  %v2614_v8 = vmax.f32 %v2612_v49, %v6552_v29  ;;  %v2738_v49 = vmul.f32 1.442695, %v2660_v6 }
 0x6a4   :  { %4246 = vpow2.f32 %v2718_v43  ;;  %v2734_v43 = vmul.f32 1.442695, %v2658_v36 }
 0x6a5   :  { %4248 = vpow2.f32 %v2722_v59  ;;  %v2616_v44 = vmax.f32 %v2614_v8, %v6566_v46  ;;  %v2666_v8 = vsub.f32 %v6546_v62, %v6717_v24 }
 0x6a6   :  { %4250 = vpow2.f32 %v2726_v10 }
 0x6a7   :  { %v2618_v59 = vmax.f32 %v2616_v44, %v6583_v27  ;;  %4252 = vpow2.f32 %v2730_v4 }
 0x6a8   :  { %3931 = vmatmul.msk.bf16.gmra.mxu1 %vm358_vm1, %v6505_v14  ;;  %3901 = vmatmul.msk.bf16.gmra.mxu0 %vm358_vm1, %v6433_v13  ;;  %v2611_v14 = vmax.f32 %v2609_v23, %v6529_v7  ;;  %v6751_v33 = vpop.eup %4242  ;;  %4254 = vpow2.f32 %v2734_v43 }
 0x6a9   :  { %8452 = vst [vmem:[#allocation52_spill] sm:$0xff] %v6751_v33  ;;  %v6754_v63 = vpop.eup %4244  ;;  %4256 = vpow2.f32 %v2738_v49  ;;  %v8461_v49 = vld [vmem:[#allocation8_spill] sm:$0xff] }
 0x6aa   :  { %v2613_v0 = vmax.f32 %v2611_v14, %v6544_v39  ;;  %8453 = vst [vmem:[#allocation33_spill] sm:$0xff] %v6754_v63  ;;  %v2838_v45 = vadd.f32 %v6754_v63, %v6751_v33  ;;  %v6764_v17 = vpop.eup %4246  ;;  %v2664_v14 = vsub.f32 %v6539_v52, %v6717_v24  ;;  %v6778_v52 = vpop.f32.mrf.mxu1  ;;  %v8460_v63 = vld [vmem:[#allocation36_spill] sm:$0xff]  ;;  %v2672_v33 = vsub.f32 %v6571_v16, %v6717_v24 }
 0x6ab   :  { %8455 = vst [vmem:[#allocation17_spill] sm:$0xff] %v6764_v17  ;;  %v6771_v10 = vpop.eup %4248 }
 0x6ac   :  { %v2615_v21 = vmax.f32 %v2613_v0, %v6558_v20  ;;  %v2839_v36 = vadd.f32 %v6764_v17, %v2838_v45  ;;  %8456 = vst [vmem:[#allocation42_spill] sm:$0xff] %v6771_v10  ;;  %v2620_v0 = vmax.f32 %v2618_v59, %v6595_v55  ;;  %v6780_v6 = vpop.eup %4250  ;;  %v2746_v45 = vmul.f32 1.442695, %v2664_v14 }
 0x6ad   :  { %8457 = vst [vmem:[#allocation44_spill] sm:$0xff] %v6780_v6  ;;  %v6789_v43 = vpop.eup %4252 }
 0x6ae   :  { %v2617_v23 = vmax.f32 %v2615_v21, %v6574_v30  ;;  %v2742_v21 = vmul.f32 1.442695, %v2662_v18  ;;  %v2840_v25 = vadd.f32 %v6771_v10, %v2839_v36  ;;  %v2622_v4 = vmax.f32 %v2620_v0, %v6607_v35  ;;  %8458 = vst [vmem:[#allocation16_spill] sm:$0xff] %v6789_v43  ;;  %v8464_v10 = vld [vmem:[#allocation37_spill] sm:$0xff] }
 0x6af   :  { %v2750_v0 = vmul.f32 1.442695, %v2666_v8 }
 0x6b0   :  { %v2619_v53 = vmax.f32 %v2617_v23, %v6587_v15  ;;  %v2668_v23 = vsub.f32 %v6554_v48, %v6717_v24  ;;  %v2841_v18 = vadd.f32 %v6780_v6, %v2840_v25  ;;  %v2624_v59 = vmax.f32 %v2622_v4, %v6621_v54  ;;  %v8468_v6 = vld [vmem:[#allocation22_spill] sm:$0xff] }
 0x6b1   :  { %4258 = vpow2.f32 %v2742_v21  ;;  %v6805_v21 = vpop.f32.mrf.mxu0 }
 0x6b2   :  { %v2621_v44 = vmax.f32 %v2619_v53, %v6599_v51  ;;  %v8459_v53 = vld [vmem:[#allocation21_spill] sm:$0xff]  ;;  %v2842_v14 = vadd.f32 %v6789_v43, %v2841_v18  ;;  %4260 = vpow2.f32 %v2746_v45  ;;  %v2754_v4 = vmul.f32 1.442695, %v2668_v23  ;;  %8465 = vst [vmem:[#allocation43_spill] sm:$0xff] %v6805_v21  ;;  %v8467_v18 = vld [vmem:[#allocation47_spill] sm:$0xff]  ;;  %v6814_v23 = vpop.f32.mrf.mxu1 }
 0x6b3   :  { %v2670_v36 = vsub.f32 %v8459_v53, %v6717_v24  ;;  %v2674_v43 = vsub.f32 %v6577_v26, %v6717_v24  ;;  %4262 = vpow2.f32 %v2750_v0  ;;  %v2676_v21 = vsub.f32 %v6585_v38, %v6717_v24 }
 0x6b4   :  { %v2623_v62 = vmax.f32 %v2621_v44, %v6611_v40  ;;  %v8463_v44 = vld [vmem:[#allocation32_spill] sm:$0xff]  ;;  %4264 = vpow2.f32 %v2754_v4 }
 0x6b5   :  { %v2626_v25 = vmax.f32 %v2624_v59, %v8463_v44  ;;  %v2758_v59 = vmul.f32 1.442695, %v2670_v36  ;;  %v2770_v4 = vmul.f32 1.442695, %v2676_v21 }
 0x6b6   :  { %v2625_v48 = vmax.f32 %v2623_v62, %v8460_v63 }
 0x6b7   :  { %v2628_v17 = vmax.f32 %v2626_v25, %v8467_v18  ;;  %v2762_v25 = vmul.f32 1.442695, %v2672_v33  ;;  %4266 = vpow2.f32 %v2758_v59 }
 0x6b8   :  { %3932 = vmatmul.msk.bf16.gmra.mxu1 %vm358_vm1, %v6425_v57  ;;  %3902 = vmatmul.msk.bf16.gmra.mxu0 %vm358_vm1, %v8461_v49  ;;  %v6798_v57 = vpop.eup %4254  ;;  %v2627_v53 = vmax.f32 %v2625_v48, %v8464_v10  ;;  %v8470_v48 = vld [vmem:[#allocation46_spill] sm:$0xff] }
 0x6b9   :  { %8462 = vst [vmem:[#allocation51_spill] sm:$0xff] %v6798_v57  ;;  %v2843_v8 = vadd.f32 %v6798_v57, %v2842_v14  ;;  %v6807_v62 = vpop.eup %4256  ;;  %v2630_v14 = vmax.f32 %v2628_v17, %v8470_v48  ;;  %4268 = vpow2.f32 %v2762_v25  ;;  %v6845_v25 = vpop.f32.mrf.mxu0 }
 0x6ba   :  { %8466 = vst [vmem:[#allocation14_spill] sm:$0xff] %v6807_v62  ;;  %v2629_v44 = vmax.f32 %v2627_v53, %v8468_v6  ;;  %v6816_v45 = vpop.eup %4258  ;;  %v2678_v53 = vsub.f32 %v6589_v9, %v6717_v24  ;;  %v6847_v21 = vpop.f32.mrf.mxu1 }
 0x6bb   :  { %v2844_v16 = vadd.f32 %v6807_v62, %v2843_v8  ;;  %8469 = vst [vmem:[#allocation26_spill] sm:$0xff] %v6816_v45  ;;  %v6823_v36 = vpop.eup %4260  ;;  %v2632_v0 = vmax.f32 %v2630_v14, %v6707_v41  ;;  %v2766_v8 = vmul.f32 1.442695, %v2674_v43 }
 0x6bc   :  { %v2631_v57 = vmax.f32 %v2629_v44, %v6689_v47  ;;  %8471 = vst [vmem:[#allocation15_spill] sm:$0xff] %v6823_v36  ;;  %v6830_v38 = vpop.eup %4262  ;;  %v2680_v44 = vsub.f32 %v6597_v2, %v6717_v24  ;;  %v2774_v43 = vmul.f32 1.442695, %v2678_v53 }
 0x6bd   :  { %v2845_v26 = vadd.f32 %v6816_v45, %v2844_v16  ;;  %v2634_v33 = vmax.f32 %v2632_v0, %v6719_v22  ;;  %v2682_v16 = vsub.f32 %v6601_v32, %v6717_v24  ;;  %v6838_v59 = vpop.eup %4264  ;;  %4270 = vpow2.f32 %v2766_v8  ;;  %8472 = vst [vmem:[#allocation29_spill] sm:$0xff] %v6845_v25 }
 0x6be   :  { %v2633_v17 = vmax.f32 %v2631_v57, %v6713_v12  ;;  %v6849_v32 = vpop.eup %4266  ;;  %4272 = vpow2.f32 %v2770_v4 }
 0x6bf   :  { %v2846_v62 = vadd.f32 %v6823_v36, %v2845_v26  ;;  %v2636_v14 = vmax.f32 %v2634_v33, %v6778_v52  ;;  %v2684_v26 = vsub.f32 %v6609_v37, %v6717_v24  ;;  %v6856_v37 = vpop.eup %4268  ;;  %4274 = vpow2.f32 %v2774_v43 }
 0x6c0   :  { %v2635_v57 = vmax.f32 %v2633_v17, %v6746_v60  ;;  %v2686_v17 = vsub.f32 %v6613_v19, %v6717_v24  ;;  %v2782_v33 = vmul.f32 1.442695, %v2682_v16  ;;  %v2690_v19 = vsub.f32 %v6623_v34, %v6717_v24  ;;  %v8476_v34 = vld [vmem:[#allocation48_spill] sm:$0xff] }
 0x6c1   :  { %v2847_v9 = vadd.f32 %v6830_v38, %v2846_v62  ;;  %v2778_v62 = vmul.f32 1.442695, %v2680_v44  ;;  %v2638_v53 = vmax.f32 %v2636_v14, %v6847_v21  ;;  %v8473_v44 = vld [vmem:[#allocation11_spill] sm:$0xff]  ;;  %v2786_v14 = vmul.f32 1.442695, %v2684_v26 }
 0x6c2   :  { %v2637_v0 = vmax.f32 %v2635_v57, %v6814_v23  ;;  %v2790_v16 = vmul.f32 1.442695, %v2686_v17  ;;  %v2694_v17 = vsub.f32 %v8476_v34, %v6717_v24  ;;  %v2698_v34 = vsub.f32 %v6645_v5, %v6717_v24 }
 0x6c3   :  { %v2848_v2 = vadd.f32 %v6838_v59, %v2847_v9  ;;  %v6863_v57 = vpop.eup %4270  ;;  %4276 = vpow2.f32 %v2778_v62 }
 0x6c4   :  { %v2639_v9 = vmax.f32 %v2637_v0, %v2638_v53  ;;  %v6868_v36 = vpop.eup %4272  ;;  %4278 = vpow2.f32 %v2782_v33  ;;  %v2798_v33 = vmul.f32 1.442695, %v2690_v19  ;;  %v2806_v19 = vmul.f32 1.442695, %v2694_v17 }
 0x6c5   :  { %v2849_v8 = vadd.f32 %v6849_v32, %v2848_v2  ;;  %v6873_v53 = vpop.eup %4274  ;;  %4280 = vpow2.f32 %v2786_v14 }
 0x6c6   :  { %v2640_v2 = vrot.slane %v2639_v9, 4  ;;  %8474 = vst [vmem:[#allocation38_spill] sm:$0xff] %v6873_v53  ;;  %4282 = vpow2.f32 %v2790_v16  ;;  %v6894_v16 = vpop.f32.mrf.mxu1 }
 0x6c7   :  { %v2850_v4 = vadd.f32 %v6856_v37, %v2849_v8  ;;  %8478 = vst [vmem:[#allocation45_spill] sm:$0xff] %v6894_v16 }
 0x6c8   :  { %3933 = vmatmul.msk.bf16.gmra.mxu1 %vm358_vm1, %v6433_v13  ;;  %3903 = vmatmul.msk.bf16.gmra.mxu0 %vm358_vm1, %v8473_v44  ;;  %v2688_v13 = vsub.f32 %v6619_v28, %v6717_v24  ;;  %v2641_v43 = vmax.f32 %v2639_v9, %v2640_v2  ;;  %v2692_v28 = vsub.f32 %v6631_v3, %v6717_v24  ;;  %v8477_v3 = vld [vmem:[#allocation24_spill] sm:$0xff] }
 0x6c9   :  { %v2851_v25 = vadd.f32 %v6863_v57, %v2850_v4  ;;  %v6878_v4 = vpop.f32.mrf.mxu0  ;;  %v6880_v45 = vpop.eup %4276 }
 0x6ca   :  { %v2794_v26 = vmul.f32 1.442695, %v2688_v13  ;;  %v2642_v62 = vrot.slane %v2641_v43, 2  ;;  %8475 = vst [vmem:[#allocation50_spill] sm:$0xff] %v6878_v4  ;;  %v6885_v2 = vpop.eup %4278  ;;  %v2696_v13 = vsub.f32 %v8477_v3, %v6717_v24  ;;  %v2802_v14 = vmul.f32 1.442695, %v2692_v28 }
 0x6cb   :  { %v2852_v0 = vadd.f32 %v6868_v36, %v2851_v25 }
 0x6cc   :  { %v2643_v25 = vmax.f32 %v2641_v43, %v2642_v62  ;;  %4284 = vpow2.f32 %v2794_v26  ;;  %v2700_v26 = vsub.f32 %v6653_v42, %v6717_v24  ;;  %v2810_v28 = vmul.f32 1.442695, %v2696_v13 }
 0x6cd   :  { %v2853_v8 = vadd.f32 %v6873_v53, %v2852_v0  ;;  %v6890_v53 = vpop.eup %4280  ;;  %4286 = vpow2.f32 %v2798_v33  ;;  %v2814_v42 = vmul.f32 1.442695, %v2698_v34  ;;  %v2706_v34 = vsub.f32 %v6691_v31, %v6717_v24 }
 0x6ce   :  { %v2644_v4 = vrot.slane %v2643_v25, 1  ;;  %v6897_v62 = vpop.eup %4282  ;;  %4288 = vpow2.f32 %v2802_v14  ;;  %v8482_v14 = vld [vmem:[#allocation18_spill] sm:$0xff] }
 0x6cf   :  { %v2854_v9 = vadd.f32 %v6880_v45, %v2853_v8  ;;  %v8479_v8 = vld [vmem:[#allocation13_spill] sm:$0xff]  ;;  %4290 = vpow2.f32 %v2806_v19 }
 0x6d0   :  { %v6906_v17 = vmax.f32 %v2643_v25, %v2644_v4  ;;  %4292 = vpow2.f32 %v2810_v28 }
 0x6d1   :  { %v2855_v0 = vadd.f32 %v6885_v2, %v2854_v9  ;;  %v2702_v9 = vsub.f32 %v8479_v8, %v6717_v24  ;;  %v6908_v33 = vpop.f32.mrf.mxu0  ;;  %4294 = vpow2.f32 %v2814_v42 }
 0x6d2   :  { %8480 = vst [vmem:[#allocation10_spill] sm:$0xff] %v6908_v33  ;;  %v6910_v3 = vpop.eup %4284  ;;  %v2647_v8 = vsub.f32 %v6493_v58, %v6906_v17  ;;  %v6928_v33 = vpop.f32.mrf.mxu1  ;;  %v2651_v58 = vsub.f32 %v6509_v61, %v6906_v17  ;;  %v2655_v61 = vsub.f32 %v6529_v7, %v6906_v17  ;;  %v2659_v7 = vsub.f32 %v6544_v39, %v6906_v17 }
 0x6d3   :  { %v2856_v43 = vadd.f32 %v6890_v53, %v2855_v0  ;;  %v8481_v0 = vld [vmem:[#allocation31_spill] sm:$0xff]  ;;  %v2822_v4 = vmul.f32 1.442695, %v2702_v9  ;;  %8483 = vst [vmem:[#allocation23_spill] sm:$0xff] %v6928_v33  ;;  %v2830_v33 = vmul.f32 1.442695, %v2706_v34  ;;  %v2657_v34 = vsub.f32 %v6537_v56, %v6906_v17 }
 0x6d4   :  { %v2704_v16 = vsub.f32 %v8481_v0, %v6717_v24  ;;  %v2649_v0 = vsub.f32 %v6503_v1, %v6906_v17 }
 0x6d5   :  { %v2857_v5 = vadd.f32 %v6897_v62, %v2856_v43  ;;  %v2818_v43 = vmul.f32 1.442695, %v2700_v26  ;;  %v2708_v26 = vsub.f32 %v6705_v50, %v6717_v24  ;;  %v2653_v24 = vsub.f32 %v6520_v11, %v6906_v17 }
 0x6d6   :  { %v2716_v31 = vmul.f32 1.442695, %v2649_v0 }
 0x6d7   :  { %v2858_v13 = vadd.f32 %v6910_v3, %v2857_v5  ;;  %v2826_v5 = vmul.f32 1.442695, %v2704_v16  ;;  %4296 = vpow2.f32 %v2818_v43  ;;  %v2834_v50 = vmul.f32 1.442695, %v2708_v26 }
 0x6d8   :  { %3934 = vmatmul.msk.bf16.gmra.mxu1 %vm358_vm1, %v8461_v49  ;;  %3904 = vmatmul.msk.bf16.gmra.mxu0 %vm358_vm1, %v8482_v14  ;;  %v6917_v49 = vpop.eup %4286  ;;  %4298 = vpow2.f32 %v2822_v4  ;;  %v2720_v4 = vmul.f32 1.442695, %v2651_v58  ;;  %v2724_v11 = vmul.f32 1.442695, %v2653_v24  ;;  %v2728_v58 = vmul.f32 1.442695, %v2655_v61 }
 0x6d9   :  { %v2859_v25 = vadd.f32 %v6917_v49, %v2858_v13  ;;  %v6924_v19 = vpop.eup %4288  ;;  %v2712_v13 = vmul.f32 1.442695, %v2647_v8  ;;  %v6938_v42 = vpop.f32.mrf.mxu0  ;;  %4300 = vpow2.f32 %v2826_v5  ;;  %v2661_v24 = vsub.f32 %v6552_v29, %v6906_v17 }
 0x6da   :  { %v6933_v9 = vpop.eup %4290  ;;  %8484 = vst [vmem:[#allocation40_spill] sm:$0xff] %v6938_v42  ;;  %v6954_v5 = vpop.f32.mrf.mxu1 }
 0x6db   :  { %v2860_v28 = vadd.f32 %v6924_v19, %v2859_v25  ;;  %v6940_v16 = vpop.eup %4292  ;;  %4302 = vpow2.f32 %v2712_v13  ;;  %8485 = vst [vmem:[#allocation28_spill] sm:$0xff] %v6954_v5 }
 0x6dc   :  { %v6945_v25 = vpop.eup %4294  ;;  %4304 = vpow2.f32 %v2716_v31 }
 0x6dd   :  { %v2861_v1 = vadd.f32 %v6933_v9, %v2860_v28  ;;  %v6950_v0 = vpop.eup %4296  ;;  %4306 = vpow2.f32 %v2830_v33 }
 0x6de   :  { %v6956_v26 = vpop.eup %4298  ;;  %4308 = vpow2.f32 %v2834_v50  ;;  %v2732_v50 = vmul.f32 1.442695, %v2657_v34 }
 0x6df   :  { %v2862_v43 = vadd.f32 %v6940_v16, %v2861_v1  ;;  %v6959_v1 = vpop.eup %4300  ;;  %4310 = vpow2.f32 %v2720_v4  ;;  %v2736_v4 = vmul.f32 1.442695, %v2659_v7 }
 0x6e0   :  { %4312 = vpow2.f32 %v2724_v11  ;;  %v2665_v11 = vsub.f32 %v6566_v46, %v6906_v17 }
 0x6e1   :  { %v2863_v8 = vadd.f32 %v6945_v25, %v2862_v43  ;;  %v6965_v33 = vpop.eup %4302  ;;  %v6968_v13 = vpop.f32.mrf.mxu0  ;;  %v8489_v43 = vld [vmem:[#allocation19_spill] sm:$0xff]  ;;  %4314 = vpow2.f32 %v2728_v58 }
 0x6e2   :  { %8486 = vst [vmem:[#allocation39_spill] sm:$0xff] %v6965_v33  ;;  %v6970_v31 = vpop.eup %4304  ;;  %4316 = vpow2.f32 %v2732_v50  ;;  %v6990_v5 = vpop.f32.mrf.mxu1  ;;  %v2748_v50 = vmul.f32 1.442695, %v2665_v11 }
 0x6e3   :  { %v2864_v28 = vadd.f32 %v6950_v0, %v2863_v8  ;;  %8487 = vst [vmem:[#allocation21_spill] sm:$0xff] %v6968_v13  ;;  %v6977_v61 = vpop.eup %4306  ;;  %v2875_v29 = vadd.f32 %v6970_v31, %v6965_v33  ;;  %4318 = vpow2.f32 %v2736_v4 }
 0x6e4   :  { %8488 = vst [vmem:[#allocation36_spill] sm:$0xff] %v6970_v31  ;;  %v6981_v8 = vpop.eup %4308 }
 0x6e5   :  { %v2865_v56 = vadd.f32 %v6956_v26, %v2864_v28  ;;  %v6986_v34 = vpop.eup %4310  ;;  %8490 = vst [vmem:[#allocation8_spill] sm:$0xff] %v6990_v5 }
 0x6e6   :  { %v2876_v7 = vadd.f32 %v6986_v34, %v2875_v29  ;;  %v6994_v58 = vpop.eup %4312 }
 0x6e7   :  { %v2866_v39 = vadd.f32 %v6959_v1, %v2865_v56  ;;  %v2740_v56 = vmul.f32 1.442695, %v2661_v24  ;;  %8491 = vst [vmem:[#allocation37_spill] sm:$0xff] %v6994_v58  ;;  %v7001_v46 = vpop.eup %4314  ;;  %v2669_v24 = vsub.f32 %v6583_v27, %v6906_v17 }
 0x6e8   :  { %3935 = vmatmul.msk.bf16.gmra.mxu1 %vm358_vm1, %v8473_v44  ;;  %3905 = vmatmul.msk.bf16.gmra.mxu0 %vm358_vm1, %v8489_v43  ;;  %v2663_v44 = vsub.f32 %v6558_v20, %v6906_v17  ;;  %v2877_v42 = vadd.f32 %v6994_v58, %v2876_v7  ;;  %v7006_v29 = vpop.eup %4316 }
 0x6e9   :  { %v2867_v28 = vadd.f32 %v6977_v61, %v2866_v39  ;;  %v2667_v39 = vsub.f32 %v6574_v30, %v6906_v17  ;;  %v6999_v31 = vpop.f32.mrf.mxu0  ;;  %4320 = vpow2.f32 %v2740_v56  ;;  %v2671_v30 = vsub.f32 %v6587_v15, %v6906_v17  ;;  %v7011_v7 = vpop.eup %4318 }
 0x6ea   :  { %v2744_v13 = vmul.f32 1.442695, %v2663_v44  ;;  %8492 = vst [vmem:[#allocation47_spill] sm:$0xff] %v6999_v31  ;;  %v2673_v31 = vsub.f32 %v6595_v55, %v6906_v17  ;;  %v2756_v27 = vmul.f32 1.442695, %v2669_v24  ;;  %v7015_v11 = vpop.f32.mrf.mxu1  ;;  %v2675_v15 = vsub.f32 %v6599_v51, %v6906_v17  ;;  %v8495_v51 = vld [vmem:[#allocation35_spill] sm:$0xff] }
 0x6eb   :  { %v2868_v20 = vadd.f32 %v6981_v8, %v2867_v28  ;;  %v2878_v28 = vadd.f32 %v7001_v46, %v2877_v42  ;;  %v2752_v44 = vmul.f32 1.442695, %v2667_v39  ;;  %8493 = vst [vmem:[#allocation22_spill] sm:$0xff] %v7015_v11 }
 0x6ec   :  { %4322 = vpow2.f32 %v2744_v13  ;;  %v2760_v13 = vmul.f32 1.442695, %v2671_v30 }
 0x6ed   :  { %v2879_v4 = vadd.f32 %v7006_v29, %v2878_v28  ;;  %v2869_v5 = vrot.slane %v2868_v20, 4  ;;  %4324 = vpow2.f32 %v2748_v50  ;;  %v2677_v50 = vsub.f32 %v6607_v35, %v6906_v17 }
 0x6ee   :  { %4326 = vpow2.f32 %v2752_v44  ;;  %v2768_v44 = vmul.f32 1.442695, %v2675_v15  ;;  %v2681_v35 = vsub.f32 %v6621_v54, %v6906_v17 }
 0x6ef   :  { %v2880_v42 = vadd.f32 %v7011_v7, %v2879_v4  ;;  %v7018_v56 = vpop.eup %4320  ;;  %v2870_v24 = vadd.f32 %v2869_v5, %v2868_v20  ;;  %4328 = vpow2.f32 %v2756_v27  ;;  %v2764_v4 = vmul.f32 1.442695, %v2673_v31 }
 0x6f0   :  { %4330 = vpow2.f32 %v2760_v13  ;;  %v2772_v31 = vmul.f32 1.442695, %v2677_v50  ;;  %v8497_v50 = vld [vmem:[#allocation32_spill] sm:$0xff] }
 0x6f1   :  { %v2881_v39 = vadd.f32 %v7018_v56, %v2880_v42  ;;  %v7025_v28 = vpop.f32.mrf.mxu0  ;;  %v2871_v20 = vrot.slane %v2870_v24, 2  ;;  %4332 = vpow2.f32 %v2764_v4  ;;  %v2685_v4 = vsub.f32 %v8497_v50, %v6906_v17 }
 0x6f2   :  { %8494 = vst [vmem:[#allocation46_spill] sm:$0xff] %v7025_v28  ;;  %v7027_v55 = vpop.eup %4322  ;;  %v7043_v27 = vpop.f32.mrf.mxu1  ;;  %4334 = vpow2.f32 %v2768_v44  ;;  %v2689_v44 = vsub.f32 %v8467_v18, %v6906_v17 }
 0x6f3   :  { %v2882_v11 = vadd.f32 %v7027_v55, %v2881_v39  ;;  %v7034_v30 = vpop.eup %4324  ;;  %8496 = vst [vmem:[#allocation11_spill] sm:$0xff] %v7043_v27  ;;  %v2872_v54 = vadd.f32 %v2871_v20, %v2870_v24  ;;  %4336 = vpow2.f32 %v2772_v31  ;;  %v2780_v27 = vmul.f32 1.442695, %v2681_v35 }
 0x6f4   :  { %v7039_v5 = vpop.eup %4326  ;;  %v2788_v31 = vmul.f32 1.442695, %v2685_v4  ;;  %v2796_v18 = vmul.f32 1.442695, %v2689_v44 }
 0x6f5   :  { %v2883_v42 = vadd.f32 %v7034_v30, %v2882_v11  ;;  %v7046_v28 = vpop.eup %4328  ;;  %v2873_v20 = vrot.slane %v2872_v54, 1 }
 0x6f6   :  { %v7053_v33 = vpop.eup %4330 }
 0x6f7   :  { %v2884_v39 = vadd.f32 %v7039_v5, %v2883_v42  ;;  %v7058_v58 = vpop.eup %4332  ;;  %v2874_v4 = vadd.f32 %v2873_v20, %v2872_v54 }
 0x6f8   :  { %3936 = vmatmul.msk.bf16.gmra.mxu1 %vm358_vm1, %v8482_v14  ;;  %3906 = vmatmul.msk.bf16.gmra.mxu0 %vm358_vm1, %v8495_v51  ;;  %v2679_v14 = vsub.f32 %v6611_v40, %v6906_v17  ;;  %v2683_v40 = vsub.f32 %v8460_v63, %v6906_v17  ;;  %v2687_v63 = vsub.f32 %v8464_v10, %v6906_v17  ;;  %v7065_v24 = vpop.eup %4334 }
 0x6f9   :  { %v2885_v11 = vadd.f32 %v7046_v28, %v2884_v39  ;;  %v7051_v13 = vpop.f32.mrf.mxu0  ;;  %v7070_v50 = vpop.eup %4336  ;;  %v2691_v10 = vsub.f32 %v8468_v6, %v6906_v17  ;;  %v8499_v6 = vld [vmem:[#allocation27_spill] sm:$0xff] }
 0x6fa   :  { %v2776_v15 = vmul.f32 1.442695, %v2679_v14  ;;  %v2784_v14 = vmul.f32 1.442695, %v2683_v40  ;;  %v7067_v35 = vpop.f32.mrf.mxu1  ;;  %v2792_v40 = vmul.f32 1.442695, %v2687_v63 }
 0x6fb   :  { %v2886_v42 = vadd.f32 %v7053_v33, %v2885_v11  ;;  %8498 = vst [vmem:[#allocation48_spill] sm:$0xff] %v7067_v35 }
 0x6fc   :  { %4338 = vpow2.f32 %v2776_v15 }
 0x6fd   :  { %v2887_v39 = vadd.f32 %v7058_v58, %v2886_v42  ;;  %4340 = vpow2.f32 %v2780_v27 }
 0x6fe   :  { %4342 = vpow2.f32 %v2784_v14  ;;  %v2800_v14 = vmul.f32 1.442695, %v2691_v10 }
 0x6ff   :  { %v2888_v11 = vadd.f32 %v7065_v24, %v2887_v39  ;;  %v2693_v39 = vsub.f32 %v8470_v48, %v6906_v17  ;;  %4344 = vpow2.f32 %v2788_v31  ;;  %v2697_v48 = vsub.f32 %v6707_v41, %v6906_v17 }
 0x700   :  { %4346 = vpow2.f32 %v2792_v40  ;;  %v2701_v41 = vsub.f32 %v6719_v22, %v6906_v17 }
 0x701   :  { %v2889_v15 = vadd.f32 %v7070_v50, %v2888_v11  ;;  %v7077_v42 = vpop.f32.mrf.mxu0  ;;  %4348 = vpow2.f32 %v2796_v18  ;;  %v2804_v20 = vmul.f32 1.442695, %v2693_v39  ;;  %v2699_v11 = vsub.f32 %v6713_v12, %v6906_v17 }
 0x702   :  { %v7079_v27 = vpop.eup %4338  ;;  %4350 = vrcp.f32 %v2874_v4  ;;  %v7095_v31 = vpop.f32.mrf.mxu1  ;;  %v2703_v4 = vsub.f32 %v6746_v60, %v6906_v17  ;;  %v2812_v12 = vmul.f32 1.442695, %v2697_v48  ;;  %v2709_v60 = vsub.f32 %v6847_v21, %v6906_v17 }
 0x703   :  { %v2890_v35 = vadd.f32 %v7079_v27, %v2889_v15  ;;  %v7086_v63 = vpop.eup %4340  ;;  %8500 = vst [vmem:[#allocation24_spill] sm:$0xff] %v7095_v31  ;;  %4352 = vpow2.f32 %v2800_v14  ;;  %v2707_v31 = vsub.f32 %v6814_v23, %v6906_v17  ;;  %v2820_v48 = vmul.f32 1.442695, %v2701_v41 }
 0x704   :  { %v7091_v54 = vpop.eup %4342  ;;  %4354 = vpow2.f32 %v2804_v20  ;;  %v2824_v20 = vmul.f32 1.442695, %v2703_v4 }
 0x705   :  { %v2891_v44 = vadd.f32 %v7086_v63, %v2890_v35 }
 0x707   :  { %v2892_v15 = vadd.f32 %v7091_v54, %v2891_v44  ;;  %v2816_v44 = vmul.f32 1.442695, %v2699_v11 }
 0x708   :  { %3937 = vmatmul.msk.bf16.gmra.mxu1 %vm358_vm1, %v8489_v43  ;;  %3907 = vmatmul.msk.bf16.gmra.mxu0 %vm358_vm1, %v8499_v6  ;;  %v2695_v43 = vsub.f32 %v6689_v47, %v6906_v17  ;;  %v7100_v47 = vpop.eup %4344 }
 0x709   :  { %v2893_v35 = vadd.f32 %v7100_v47, %v2892_v15  ;;  %v7103_v40 = vpop.f32.mrf.mxu0  ;;  %v7105_v18 = vpop.eup %4346  ;;  %v2705_v15 = vsub.f32 %v6778_v52, %v6906_v17 }
 0x70a   :  { %v2808_v10 = vmul.f32 1.442695, %v2695_v43  ;;  %8501 = vst [vmem:[#allocation13_spill] sm:$0xff] %v7103_v40  ;;  %v7111_v39 = vpop.eup %4348  ;;  %v7125_v11 = vpop.f32.mrf.mxu1 }
 0x70b   :  { %v2894_v14 = vadd.f32 %v7105_v18, %v2893_v35  ;;  %v7114_v43 = vpop.eup %4350 }
 0x70c   :  { %4356 = vpow2.f32 %v2808_v10  ;;  %v7121_v40 = vpop.eup %4352  ;;  %v2942_v52 = vmul.f32 %v7114_v43, %v6863_v57  ;;  %v2944_v23 = vmul.f32 %v7114_v43, %v6868_v36  ;;  %v2976_v21 = vmul.f32 %v7114_v43, %v6981_v8 }
 0x70d   :  { %v2895_v22 = vadd.f32 %v7111_v39, %v2894_v14  ;;  %4358 = vpow2.f32 %v2812_v12  ;;  %v7132_v35 = vpop.eup %4354  ;;  %v2974_v14 = vmul.f32 %v7114_v43, %v6977_v61  ;;  %v2938_v17 = vmul.f32 %v7114_v43, %v6849_v32 }
 0x70e   :  { %4360 = vpow2.f32 %v2816_v44  ;;  %v2940_v41 = vmul.f32 %v7114_v43, %v6856_v37  ;;  %v2992_v4 = vpack.c.bf16 %v2944_v23, %v2942_v52  ;;  %v2970_v61 = vmul.f32 %v7114_v43, %v6956_v26 }
 0x70f   :  { %v2896_v10 = vadd.f32 %v7121_v40, %v2895_v22  ;;  %v2972_v8 = vmul.f32 %v7114_v43, %v6959_v1  ;;  %4362 = vpow2.f32 %v2820_v48  ;;  %v2828_v32 = vmul.f32 1.442695, %v2705_v15 }
 0x710   :  { %v3008_v44 = vpack.c.bf16 %v2976_v21, %v2974_v14  ;;  %v2990_v37 = vpack.c.bf16 %v2940_v41, %v2938_v17  ;;  %3448 = vmatpush.bf16.msra.mxu2 %v2992_v4  ;;  %4364 = vpow2.f32 %v2824_v20  ;;  %v2832_v26 = vmul.f32 1.442695, %v2707_v31  ;;  %v8503_v4 = vld [vmem:[#allocation15_spill] sm:$0xff] }
 0x711   :  { %v2897_v57 = vadd.f32 %v7132_v35, %v2896_v10  ;;  %v7145_v36 = vpop.f32.mrf.mxu0  ;;  %v2966_v10 = vmul.f32 %v7114_v43, %v6945_v25  ;;  %v2968_v1 = vmul.f32 %v7114_v43, %v6950_v0  ;;  %v2934_v48 = vmul.f32 %v7114_v43, %v6830_v38  ;;  %v8502_v0 = vld [vmem:[#allocation26_spill] sm:$0xff] }
 0x712   :  { %v7151_v12 = vpop.eup %4356  ;;  %3461 = vmatpush.bf16.msra.mxu3 %v3008_v44  ;;  %v2936_v14 = vmul.f32 %v7114_v43, %v6838_v59  ;;  %4366 = vpow2.f32 %v2828_v32  ;;  %v2836_v25 = vmul.f32 1.442695, %v2709_v60  ;;  %v7167_v21 = vpop.f32.mrf.mxu1  ;;  %v2930_v41 = vmul.f32 %v7114_v43, %v8502_v0 }
 0x713   :  { %v2898_v22 = vadd.f32 %v7151_v12, %v2897_v57  ;;  %v7156_v52 = vpop.eup %4358  ;;  %v3004_v20 = vpack.c.bf16 %v2968_v1, %v2966_v10  ;;  %4368 = vpow2.f32 %v2832_v26  ;;  %v2954_v38 = vmul.f32 %v7114_v43, %v6897_v62 }
 0x714   :  { %v7160_v23 = vpop.eup %4360  ;;  %3449 = vmatpush.bf16.msra.mxu2 %v2990_v37  ;;  %v2988_v60 = vpack.c.bf16 %v2936_v14, %v2934_v48  ;;  %4370 = vpow2.f32 %v2836_v25  ;;  %v2962_v44 = vmul.f32 %v7114_v43, %v6933_v9  ;;  %v2964_v62 = vmul.f32 %v7114_v43, %v6940_v16 }
 0x715   :  { %v2899_v15 = vadd.f32 %v7156_v52, %v2898_v22  ;;  %v7170_v17 = vpop.eup %4362  ;;  %v2958_v25 = vmul.f32 %v7114_v43, %v6917_v49 }
 0x716   :  { %v7183_v32 = vpop.eup %4364  ;;  %v3002_v16 = vpack.c.bf16 %v2964_v62, %v2962_v44 }
 0x717   :  { %v2900_v31 = vadd.f32 %v7160_v23, %v2899_v15  ;;  %v8505_v15 = vld [vmem:[#allocation14_spill] sm:$0xff] }
 0x718   :  { %3938 = vmatmul.msk.bf16.gmra.mxu1 %vm358_vm1, %v8495_v51  ;;  %v3006_v51 = vpack.c.bf16 %v2972_v8, %v2970_v61  ;;  %v2932_v61 = vmul.f32 %v7114_v43, %v8503_v4  ;;  %v2956_v8 = vmul.f32 %v7114_v43, %v6910_v3  ;;  %3450 = vmatpush.bf16.msra.mxu2 %v2988_v60  ;;  %v8504_v3 = vld [vmem:[#allocation51_spill] sm:$0xff]  ;;  %v8506_v60 = vld [vmem:[#allocation44_spill] sm:$0xff] }
 0x719   :  { %v2901_v59 = vadd.f32 %v7170_v17, %v2900_v31  ;;  %v7177_v57 = vpop.f32.mrf.mxu0  ;;  %v2926_v1 = vmul.f32 %v7114_v43, %v8504_v3  ;;  %v2928_v48 = vmul.f32 %v7114_v43, %v8505_v15  ;;  %v2960_v31 = vmul.f32 %v7114_v43, %v6924_v19 }
 0x71a   :  { %3462 = vmatpush.bf16.msra.mxu3 %v3006_v51  ;;  %v2998_v22 = vpack.c.bf16 %v2956_v8, %v2954_v38  ;;  %v7190_v51 = vpop.eup %4366  ;;  %v2986_v26 = vpack.c.bf16 %v2932_v61, %v2930_v41  ;;  %v7197_v14 = vpop.f32.mrf.mxu1  ;;  %v2922_v4 = vmul.f32 %v7114_v43, %v8506_v60  ;;  %v8507_v61 = vld [vmem:[#allocation16_spill] sm:$0xff]  ;;  %v2952_v15 = vmul.f32 %v7114_v43, %v6890_v53 }
 0x71b   :  { %v2902_v37 = vadd.f32 %v7183_v32, %v2901_v59  ;;  %v4369_v9 = vpop.eup %4368  ;;  %v2984_v59 = vpack.c.bf16 %v2928_v48, %v2926_v1  ;;  %v2924_v49 = vmul.f32 %v7114_v43, %v8507_v61  ;;  %v3000_v8 = vpack.c.bf16 %v2960_v31, %v2958_v25  ;;  %v8512_v61 = vld [vmem:[#allocation38_spill] sm:$0xff] }
 0x71c   :  { %3451 = vmatpush.bf16.msra.mxu2 %v2986_v26  ;;  %v4371_v0 = vpop.eup %4370  ;;  %v2950_v1 = vmul.f32 %v7114_v43, %v6885_v2  ;;  %v2946_v2 = vmul.f32 %v7114_v43, %v8512_v61  ;;  %v2948_v53 = vmul.f32 %v7114_v43, %v6880_v45 }
 0x71d   :  { %v2903_v10 = vadd.f32 %v7190_v51, %v2902_v37  ;;  %v2982_v62 = vpack.c.bf16 %v2924_v49, %v2922_v4  ;;  %v8508_v37 = vld [vmem:[#allocation17_spill] sm:$0xff] }
 0x71e   :  { %3463 = vmatpush.bf16.msra.mxu3 %v3004_v20  ;;  %v2996_v4 = vpack.c.bf16 %v2952_v15, %v2950_v1 }
 0x71f   :  { %v2904_v20 = vadd.f32 %v4369_v9, %v2903_v10  ;;  %v2918_v10 = vmul.f32 %v7114_v43, %v8508_v37 }
 0x720   :  { %3452 = vmatpush.bf16.msra.mxu2 %v2984_v59  ;;  %v8511_v59 = vld [vmem:[#allocation33_spill] sm:$0xff] }
 0x721   :  { %v2905_v41 = vadd.f32 %v4371_v0, %v2904_v20  ;;  %v7205_v38 = vpop.f32.mrf.mxu0  ;;  %v8510_v20 = vld [vmem:[#allocation52_spill] sm:$0xff]  ;;  %v2916_v60 = vmul.f32 %v7114_v43, %v8511_v59 }
 0x722   :  { %3464 = vmatpush.bf16.msra.mxu3 %v3002_v16  ;;  %v7215_v3 = vpop.f32.mrf.mxu1 }
 0x723   :  { %v2906_v44 = vrot.slane %v2905_v41, 4 }
 0x724   :  { %3453 = vmatpush.bf16.msra.mxu2 %v2982_v62 }
 0x725   :  { %v2907_v19 = vadd.f32 %v2906_v44, %v2905_v41  ;;  %v2914_v41 = vmul.f32 %v7114_v43, %v8510_v20 }
 0x726   :  { %3465 = vmatpush.bf16.msra.mxu3 %v3000_v8  ;;  %v8514_v8 = vld [vmem:[#allocation49_spill] sm:$0xff] }
 0x727   :  { %v2908_v48 = vrot.slane %v2907_v19, 2 }
 0x728   :  { %3939 = vmatmul.msk.bf16.gmra.mxu1 %vm358_vm1, %v8499_v6  ;;  %v8509_v6 = vld [vmem:[#allocation42_spill] sm:$0xff] }
 0x729   :  { %v2920_v26 = vmul.f32 %v7114_v43, %v8509_v6  ;;  %v2909_v16 = vadd.f32 %v2908_v48, %v2907_v19  ;;  %v7221_v25 = vpop.f32.mrf.mxu0  ;;  %v8515_v19 = vld [vmem:[#allocation9_spill] sm:$0xff] }
 0x72a   :  { %3466 = vmatpush.bf16.msra.mxu3 %v2998_v22  ;;  %v8513_v22 = vld [vmem:[#allocation41_spill] sm:$0xff]  ;;  %v7235_v6 = vpop.f32.mrf.mxu1 }
 0x72b   :  { %v2980_v31 = vpack.c.bf16 %v2920_v26, %v2918_v10  ;;  %v2910_v49 = vrot.slane %v2909_v16, 1  ;;  %v1998_v44 = vadd.f32 %v8514_v8, %v8513_v22  ;;  %v2057_v62 = vadd.f32 %v8515_v19, %v8513_v22 }
 0x72c   :  { %v2978_v10 = vpack.c.bf16 %v2916_v60, %v2914_v41  ;;  %v2994_v26 = vpack.c.bf16 %v2948_v53, %v2946_v2 }
 0x72d   :  { %3454 = vmatpush.bf16.msra.mxu2 %v2980_v31  ;;  %v2911_v37 = vadd.f32 %v2910_v49, %v2909_v16  ;;  %v7237_v1 = vpack.c.bf16 %v1998_v44, %v1998_v44  ;;  %v7239_v45 = vpack.c.bf16 %v2057_v62, %v2057_v62 }
 0x72e   :  { %3467 = vmatpush.bf16.msra.mxu3 %v2996_v4 }
 0x72f   :  { %4372 = vrcp.f32 %v2911_v37 }
 0x731   :  { %3455 = vmatpush.bf16.msra.mxu2 %v2978_v10  ;;  %v7241_v43 = vpop.f32.mrf.mxu0 }
 0x732   :  { %3468 = vmatpush.bf16.msra.mxu3 %v2994_v26  ;;  %v7247_v48 = vpop.f32.mrf.mxu1 }
 0x734   :  { %3456 = vmatmul.bf16.vlgmr.msra.gmra.mxu2 %v7237_v1 }
 0x735   :  { %3469 = vmatmul.bf16.vlgmr.msra.gmra.mxu3 %v7239_v45  ;;  %v7245_v15 = vpop.eup %4372 }
 0x736   :  { %v2943_v16 = vmul.f32 %v7245_v15, %v7065_v24  ;;  %v2945_v31 = vmul.f32 %v7245_v15, %v7070_v50  ;;  %v2975_v20 = vmul.f32 %v7245_v15, %v4369_v9  ;;  %v2977_v41 = vmul.f32 %v7245_v15, %v4371_v0 }
 0x737   :  { %v2939_v59 = vmul.f32 %v7245_v15, %v7053_v33  ;;  %v2941_v60 = vmul.f32 %v7245_v15, %v7058_v58  ;;  %v2971_v4 = vmul.f32 %v7245_v15, %v7183_v32  ;;  %v2973_v24 = vmul.f32 %v7245_v15, %v7190_v51 }
 0x738   :  { %v2993_v61 = vpack.c.bf16 %v2945_v31, %v2943_v16  ;;  %v3009_v2 = vpack.c.bf16 %v2977_v41, %v2975_v20  ;;  %v2935_v50 = vmul.f32 %v7245_v15, %v7039_v5  ;;  %v2937_v33 = vmul.f32 %v7245_v15, %v7046_v28  ;;  %v8516_v41 = vld [vmem:[#allocation37_spill] sm:$0xff] }
 0x739   :  { %v7265_v9 = vpop.f32.mrf.mxu0  ;;  %v2991_v0 = vpack.c.bf16 %v2941_v60, %v2939_v59  ;;  %v3007_v58 = vpack.c.bf16 %v2973_v24, %v2971_v4  ;;  %v2967_v32 = vmul.f32 %v7245_v15, %v7160_v23  ;;  %v2969_v49 = vmul.f32 %v7245_v15, %v7170_v17 }
 0x73a   :  { %3474 = vmatpush.bf16.msrb.mxu2 %v2993_v61  ;;  %3487 = vmatpush.bf16.msrb.mxu3 %v3009_v2  ;;  %v2989_v53 = vpack.c.bf16 %v2937_v33, %v2935_v50  ;;  %v7273_v51 = vpop.f32.mrf.mxu1  ;;  %v2955_v5 = vmul.f32 %v7245_v15, %v7105_v18  ;;  %v2931_v28 = vmul.f32 %v7245_v15, %v7027_v55 }
 0x73b   :  { %v3005_v22 = vpack.c.bf16 %v2969_v49, %v2967_v32  ;;  %v2933_v8 = vmul.f32 %v7245_v15, %v7034_v30  ;;  %v2957_v23 = vmul.f32 %v7245_v15, %v7111_v39  ;;  %v2963_v17 = vmul.f32 %v7245_v15, %v7151_v12 }
 0x73c   :  { %v2965_v44 = vmul.f32 %v7245_v15, %v7156_v52  ;;  %v2951_v19 = vmul.f32 %v7245_v15, %v7091_v54  ;;  %v2953_v18 = vmul.f32 %v7245_v15, %v7100_v47  ;;  %v2947_v30 = vmul.f32 %v7245_v15, %v7079_v27 }
 0x73d   :  { %v2999_v55 = vpack.c.bf16 %v2957_v23, %v2955_v5  ;;  %v2927_v12 = vmul.f32 %v7245_v15, %v7011_v7  ;;  %v2929_v52 = vmul.f32 %v7245_v15, %v7018_v56  ;;  %v2949_v54 = vmul.f32 %v7245_v15, %v7086_v63  ;;  %v8525_v23 = vld [vmem:[#allocation29_spill] sm:$0xff] }
 0x73e   :  { %3475 = vmatpush.bf16.msrb.mxu2 %v2991_v0  ;;  %3488 = vmatpush.bf16.msrb.mxu3 %v3007_v58  ;;  %v2997_v39 = vpack.c.bf16 %v2953_v18, %v2951_v19  ;;  %v2987_v37 = vpack.c.bf16 %v2933_v8, %v2931_v28  ;;  %v3003_v47 = vpack.c.bf16 %v2965_v44, %v2963_v17  ;;  %v8526_v17 = vld [vmem:[#allocation34_spill] sm:$0xff]  ;;  %v8528_v18 = vld [vmem:[#allocation43_spill] sm:$0xff] }
 0x73f   :  { %v2959_v10 = vmul.f32 %v7245_v15, %v7121_v40  ;;  %v2961_v27 = vmul.f32 %v7245_v15, %v7132_v35  ;;  %v2995_v26 = vpack.c.bf16 %v2949_v54, %v2947_v30  ;;  %v2985_v7 = vpack.c.bf16 %v2929_v52, %v2927_v12  ;;  %v8527_v19 = vld [vmem:[#allocation50_spill] sm:$0xff]  ;;  %v8530_v52 = vld [vmem:[#allocation40_spill] sm:$0xff] }
 0x740   :  { %v2923_v56 = vmul.f32 %v7245_v15, %v7001_v46  ;;  %v2925_v63 = vmul.f32 %v7245_v15, %v7006_v29  ;;  %v2919_v35 = vmul.f32 %v7245_v15, %v6986_v34  ;;  %v2921_v59 = vmul.f32 %v7245_v15, %v8516_v41  ;;  %v8517_v46 = vld [vmem:[#allocation39_spill] sm:$0xff]  ;;  %v8518_v29 = vld [vmem:[#allocation36_spill] sm:$0xff] }
 0x741   :  { %v7291_v62 = vpop.f32.mrf.mxu0  ;;  %v3001_v31 = vpack.c.bf16 %v2961_v27, %v2959_v10  ;;  %v2915_v61 = vmul.f32 %v7245_v15, %v8517_v46  ;;  %v2917_v2 = vmul.f32 %v7245_v15, %v8518_v29  ;;  %v3010_v44 = vmax.f32 %v8526_v17, %v8525_v23  ;;  %v8533_v27 = vld [vmem:[#allocation47_spill] sm:$0xff] }
 0x742   :  { %3476 = vmatpush.bf16.msrb.mxu2 %v2989_v53  ;;  %3489 = vmatpush.bf16.msrb.mxu3 %v3005_v22  ;;  %v7305_v16 = vpop.f32.mrf.mxu1  ;;  %v2983_v40 = vpack.c.bf16 %v2925_v63, %v2923_v56  ;;  %v2981_v4 = vpack.c.bf16 %v2921_v59, %v2919_v35 }
 0x743   :  { %v2979_v50 = vpack.c.bf16 %v2917_v2, %v2915_v61 }
 0x746   :  { %3477 = vmatpush.bf16.msrb.mxu2 %v2987_v37  ;;  %3490 = vmatpush.bf16.msrb.mxu3 %v3003_v47  ;;  %v8532_v47 = vld [vmem:[#allocation21_spill] sm:$0xff] }
 0x749   :  { %v7311_v20 = vpop.f32.mrf.mxu0 }
 0x74a   :  { %3478 = vmatpush.bf16.msrb.mxu2 %v2985_v7  ;;  %3491 = vmatpush.bf16.msrb.mxu3 %v3001_v31  ;;  %v7317_v60 = vpop.f32.mrf.mxu1  ;;  %v8534_v7 = vld [vmem:[#allocation46_spill] sm:$0xff] }
 0x74e   :  { %3479 = vmatpush.bf16.msrb.mxu2 %v2983_v40  ;;  %3492 = vmatpush.bf16.msrb.mxu3 %v2999_v55  ;;  %v3011_v55 = vmax.f32 %v8528_v18, %v8527_v19  ;;  %v8535_v40 = vld [vmem:[#allocation13_spill] sm:$0xff] }
 0x750   :  { %v3013_v54 = vmax.f32 %v3011_v55, %v8530_v52 }
 0x751   :  { %v7323_v24 = vpop.f32.mrf.mxu0 }
 0x752   :  { %3480 = vmatpush.bf16.msrb.mxu2 %v2981_v4  ;;  %3493 = vmatpush.bf16.msrb.mxu3 %v2997_v39  ;;  %v7325_v34 = vpop.f32.mrf.mxu1  ;;  %v8529_v39 = vld [vmem:[#allocation10_spill] sm:$0xff] }
 0x753   :  { %v3012_v12 = vmax.f32 %v3010_v44, %v8529_v39 }
 0x755   :  { %v3014_v10 = vmax.f32 %v3012_v12, %v8532_v47 }
 0x756   :  { %3481 = vmatpush.bf16.msrb.mxu2 %v2979_v50  ;;  %3494 = vmatpush.bf16.msrb.mxu3 %v2995_v26  ;;  %v3015_v26 = vmax.f32 %v3013_v54, %v8533_v27 }
 0x757   :  { %v3016_v31 = vmax.f32 %v3014_v10, %v8534_v7 }
 0x758   :  { %v3017_v56 = vmax.f32 %v3015_v26, %v7051_v13 }
 0x759   :  { %3482 = vmatmul.bf16.vlgmr.msrb.gmra.mxu2 %v7237_v1  ;;  %3495 = vmatmul.bf16.vlgmr.msrb.gmra.mxu3 %v7239_v45  ;;  %v7329_v0 = vpop.f32.mrf.mxu0  ;;  %v3018_v63 = vmax.f32 %v3016_v31, %v7077_v42 }
 0x75a   :  { %v7331_v33 = vpop.f32.mrf.mxu1  ;;  %v3019_v35 = vmax.f32 %v3017_v56, %v8535_v40 }
 0x75b   :  { %v3020_v59 = vmax.f32 %v3018_v63, %v7145_v36 }
 0x75c   :  { %v3021_v4 = vmax.f32 %v3019_v35, %v7177_v57 }
 0x75d   :  { %v3022_v61 = vmax.f32 %v3020_v59, %v7205_v38 }
 0x75e   :  { %v3023_v29 = vmax.f32 %v3021_v4, %v7221_v25 }
 0x75f   :  { %v3024_v2 = vmax.f32 %v3022_v61, %v7241_v43 }
 0x760   :  { %v3025_v50 = vmax.f32 %v3023_v29, %v7265_v9 }
 0x761   :  { %v7333_v58 = vpop.f32.mrf.mxu0  ;;  %v3026_v44 = vmax.f32 %v3024_v2, %v7291_v62 }
 0x762   :  { %8519 = vst [vmem:[#allocation31_spill] sm:$0xff] %v7333_v58  ;;  %v7335_v15 = vpop.f32.mrf.mxu1  ;;  %v3027_v55 = vmax.f32 %v3025_v50, %v7311_v20 }
 0x763   :  { %v3028_v54 = vmax.f32 %v3026_v44, %v7323_v24 }
 0x764   :  { %v3029_v10 = vmax.f32 %v3027_v55, %v7329_v0 }
 0x765   :  { %v3030_v31 = vmax.f32 %v3028_v54, %v7333_v58  ;;  %v8545_v58 = vld [vmem:[#allocation48_spill] sm:$0xff] }
 0x769   :  { %v7337_v53 = vpop.f32.mrf.mxu0 }
 0x76a   :  { %8520 = vst [vmem:[#allocation18_spill] sm:$0xff] %v7337_v53  ;;  %v7339_v32 = vpop.f32.mrf.mxu1  ;;  %v3031_v56 = vmax.f32 %v3029_v10, %v7337_v53 }
 0x771   :  { %v7341_v49 = vpop.f32.mrf.mxu0 }
 0x772   :  { %8521 = vst [vmem:[#allocation19_spill] sm:$0xff] %v7341_v49  ;;  %v7343_v5 = vpop.f32.mrf.mxu1  ;;  %v3032_v63 = vmax.f32 %v3030_v31, %v7341_v49  ;;  %v8539_v31 = vld [vmem:[#allocation28_spill] sm:$0xff] }
 0x779   :  { %v7345_v22 = vpop.f32.mrf.mxu0 }
 0x77a   :  { %8522 = vst [vmem:[#allocation35_spill] sm:$0xff] %v7345_v22  ;;  %v7347_v1 = vpop.f32.mrf.mxu1  ;;  %v3033_v35 = vmax.f32 %v3031_v56, %v7345_v22  ;;  %v8540_v56 = vld [vmem:[#allocation45_spill] sm:$0xff] }
 0x77b   :  { %v3047_v22 = vmax.f32 %v8540_v56, %v8539_v31 }
 0x781   :  { %v7349_v45 = vpop.f32.mrf.mxu0 }
 0x782   :  { %8523 = vst [vmem:[#allocation32_spill] sm:$0xff] %v7349_v45  ;;  %v7351_v28 = vpop.f32.mrf.mxu1  ;;  %v3034_v59 = vmax.f32 %v3032_v63, %v7349_v45  ;;  %v8541_v45 = vld [vmem:[#allocation8_spill] sm:$0xff] }
 0x789   :  { %v7353_v8 = vpop.f32.mrf.mxu0 }
 0x78a   :  { %8524 = vst [vmem:[#allocation27_spill] sm:$0xff] %v7353_v8  ;;  %v7359_v30 = vpop.f32.mrf.mxu1  ;;  %v3035_v4 = vmax.f32 %v3033_v35, %v7353_v8  ;;  %v8542_v35 = vld [vmem:[#allocation23_spill] sm:$0xff] }
 0x78b   :  { %v3048_v8 = vmax.f32 %v8542_v35, %v8541_v45  ;;  %v7416_v45 = vpop.f32.mrf.mxu2 }
 0x78c   :  { %8547 = vst [vmem:[#allocation44_spill] sm:$0xff] %v7416_v45 }
 0x791   :  { %v7363_v37 = vpop.f32.mrf.mxu0 }
 0x792   :  { %8531 = vst [vmem:[#allocation26_spill] sm:$0xff] %v7363_v37  ;;  %v7371_v41 = vpop.f32.mrf.mxu1  ;;  %v3036_v61 = vmax.f32 %v3034_v59, %v7363_v37  ;;  %v8543_v59 = vld [vmem:[#allocation22_spill] sm:$0xff] }
 0x793   :  { %v3049_v37 = vmax.f32 %v3047_v22, %v8543_v59  ;;  %v7418_v22 = vpop.f32.mrf.mxu3 }
 0x794   :  { %8548 = vst [vmem:[#allocation16_spill] sm:$0xff] %v7418_v22 }
 0x799   :  { %v7375_v46 = vpop.f32.mrf.mxu0 }
 0x79a   :  { %8536 = vst [vmem:[#allocation15_spill] sm:$0xff] %v7375_v46  ;;  %v7383_v12 = vpop.f32.mrf.mxu1  ;;  %v3037_v29 = vmax.f32 %v3035_v4, %v7375_v46  ;;  %v8544_v46 = vld [vmem:[#allocation11_spill] sm:$0xff] }
 0x79b   :  { %v3050_v49 = vmax.f32 %v3048_v8, %v8544_v46 }
 0x7a1   :  { %v7387_v26 = vpop.f32.mrf.mxu0 }
 0x7a2   :  { %8537 = vst [vmem:[#allocation51_spill] sm:$0xff] %v7387_v26  ;;  %v7397_v2 = vpop.f32.mrf.mxu1  ;;  %v3038_v44 = vmax.f32 %v3036_v61, %v7387_v26  ;;  %v3051_v61 = vmax.f32 %v3049_v37, %v8545_v58 }
 0x7a9   :  { %v7399_v50 = vpop.f32.mrf.mxu0 }
 0x7aa   :  { %8538 = vst [vmem:[#allocation14_spill] sm:$0xff] %v7399_v50  ;;  %v3039_v55 = vmax.f32 %v3037_v29, %v7399_v50  ;;  %v7409_v53 = vpop.f32.mrf.mxu1  ;;  %v8546_v29 = vld [vmem:[#allocation24_spill] sm:$0xff] }
 0x7ac   :  { %v3040_v54 = vmax.f32 %v3038_v44, %v3039_v55  ;;  %v3052_v44 = vmax.f32 %v3050_v49, %v8546_v29  ;;  %v3053_v55 = vmax.f32 %v3051_v61, %v7125_v11 }
 0x7ae   :  { %v3041_v10 = vrot.slane %v3040_v54, 4 }
 0x7b0   :  { %v3042_v63 = vmax.f32 %v3040_v54, %v3041_v10  ;;  %v3054_v54 = vmax.f32 %v3052_v44, %v7167_v21  ;;  %v3055_v10 = vmax.f32 %v3053_v55, %v7197_v14 }
 0x7b2   :  { %v3043_v4 = vrot.slane %v3042_v63, 2  ;;  %v3056_v8 = vmax.f32 %v3054_v54, %v7215_v3  ;;  %v3057_v46 = vmax.f32 %v3055_v10, %v7235_v6  ;;  %v7425_v49 = vpop.f32.mrf.mxu1 }
 0x7b4   :  { %v3044_v26 = vmax.f32 %v3042_v63, %v3043_v4  ;;  %v3058_v37 = vmax.f32 %v3056_v8, %v7247_v48  ;;  %v3059_v63 = vmax.f32 %v3057_v46, %v7273_v51 }
 0x7b6   :  { %v3045_v50 = vrot.slane %v3044_v26, 1  ;;  %v3060_v4 = vmax.f32 %v3058_v37, %v7305_v16  ;;  %v3061_v61 = vmax.f32 %v3059_v63, %v7317_v60 }
 0x7b7   :  { %v3457_v8 = vpop.f32.mrf.mxu2 }
 0x7b8   :  { %v7422_v59 = vmax.f32 %v3044_v26, %v3045_v50  ;;  %v3062_v54 = vmax.f32 %v3060_v4, %v7325_v34  ;;  %v3063_v50 = vmax.f32 %v3061_v61, %v7331_v33  ;;  %v3470_v37 = vpop.f32.mrf.mxu3 }
 0x7ba   :  { %v3084_v44 = vsub.f32 %v8526_v17, %v7422_v59  ;;  %v3086_v55 = vsub.f32 %v8528_v18, %v7422_v59  ;;  %v3088_v26 = vsub.f32 %v8525_v23, %v7422_v59  ;;  %v3064_v10 = vmax.f32 %v3062_v54, %v7335_v15  ;;  %v7447_v61 = vpop.f32.mrf.mxu1 }
 0x7bb   :  { %v3090_v46 = vsub.f32 %v8527_v19, %v7422_v59  ;;  %v3065_v63 = vmax.f32 %v3063_v50, %v7339_v32  ;;  %v3092_v4 = vsub.f32 %v8529_v39, %v7422_v59  ;;  %v7445_v23 = vadd.f32 %v3470_v37, %v3457_v8 }
 0x7bc   :  { %v3148_v17 = vmul.f32 1.442695, %v3084_v44  ;;  %v3152_v22 = vmul.f32 1.442695, %v3086_v55  ;;  %v3066_v18 = vmax.f32 %v3064_v10, %v7343_v5  ;;  %v3156_v45 = vmul.f32 1.442695, %v3088_v26 }
 0x7bd   :  { %8549 = vst [vmem:[#allocation17_spill] sm:$0xff] %v7445_v23  ;;  %v3067_v54 = vmax.f32 %v3065_v63, %v7347_v1  ;;  %v3094_v50 = vsub.f32 %v8530_v52, %v7422_v59  ;;  %v3160_v44 = vmul.f32 1.442695, %v3090_v46  ;;  %v3096_v39 = vsub.f32 %v8532_v47, %v7422_v59 }
 0x7be   :  { %4374 = vpow2.f32 %v3148_v17  ;;  %v3068_v19 = vmax.f32 %v3066_v18, %v7351_v28  ;;  %v3164_v26 = vmul.f32 1.442695, %v3092_v4  ;;  %v3098_v63 = vsub.f32 %v8533_v27, %v7422_v59 }
 0x7bf   :  { %4376 = vpow2.f32 %v3152_v22  ;;  %v3069_v55 = vmax.f32 %v3067_v54, %v7359_v30  ;;  %v3168_v52 = vmul.f32 1.442695, %v3094_v50  ;;  %v3459_v22 = vpop.f32.mrf.mxu2  ;;  %v3172_v47 = vmul.f32 1.442695, %v3096_v39 }
 0x7c0   :  { %v3070_v10 = vmax.f32 %v3068_v19, %v7371_v41  ;;  %4378 = vpow2.f32 %v3156_v45  ;;  %v3472_v46 = vpop.f32.mrf.mxu3  ;;  %v3100_v45 = vsub.f32 %v8534_v7, %v7422_v59  ;;  %v3102_v27 = vsub.f32 %v7051_v13, %v7422_v59 }
 0x7c1   :  { %v3071_v8 = vmax.f32 %v3069_v55, %v7383_v12  ;;  %4380 = vpow2.f32 %v3160_v44  ;;  %v3176_v55 = vmul.f32 1.442695, %v3098_v63  ;;  %v3106_v63 = vsub.f32 %v8535_v40, %v7422_v59 }
 0x7c2   :  { %v3072_v37 = vmax.f32 %v3070_v10, %v7397_v2  ;;  %4382 = vpow2.f32 %v3164_v26  ;;  %v7469_v19 = vpop.f32.mrf.mxu1  ;;  %v3180_v13 = vmul.f32 1.442695, %v3100_v45  ;;  %v3110_v40 = vsub.f32 %v7177_v57, %v7422_v59 }
 0x7c3   :  { %v3073_v18 = vmax.f32 %v3071_v8, %v7409_v53  ;;  %4384 = vpow2.f32 %v3168_v52  ;;  %v3104_v8 = vsub.f32 %v7077_v42, %v7422_v59  ;;  %v3184_v52 = vmul.f32 1.442695, %v3102_v27 }
 0x7c4   :  { %v7461_v17 = vpop.eup %4374  ;;  %v3074_v4 = vmax.f32 %v3072_v37, %v7425_v49  ;;  %4386 = vpow2.f32 %v3172_v47  ;;  %v3108_v42 = vsub.f32 %v7145_v36, %v7422_v59  ;;  %v3192_v27 = vmul.f32 1.442695, %v3106_v63 }
 0x7c5   :  { %8550 = vst [vmem:[#allocation42_spill] sm:$0xff] %v7461_v17  ;;  %v7464_v54 = vpop.eup %4376  ;;  %v3075_v10 = vmax.f32 %v3073_v18, %v7447_v61  ;;  %4388 = vpow2.f32 %v3176_v55  ;;  %v3188_v45 = vmul.f32 1.442695, %v3104_v8  ;;  %v3112_v36 = vsub.f32 %v7205_v38, %v7422_v59 }
 0x7c6   :  { %8551 = vst [vmem:[#allocation52_spill] sm:$0xff] %v7464_v54  ;;  %v3276_v50 = vadd.f32 %v7464_v54, %v7461_v17  ;;  %v7475_v44 = vpop.eup %4378  ;;  %v3076_v7 = vmax.f32 %v3074_v4, %v7469_v19  ;;  %4390 = vpow2.f32 %v3180_v13  ;;  %v3196_v8 = vmul.f32 1.442695, %v3108_v42 }
 0x7c7   :  { %8552 = vst [vmem:[#allocation33_spill] sm:$0xff] %v7475_v44  ;;  %v7480_v26 = vpop.eup %4380  ;;  %4392 = vpow2.f32 %v3184_v52  ;;  %v3114_v57 = vsub.f32 %v7221_v25, %v7422_v59  ;;  %v3200_v63 = vmul.f32 1.442695, %v3110_v40  ;;  %v3204_v38 = vmul.f32 1.442695, %v3112_v36 }
 0x7c8   :  { %v3277_v39 = vadd.f32 %v7475_v44, %v3276_v50  ;;  %8553 = vst [vmem:[#allocation38_spill] sm:$0xff] %v7480_v26  ;;  %v3077_v37 = vmax.f32 %v3075_v10, %v3076_v7  ;;  %v7485_v46 = vpop.eup %4382  ;;  %4394 = vpow2.f32 %v3188_v45  ;;  %v3122_v36 = vsub.f32 %v7311_v20, %v7422_v59 }
 0x7c9   :  { %v7490_v50 = vpop.eup %4384  ;;  %4396 = vpow2.f32 %v3192_v27  ;;  %v3208_v25 = vmul.f32 1.442695, %v3114_v57 }
 0x7ca   :  { %v3278_v22 = vadd.f32 %v7480_v26, %v3277_v39  ;;  %v3078_v18 = vrot.slane %v3077_v37, 4  ;;  %v7495_v7 = vpop.eup %4386  ;;  %4398 = vpow2.f32 %v3196_v8 }
 0x7cb   :  { %4400 = vpow2.f32 %v3200_v63 }
 0x7cc   :  { %v3279_v4 = vadd.f32 %v7485_v46, %v3278_v22  ;;  %v3079_v47 = vmax.f32 %v3077_v37, %v3078_v18  ;;  %v7500_v22 = vpop.eup %4388  ;;  %4402 = vpow2.f32 %v3204_v38 }
 0x7cd   :  { %v7505_v18 = vpop.eup %4390  ;;  %4404 = vpow2.f32 %v3208_v25  ;;  %v8554_v25 = vld [vmem:[#allocation31_spill] sm:$0xff] }
 0x7ce   :  { %v3280_v10 = vadd.f32 %v7490_v50, %v3279_v4  ;;  %v3080_v55 = vrot.slane %v3079_v47, 2  ;;  %v7510_v4 = vpop.eup %4392 }
 0x7d0   :  { %v3281_v39 = vadd.f32 %v7495_v7, %v3280_v10  ;;  %v3081_v37 = vmax.f32 %v3079_v47, %v3080_v55  ;;  %v3116_v10 = vsub.f32 %v7241_v43, %v7422_v59  ;;  %v7515_v47 = vpop.eup %4394  ;;  %v3118_v55 = vsub.f32 %v7265_v9, %v7422_v59 }
 0x7d1   :  { %v7520_v27 = vpop.eup %4396  ;;  %v3124_v9 = vsub.f32 %v7323_v24, %v7422_v59  ;;  %v3126_v24 = vsub.f32 %v7329_v0, %v7422_v59 }
 0x7d2   :  { %v3282_v13 = vadd.f32 %v7500_v22, %v3281_v39  ;;  %v3082_v45 = vrot.slane %v3081_v37, 1  ;;  %v3120_v39 = vsub.f32 %v7291_v62, %v7422_v59  ;;  %v3212_v43 = vmul.f32 1.442695, %v3116_v10 }
 0x7d3   :  { %v3216_v57 = vmul.f32 1.442695, %v3118_v55  ;;  %v3224_v10 = vmul.f32 1.442695, %v3122_v36  ;;  %v3228_v55 = vmul.f32 1.442695, %v3124_v9 }
 0x7d4   :  { %v3283_v52 = vadd.f32 %v7505_v18, %v3282_v13  ;;  %v7527_v13 = vmax.f32 %v3081_v37, %v3082_v45  ;;  %4406 = vpow2.f32 %v3212_v43  ;;  %v3220_v62 = vmul.f32 1.442695, %v3120_v39  ;;  %v8555_v36 = vld [vmem:[#allocation18_spill] sm:$0xff] }
 0x7d5   :  { %4408 = vpow2.f32 %v3216_v57 }
 0x7d6   :  { %v3284_v42 = vadd.f32 %v7510_v4, %v3283_v52  ;;  %v7529_v52 = vpop.eup %4398  ;;  %v3085_v37 = vsub.f32 %v8540_v56, %v7527_v13  ;;  %v3087_v38 = vsub.f32 %v8542_v35, %v7527_v13  ;;  %v3130_v56 = vsub.f32 %v8555_v36, %v7422_v59 }
 0x7d7   :  { %4410 = vpow2.f32 %v3220_v62  ;;  %v3089_v35 = vsub.f32 %v8539_v31, %v7527_v13  ;;  %v8559_v62 = vld [vmem:[#allocation19_spill] sm:$0xff] }
 0x7d8   :  { %v3285_v40 = vadd.f32 %v7515_v47, %v3284_v42  ;;  %v7534_v42 = vpop.eup %4400  ;;  %4412 = vpow2.f32 %v3224_v10  ;;  %v3150_v9 = vmul.f32 1.442695, %v3085_v37  ;;  %v3154_v57 = vmul.f32 1.442695, %v3087_v38  ;;  %v8561_v37 = vld [vmem:[#allocation22_spill] sm:$0xff] }
 0x7d9   :  { %v7541_v45 = vpop.eup %4402  ;;  %4414 = vpow2.f32 %v3228_v55  ;;  %v3132_v36 = vsub.f32 %v8559_v62, %v7422_v59  ;;  %v3093_v38 = vsub.f32 %v8561_v37, %v7527_v13  ;;  %v3158_v55 = vmul.f32 1.442695, %v3089_v35 }
 0x7da   :  { %v3286_v8 = vadd.f32 %v7520_v27, %v3285_v40  ;;  %v3128_v40 = vsub.f32 %v8554_v25, %v7422_v59  ;;  %v7548_v43 = vpop.eup %4404  ;;  %v8557_v25 = vld [vmem:[#allocation8_spill] sm:$0xff]  ;;  %4416 = vpow2.f32 %v3150_v9 }
 0x7db   :  { %v7555_v23 = vpop.eup %4406  ;;  %v3091_v54 = vsub.f32 %v8557_v25, %v7527_v13  ;;  %4418 = vpow2.f32 %v3154_v57  ;;  %v3240_v25 = vmul.f32 1.442695, %v3130_v56  ;;  %v3244_v35 = vmul.f32 1.442695, %v3132_v36 }
 0x7dc   :  { %v3287_v63 = vadd.f32 %v7529_v52, %v3286_v8  ;;  %v3483_v8 = vpop.f32.mrf.mxu2  ;;  %8556 = vst [vmem:[#allocation41_spill] sm:$0xff] %v7555_v23  ;;  %v3236_v31 = vmul.f32 1.442695, %v3128_v40  ;;  %v7564_v10 = vpop.eup %4408  ;;  %v8563_v40 = vld [vmem:[#allocation11_spill] sm:$0xff]  ;;  %v3166_v56 = vmul.f32 1.442695, %v3093_v38 }
 0x7dd   :  { %8560 = vst [vmem:[#allocation9_spill] sm:$0xff] %v7564_v10  ;;  %v3162_v9 = vmul.f32 1.442695, %v3091_v54  ;;  %v8566_v54 = vld [vmem:[#allocation27_spill] sm:$0xff]  ;;  %v8568_v38 = vld [vmem:[#allocation26_spill] sm:$0xff] }
 0x7de   :  { %v3288_v20 = vadd.f32 %v7534_v42, %v3287_v63  ;;  %v3496_v63 = vpop.f32.mrf.mxu3 }
 0x7df   :  { %v7559_v17 = vadd.f32 %v3496_v63, %v3483_v8  ;;  %v7571_v63 = vpop.eup %4410 }
 0x7e0   :  { %v3289_v39 = vadd.f32 %v7541_v45, %v3288_v20  ;;  %v3232_v20 = vmul.f32 1.442695, %v3126_v24  ;;  %v8562_v24 = vld [vmem:[#allocation35_spill] sm:$0xff]  ;;  %v7575_v62 = vpop.eup %4412 }
 0x7e1   :  { %8558 = vst [vmem:[#allocation49_spill] sm:$0xff] %v7559_v17  ;;  %v8564_v17 = vld [vmem:[#allocation32_spill] sm:$0xff] }
 0x7e2   :  { %v3290_v0 = vadd.f32 %v7548_v43, %v3289_v39  ;;  %v3134_v39 = vsub.f32 %v8562_v24, %v7422_v59  ;;  %4420 = vpow2.f32 %v3232_v20  ;;  %v3136_v37 = vsub.f32 %v8564_v17, %v7422_v59  ;;  %v7580_v24 = vpop.eup %4414 }
 0x7e3   :  { %4422 = vpow2.f32 %v3236_v31 }
 0x7e4   :  { %v3291_v26 = vadd.f32 %v7555_v23, %v3290_v0  ;;  %v3095_v0 = vsub.f32 %v8563_v40, %v7527_v13  ;;  %4424 = vpow2.f32 %v3158_v55  ;;  %v3485_v20 = vpop.f32.mrf.mxu2  ;;  %v7584_v40 = vpop.eup %4416  ;;  %v3138_v23 = vsub.f32 %v8566_v54, %v7422_v59 }
 0x7e5   :  { %8565 = vst [vmem:[#allocation37_spill] sm:$0xff] %v7584_v40  ;;  %4426 = vpow2.f32 %v3240_v25  ;;  %v3248_v17 = vmul.f32 1.442695, %v3134_v39  ;;  %v7589_v31 = vpop.eup %4418  ;;  %v3140_v55 = vsub.f32 %v8568_v38, %v7422_v59  ;;  %v8569_v39 = vld [vmem:[#allocation15_spill] sm:$0xff] }
 0x7e6   :  { %v3292_v8 = vadd.f32 %v7564_v10, %v3291_v26  ;;  %v3097_v26 = vsub.f32 %v8545_v58, %v7527_v13  ;;  %v3498_v10 = vpop.f32.mrf.mxu3  ;;  %8567 = vst [vmem:[#allocation39_spill] sm:$0xff] %v7589_v31  ;;  %4428 = vpow2.f32 %v3162_v9  ;;  %v3170_v58 = vmul.f32 1.442695, %v3095_v0 }
 0x7e7   :  { %4430 = vpow2.f32 %v3244_v35  ;;  %v3252_v10 = vmul.f32 1.442695, %v3136_v37  ;;  %v3142_v25 = vsub.f32 %v8569_v39, %v7422_v59  ;;  %v3256_v0 = vmul.f32 1.442695, %v3138_v23 }
 0x7e8   :  { %v3293_v57 = vadd.f32 %v7571_v63, %v3292_v8  ;;  %v3099_v8 = vsub.f32 %v8546_v29, %v7527_v13  ;;  %v7596_v44 = vpop.eup %4420  ;;  %4432 = vpow2.f32 %v3166_v56  ;;  %v3174_v54 = vmul.f32 1.442695, %v3097_v26 }
 0x7e9   :  { %v7602_v29 = vpop.eup %4422  ;;  %4434 = vpow2.f32 %v3248_v17  ;;  %v3313_v37 = vadd.f32 %v7589_v31, %v7584_v40  ;;  %v3103_v39 = vsub.f32 %v7167_v21, %v7527_v13  ;;  %v3260_v56 = vmul.f32 1.442695, %v3140_v55  ;;  %v8573_v31 = vld [vmem:[#allocation14_spill] sm:$0xff] }
 0x7ea   :  { %v3294_v36 = vadd.f32 %v7575_v62, %v3293_v57  ;;  %v3101_v57 = vsub.f32 %v7125_v11, %v7527_v13  ;;  %v7607_v35 = vpop.eup %4424  ;;  %4436 = vpow2.f32 %v3170_v58  ;;  %v3178_v11 = vmul.f32 1.442695, %v3099_v8 }
 0x7eb   :  { %8570 = vst [vmem:[#allocation36_spill] sm:$0xff] %v7607_v35  ;;  %v7613_v26 = vpop.eup %4426  ;;  %4438 = vpow2.f32 %v3252_v10  ;;  %v3314_v17 = vadd.f32 %v7607_v35, %v3313_v37  ;;  %v3146_v40 = vsub.f32 %v8573_v31, %v7422_v59  ;;  %v3264_v8 = vmul.f32 1.442695, %v3142_v25 }
 0x7ec   :  { %v3295_v20 = vadd.f32 %v7580_v24, %v3294_v36  ;;  %v8571_v36 = vld [vmem:[#allocation51_spill] sm:$0xff]  ;;  %4440 = vpow2.f32 %v3174_v54  ;;  %v3182_v21 = vmul.f32 1.442695, %v3101_v57  ;;  %v3107_v37 = vsub.f32 %v7215_v3, %v7527_v13 }
 0x7ed   :  { %v3144_v38 = vsub.f32 %v8571_v36, %v7422_v59  ;;  %v3105_v36 = vsub.f32 %v7197_v14, %v7527_v13  ;;  %4442 = vpow2.f32 %v3256_v0  ;;  %v3186_v59 = vmul.f32 1.442695, %v3103_v39 }
 0x7ee   :  { %v3296_v9 = vadd.f32 %v7596_v44, %v3295_v20  ;;  %v7617_v20 = vpop.eup %4428  ;;  %4444 = vpow2.f32 %v3178_v11  ;;  %v3109_v0 = vsub.f32 %v7235_v6, %v7527_v13  ;;  %v3272_v3 = vmul.f32 1.442695, %v3146_v40 }
 0x7ef   :  { %8572 = vst [vmem:[#allocation29_spill] sm:$0xff] %v7617_v20  ;;  %v7623_v58 = vpop.eup %4430  ;;  %v3315_v10 = vadd.f32 %v7617_v20, %v3314_v17  ;;  %4446 = vpow2.f32 %v3260_v56  ;;  %v3268_v14 = vmul.f32 1.442695, %v3144_v38  ;;  %v3111_v56 = vsub.f32 %v7247_v48, %v7527_v13 }
 0x7f0   :  { %v3297_v23 = vadd.f32 %v7602_v29, %v3296_v9  ;;  %v7627_v9 = vpop.eup %4432  ;;  %4448 = vpow2.f32 %v3182_v21  ;;  %v3113_v40 = vsub.f32 %v7273_v51, %v7527_v13 }
 0x7f1   :  { %8574 = vst [vmem:[#allocation34_spill] sm:$0xff] %v7627_v9  ;;  %v7631_v31 = vpop.eup %4434  ;;  %v3316_v54 = vadd.f32 %v7627_v9, %v3315_v10  ;;  %4450 = vpow2.f32 %v3264_v8  ;;  %v3198_v8 = vmul.f32 1.442695, %v3109_v0 }
 0x7f2   :  { %v3298_v55 = vadd.f32 %v7613_v26, %v3297_v23  ;;  %v7635_v25 = vpop.eup %4436  ;;  %v3190_v23 = vmul.f32 1.442695, %v3105_v36  ;;  %4452 = vpow2.f32 %v3186_v59 }
 0x7f3   :  { %8575 = vst [vmem:[#allocation50_spill] sm:$0xff] %v7635_v25  ;;  %v7639_v17 = vpop.eup %4438  ;;  %v3317_v11 = vadd.f32 %v7635_v25, %v3316_v54  ;;  %4454 = vpow2.f32 %v3268_v14  ;;  %v3115_v14 = vsub.f32 %v7305_v16, %v7527_v13  ;;  %v3202_v54 = vmul.f32 1.442695, %v3111_v56 }
 0x7f4   :  { %v3299_v57 = vadd.f32 %v7623_v58, %v3298_v55  ;;  %v7643_v38 = vpop.eup %4440  ;;  %v3194_v55 = vmul.f32 1.442695, %v3107_v37  ;;  %4456 = vpow2.f32 %v3190_v23 }
 0x7f5   :  { %v7647_v10 = vpop.eup %4442  ;;  %v3318_v36 = vadd.f32 %v7643_v38, %v3317_v11  ;;  %4458 = vpow2.f32 %v3272_v3  ;;  %v3117_v3 = vsub.f32 %v7317_v60, %v7527_v13  ;;  %v3206_v11 = vmul.f32 1.442695, %v3113_v40 }
 0x7f6   :  { %v3300_v39 = vadd.f32 %v7631_v31, %v3299_v57  ;;  %v7651_v21 = vpop.eup %4444  ;;  %4460 = vpow2.f32 %v3194_v55  ;;  %v3119_v55 = vsub.f32 %v7325_v34, %v7527_v13 }
 0x7f7   :  { %v7655_v57 = vpop.eup %4446  ;;  %v3319_v37 = vadd.f32 %v7651_v21, %v3318_v36  ;;  %4462 = vpow2.f32 %v3198_v8  ;;  %v3121_v8 = vsub.f32 %v7331_v33, %v7527_v13  ;;  %v3125_v33 = vsub.f32 %v7339_v32, %v7527_v13 }
 0x7f8   :  { %v3301_v6 = vadd.f32 %v7639_v17, %v3300_v39  ;;  %v7659_v59 = vpop.eup %4448  ;;  %4464 = vpow2.f32 %v3202_v54  ;;  %v3218_v54 = vmul.f32 1.442695, %v3119_v55  ;;  %v3129_v32 = vsub.f32 %v7347_v1, %v7527_v13 }
 0x7f9   :  { %v7663_v39 = vpop.eup %4450  ;;  %v3320_v0 = vadd.f32 %v7659_v59, %v3319_v37  ;;  %4466 = vpow2.f32 %v3206_v11  ;;  %v3133_v1 = vsub.f32 %v7359_v30, %v7527_v13  ;;  %v3137_v30 = vsub.f32 %v7383_v12, %v7527_v13 }
 0x7fa   :  { %v3302_v48 = vadd.f32 %v7647_v10, %v3301_v6  ;;  %v7667_v23 = vpop.eup %4452  ;;  %v3143_v12 = vsub.f32 %v7425_v49, %v7527_v13  ;;  %v3145_v49 = vsub.f32 %v7447_v61, %v7527_v13 }
 0x7fb   :  { %v7671_v6 = vpop.eup %4454  ;;  %v3321_v16 = vadd.f32 %v7667_v23, %v3320_v0 }
 0x7fc   :  { %v3303_v51 = vadd.f32 %v7655_v57, %v3302_v48  ;;  %v7675_v56 = vpop.eup %4456  ;;  %v3210_v48 = vmul.f32 1.442695, %v3115_v14  ;;  %v3123_v14 = vsub.f32 %v7335_v15, %v7527_v13  ;;  %v3127_v15 = vsub.f32 %v7343_v5, %v7527_v13 }
 0x7fd   :  { %v7679_v37 = vpop.eup %4458  ;;  %v3322_v60 = vadd.f32 %v7675_v56, %v3321_v16  ;;  %v3131_v5 = vsub.f32 %v7351_v28, %v7527_v13  ;;  %v3135_v28 = vsub.f32 %v7371_v41, %v7527_v13 }
 0x7fe   :  { %v3304_v36 = vadd.f32 %v7663_v39, %v3303_v51  ;;  %v7683_v40 = vpop.eup %4460  ;;  %v3214_v51 = vmul.f32 1.442695, %v3117_v3  ;;  %4468 = vpow2.f32 %v3210_v48  ;;  %v3222_v3 = vmul.f32 1.442695, %v3121_v8 }
 0x7ff   :  { %v3323_v35 = vadd.f32 %v7683_v40, %v3322_v60  ;;  %v7689_v34 = vpop.eup %4462  ;;  %v3226_v55 = vmul.f32 1.442695, %v3123_v14  ;;  %v3230_v8 = vmul.f32 1.442695, %v3125_v33  ;;  %v3234_v14 = vmul.f32 1.442695, %v3127_v15 }
 0x800   :  { %v3305_v20 = vadd.f32 %v7671_v6, %v3304_v36  ;;  %v7694_v25 = vpop.eup %4464  ;;  %4470 = vpow2.f32 %v3214_v51  ;;  %v3238_v33 = vmul.f32 1.442695, %v3129_v32  ;;  %v3242_v15 = vmul.f32 1.442695, %v3131_v5 }
 0x801   :  { %v3324_v16 = vadd.f32 %v7689_v34, %v3323_v35  ;;  %v7699_v60 = vpop.eup %4466  ;;  %4472 = vpow2.f32 %v3218_v54  ;;  %v3246_v32 = vmul.f32 1.442695, %v3133_v1  ;;  %v3250_v41 = vmul.f32 1.442695, %v3135_v28 }
 0x802   :  { %v3306_v0 = vadd.f32 %v7679_v37, %v3305_v20  ;;  %4474 = vpow2.f32 %v3222_v3  ;;  %v3141_v5 = vsub.f32 %v7409_v53, %v7527_v13 }
 0x803   :  { %v3325_v11 = vadd.f32 %v7694_v25, %v3324_v16  ;;  %4476 = vpow2.f32 %v3226_v55 }
 0x804   :  { %v3307_v36 = vrot.slane %v3306_v0, 4  ;;  %v7704_v9 = vpop.eup %4468  ;;  %4478 = vpow2.f32 %v3230_v8 }
 0x805   :  { %v3326_v35 = vadd.f32 %v7699_v60, %v3325_v11  ;;  %4480 = vpow2.f32 %v3234_v14 }
 0x806   :  { %v3308_v20 = vadd.f32 %v3307_v36, %v3306_v0  ;;  %v7709_v36 = vpop.eup %4470 }
 0x807   :  { %v3327_v0 = vadd.f32 %v7704_v9, %v3326_v35  ;;  %v7714_v11 = vpop.eup %4472 }
 0x808   :  { %v3309_v48 = vrot.slane %v3308_v20, 2 }
 0x809   :  { %v3328_v16 = vadd.f32 %v7709_v36, %v3327_v0  ;;  %v3139_v0 = vsub.f32 %v7397_v2, %v7527_v13 }
 0x80a   :  { %v3310_v51 = vadd.f32 %v3309_v48, %v3308_v20  ;;  %v7719_v48 = vpop.eup %4474 }
 0x80b   :  { %v3329_v20 = vadd.f32 %v7714_v11, %v3328_v16  ;;  %v7724_v35 = vpop.eup %4476  ;;  %v3254_v16 = vmul.f32 1.442695, %v3137_v30  ;;  %v3258_v53 = vmul.f32 1.442695, %v3139_v0  ;;  %v3266_v30 = vmul.f32 1.442695, %v3143_v12 }
 0x80c   :  { %v3311_v54 = vrot.slane %v3310_v51, 1 }
 0x80d   :  { %v3330_v55 = vadd.f32 %v7719_v48, %v3329_v20  ;;  %v3262_v20 = vmul.f32 1.442695, %v3141_v5 }
 0x80e   :  { %v3312_v3 = vadd.f32 %v3311_v54, %v3310_v51  ;;  %v7729_v51 = vpop.eup %4478 }
 0x80f   :  { %v3331_v8 = vadd.f32 %v7724_v35, %v3330_v55  ;;  %v7736_v54 = vpop.eup %4480  ;;  %v3147_v55 = vsub.f32 %v7469_v19, %v7527_v13 }
 0x810   :  { %4482 = vrcp.f32 %v3312_v3 }
 0x811   :  { %4484 = vpow2.f32 %v3238_v33  ;;  %v3332_v14 = vadd.f32 %v7729_v51, %v3331_v8  ;;  %v3274_v5 = vmul.f32 1.442695, %v3147_v55 }
 0x812   :  { %4486 = vpow2.f32 %v3242_v15 }
 0x813   :  { %4488 = vpow2.f32 %v3246_v32  ;;  %v3333_v33 = vadd.f32 %v7736_v54, %v3332_v14 }
 0x814   :  { %4490 = vpow2.f32 %v3250_v41  ;;  %v3270_v41 = vmul.f32 1.442695, %v3145_v49 }
 0x815   :  { %4492 = vpow2.f32 %v3254_v16 }
 0x816   :  { %v7740_v1 = vpop.eup %4482  ;;  %4494 = vpow2.f32 %v3258_v53 }
 0x817   :  { %v7743_v3 = vpop.eup %4484  ;;  %v3414_v2 = vmul.f32 %v7740_v1, %v7679_v37  ;;  %4496 = vpow2.f32 %v3262_v20  ;;  %v3380_v19 = vmul.f32 %v7740_v1, %v7541_v45  ;;  %v3382_v13 = vmul.f32 %v7740_v1, %v7548_v43 }
 0x818   :  { %v3334_v28 = vadd.f32 %v7743_v3, %v3333_v33  ;;  %v7748_v15 = vpop.eup %4486  ;;  %4498 = vpow2.f32 %v3266_v30  ;;  %v3412_v14 = vmul.f32 %v7740_v1, %v7671_v6  ;;  %v3376_v16 = vmul.f32 %v7740_v1, %v7529_v52 }
 0x819   :  { %v7755_v8 = vpop.eup %4488  ;;  %v3378_v33 = vmul.f32 %v7740_v1, %v7534_v42  ;;  %v3408_v53 = vmul.f32 %v7740_v1, %v7655_v57  ;;  %v3410_v45 = vmul.f32 %v7740_v1, %v7663_v39  ;;  %v3430_v43 = vpack.c.bf16 %v3382_v13, %v3380_v19 }
 0x81a   :  { %v3335_v32 = vadd.f32 %v7748_v15, %v3334_v28  ;;  %v7758_v0 = vpop.eup %4490  ;;  %v3446_v28 = vpack.c.bf16 %v3414_v2, %v3412_v14  ;;  %4500 = vpow2.f32 %v3270_v41  ;;  %v3404_v52 = vmul.f32 %v7740_v1, %v7639_v17 }
 0x81b   :  { %v7767_v12 = vpop.eup %4492  ;;  %v3428_v6 = vpack.c.bf16 %v3378_v33, %v3376_v16  ;;  %v3444_v55 = vpack.c.bf16 %v3410_v45, %v3408_v53  ;;  %3500 = vmatpush.bf16.msra.mxu2 %v3430_v43  ;;  %v3406_v57 = vmul.f32 %v7740_v1, %v7647_v10  ;;  %4502 = vpow2.f32 %v3274_v5 }
 0x81c   :  { %v3336_v37 = vadd.f32 %v7755_v8, %v3335_v32  ;;  %v7778_v49 = vpop.eup %4494  ;;  %3513 = vmatpush.bf16.msra.mxu3 %v3446_v28  ;;  %v3372_v2 = vmul.f32 %v7740_v1, %v7515_v47  ;;  %v3374_v32 = vmul.f32 %v7740_v1, %v7520_v27  ;;  %v3370_v5 = vmul.f32 %v7740_v1, %v7510_v4 }
 0x81d   :  { %v7782_v30 = vpop.eup %4496  ;;  %v3392_v47 = vmul.f32 %v7740_v1, %v7580_v24  ;;  %v3394_v27 = vmul.f32 %v7740_v1, %v7596_v44  ;;  %v3400_v14 = vmul.f32 %v7740_v1, %v7623_v58  ;;  %v3402_v16 = vmul.f32 %v7740_v1, %v7631_v31 }
 0x81e   :  { %v3337_v61 = vadd.f32 %v7758_v0, %v3336_v37  ;;  %v7787_v39 = vpop.eup %4498  ;;  %v3442_v37 = vpack.c.bf16 %v3406_v57, %v3404_v52  ;;  %v3426_v19 = vpack.c.bf16 %v3374_v32, %v3372_v2  ;;  %v3390_v4 = vmul.f32 %v7740_v1, %v7575_v62  ;;  %v8576_v57 = vld [vmem:[#allocation33_spill] sm:$0xff]  ;;  %v8577_v2 = vld [vmem:[#allocation38_spill] sm:$0xff] }
 0x81f   :  { %3501 = vmatpush.bf16.msra.mxu2 %v3428_v6  ;;  %v3436_v53 = vpack.c.bf16 %v3394_v27, %v3392_v47  ;;  %v3364_v44 = vmul.f32 %v7740_v1, %v7495_v7  ;;  %v3366_v58 = vmul.f32 %v7740_v1, %v7500_v22  ;;  %v3440_v43 = vpack.c.bf16 %v3402_v16, %v3400_v14  ;;  %v8581_v27 = vld [vmem:[#allocation9_spill] sm:$0xff]  ;;  %v8582_v14 = vld [vmem:[#allocation12_spill] sm:$0xff] }
 0x820   :  { %v3338_v20 = vadd.f32 %v7767_v12, %v3337_v61  ;;  %3514 = vmatpush.bf16.msra.mxu3 %v3444_v55  ;;  %v3368_v61 = vmul.f32 %v7740_v1, %v7505_v18  ;;  %v4501_v10 = vpop.eup %4500  ;;  %v3388_v18 = vmul.f32 %v7740_v1, %v7571_v63  ;;  %v3396_v63 = vmul.f32 %v7740_v1, %v7602_v29  ;;  %v8583_v16 = vld [vmem:[#allocation44_spill] sm:$0xff] }
 0x821   :  { %v4503_v33 = vpop.eup %4502  ;;  %v3398_v28 = vmul.f32 %v7740_v1, %v7613_v26  ;;  %v3422_v6 = vpack.c.bf16 %v3366_v58, %v3364_v44  ;;  %v3360_v7 = vmul.f32 %v7740_v1, %v7485_v46  ;;  %v3362_v22 = vmul.f32 %v7740_v1, %v7490_v50  ;;  %v8579_v50 = vld [vmem:[#allocation52_spill] sm:$0xff] }
 0x822   :  { %v3339_v42 = vadd.f32 %v7778_v49, %v3338_v20  ;;  %v3424_v24 = vpack.c.bf16 %v3370_v5, %v3368_v61  ;;  %v3434_v20 = vpack.c.bf16 %v3390_v4, %v3388_v18  ;;  %v3356_v29 = vmul.f32 %v7740_v1, %v8576_v57  ;;  %v8578_v61 = vld [vmem:[#allocation42_spill] sm:$0xff]  ;;  %v8580_v5 = vld [vmem:[#allocation41_spill] sm:$0xff]  ;;  %v8584_v4 = vld [vmem:[#allocation16_spill] sm:$0xff] }
 0x823   :  { %3502 = vmatpush.bf16.msra.mxu2 %v3426_v19  ;;  %v3438_v52 = vpack.c.bf16 %v3398_v28, %v3396_v63  ;;  %v3358_v26 = vmul.f32 %v7740_v1, %v8577_v2  ;;  %v3352_v46 = vmul.f32 %v7740_v1, %v8578_v61  ;;  %v3354_v19 = vmul.f32 %v7740_v1, %v8579_v50 }
 0x824   :  { %v3340_v17 = vadd.f32 %v7782_v30, %v3339_v42  ;;  %3515 = vmatpush.bf16.msra.mxu3 %v3442_v37  ;;  %v3384_v47 = vmul.f32 %v7740_v1, %v8580_v5  ;;  %v2013_v18 = vadd.f32 %v8583_v16, %v8582_v14  ;;  %v4545_v16 = vld [vmem:[%s7998_s0 + $0x28] sm:$0xff] }
 0x826   :  { %v3341_v41 = vadd.f32 %v7787_v39, %v3340_v17  ;;  %v3420_v17 = vpack.c.bf16 %v3362_v22, %v3360_v7  ;;  %v7841_v58 = vpack.c.bf16 %v2013_v18, %v2013_v18 }
 0x827   :  { %3503 = vmatpush.bf16.msra.mxu2 %v3424_v24 }
 0x828   :  { %v3342_v13 = vadd.f32 %v4501_v10, %v3341_v41  ;;  %3516 = vmatpush.bf16.msra.mxu3 %v3440_v43  ;;  %v3418_v41 = vpack.c.bf16 %v3358_v26, %v3356_v29 }
 0x82a   :  { %v3343_v45 = vadd.f32 %v4503_v33, %v3342_v13  ;;  %v3386_v13 = vmul.f32 %v7740_v1, %v8581_v27 }
 0x82b   :  { %3504 = vmatpush.bf16.msra.mxu2 %v3422_v6 }
 0x82c   :  { %v3344_v31 = vrot.slane %v3343_v45, 4  ;;  %3517 = vmatpush.bf16.msra.mxu3 %v3438_v52  ;;  %v3432_v24 = vpack.c.bf16 %v3386_v13, %v3384_v47  ;;  %v8590_v47 = vld [vmem:[#allocation39_spill] sm:$0xff] }
 0x82e   :  { %v3345_v62 = vadd.f32 %v3344_v31, %v3343_v45  ;;  %v3416_v45 = vpack.c.bf16 %v3354_v19, %v3352_v46  ;;  %v8589_v19 = vld [vmem:[#allocation37_spill] sm:$0xff] }
 0x82f   :  { %3505 = vmatpush.bf16.msra.mxu2 %v3420_v17  ;;  %v8585_v17 = vld [vmem:[#allocation34_spill] sm:$0xff] }
 0x830   :  { %v3346_v55 = vrot.slane %v3345_v62, 2  ;;  %3518 = vmatpush.bf16.msra.mxu3 %v3436_v53  ;;  %v2072_v53 = vadd.f32 %v8584_v4, %v8582_v14  ;;  %v4544_v14 = vld [vmem:[%s7998_s0 + $0x20] sm:$0xff] }
 0x832   :  { %v3347_v42 = vadd.f32 %v3346_v55, %v3345_v62  ;;  %v7843_v31 = vpack.c.bf16 %v2072_v53, %v2072_v53 }
 0x833   :  { %3506 = vmatpush.bf16.msra.mxu2 %v3418_v41  ;;  %v8586_v41 = vld [vmem:[#allocation50_spill] sm:$0xff] }
 0x834   :  { %v3348_v32 = vrot.slane %v3347_v42, 1  ;;  %3519 = vmatpush.bf16.msra.mxu3 %v3434_v20 }
 0x836   :  { %v3349_v37 = vadd.f32 %v3348_v32, %v3347_v42 }
 0x837   :  { %3507 = vmatpush.bf16.msra.mxu2 %v3416_v45  ;;  %v8591_v45 = vld [vmem:[#allocation17_spill] sm:$0xff] }
 0x838   :  { %4504 = vrcp.f32 %v3349_v37  ;;  %3520 = vmatpush.bf16.msra.mxu3 %v3432_v24  ;;  %v4546_v24 = vld [vmem:[%s8001_s3] sm:$0xff] }
 0x83a   :  { %3508 = vmatmul.bf16.vlgmr.msra.gmra.mxu2 %v7841_v58 }
 0x83b   :  { %3521 = vmatmul.bf16.vlgmr.msra.gmra.mxu3 %v7843_v31 }
 0x83e   :  { %v7839_v44 = vpop.eup %4504 }
 0x83f   :  { %v3415_v1 = vmul.f32 %v7839_v44, %v4503_v33  ;;  %v3381_v43 = vmul.f32 %v7839_v44, %v7699_v60  ;;  %v3383_v63 = vmul.f32 %v7839_v44, %v7704_v9  ;;  %v3413_v20 = vmul.f32 %v7839_v44, %v4501_v10 }
 0x840   :  { %v3377_v28 = vmul.f32 %v7839_v44, %v7689_v34  ;;  %v3379_v62 = vmul.f32 %v7839_v44, %v7694_v25  ;;  %v3409_v6 = vmul.f32 %v7839_v44, %v7782_v30  ;;  %v3411_v33 = vmul.f32 %v7839_v44, %v7787_v39 }
 0x841   :  { %v3431_v55 = vpack.c.bf16 %v3383_v63, %v3381_v43  ;;  %v3447_v52 = vpack.c.bf16 %v3415_v1, %v3413_v20  ;;  %v3373_v9 = vmul.f32 %v7839_v44, %v7675_v56  ;;  %v3375_v25 = vmul.f32 %v7839_v44, %v7683_v40 }
 0x842   :  { %v3429_v60 = vpack.c.bf16 %v3379_v62, %v3377_v28  ;;  %v3445_v34 = vpack.c.bf16 %v3411_v33, %v3409_v6  ;;  %v3405_v30 = vmul.f32 %v7839_v44, %v7767_v12  ;;  %v3407_v39 = vmul.f32 %v7839_v44, %v7778_v49  ;;  %v8592_v28 = vld [vmem:[#allocation49_spill] sm:$0xff] }
 0x843   :  { %3526 = vmatpush.bf16.msrb.mxu2 %v3431_v55  ;;  %3539 = vmatpush.bf16.msrb.mxu3 %v3447_v52  ;;  %v3427_v10 = vpack.c.bf16 %v3375_v25, %v3373_v9  ;;  %v3393_v56 = vmul.f32 %v7839_v44, %v7729_v51  ;;  %v3395_v22 = vmul.f32 %v7839_v44, %v7736_v54  ;;  %v8593_v9 = vld [vmem:[#allocation30_spill] sm:$0xff] }
 0x844   :  { %v3443_v7 = vpack.c.bf16 %v3407_v39, %v3405_v30  ;;  %v3369_v40 = vmul.f32 %v7839_v44, %v7659_v59  ;;  %v3371_v12 = vmul.f32 %v7839_v44, %v7667_v23  ;;  %v3401_v42 = vmul.f32 %v7839_v44, %v7755_v8  ;;  %v8594_v30 = vld [vmem:[#allocation25_spill] sm:$0xff] }
 0x845   :  { %v3403_v49 = vmul.f32 %v7839_v44, %v7758_v0  ;;  %v3437_v57 = vpack.c.bf16 %v3395_v22, %v3393_v56  ;;  %v3389_v29 = vmul.f32 %v7839_v44, %v7719_v48  ;;  %v3391_v51 = vmul.f32 %v7839_v44, %v7724_v35 }
 0x846   :  { %v3385_v54 = vmul.f32 %v7839_v44, %v7709_v36  ;;  %v3387_v59 = vmul.f32 %v7839_v44, %v7714_v11  ;;  %v3425_v8 = vpack.c.bf16 %v3371_v12, %v3369_v40  ;;  %v3365_v0 = vmul.f32 %v7839_v44, %v7643_v38 }
 0x847   :  { %3527 = vmatpush.bf16.msrb.mxu2 %v3429_v60  ;;  %3540 = vmatpush.bf16.msrb.mxu3 %v3445_v34  ;;  %v3435_v23 = vpack.c.bf16 %v3391_v51, %v3389_v29  ;;  %v3441_v26 = vpack.c.bf16 %v3403_v49, %v3401_v42  ;;  %v3367_v48 = vmul.f32 %v7839_v44, %v7651_v21  ;;  %v8587_v21 = vld [vmem:[#allocation36_spill] sm:$0xff] }
 0x848   :  { %v3433_v2 = vpack.c.bf16 %v3387_v59, %v3385_v54  ;;  %v3397_v35 = vmul.f32 %v7839_v44, %v7743_v3  ;;  %v3399_v36 = vmul.f32 %v7839_v44, %v7748_v15  ;;  %v3361_v37 = vmul.f32 %v7839_v44, %v8585_v17  ;;  %v8588_v3 = vld [vmem:[#allocation29_spill] sm:$0xff] }
 0x849   :  { %v3423_v11 = vpack.c.bf16 %v3367_v48, %v3365_v0  ;;  %v3363_v38 = vmul.f32 %v7839_v44, %v8586_v41  ;;  %v3357_v46 = vmul.f32 %v7839_v44, %v8587_v21  ;;  %v3359_v50 = vmul.f32 %v7839_v44, %v8588_v3 }
 0x84a   :  { %v3439_v32 = vpack.c.bf16 %v3399_v36, %v3397_v35  ;;  %v3353_v5 = vmul.f32 %v7839_v44, %v8589_v19  ;;  %v3355_v27 = vmul.f32 %v7839_v44, %v8590_v47 }
 0x84b   :  { %3528 = vmatpush.bf16.msrb.mxu2 %v3427_v10  ;;  %3541 = vmatpush.bf16.msrb.mxu3 %v3443_v7  ;;  %v3421_v61 = vpack.c.bf16 %v3363_v38, %v3361_v37  ;;  %v3419_v15 = vpack.c.bf16 %v3359_v50, %v3357_v46 }
 0x84c   :  { %v3417_v13 = vpack.c.bf16 %v3355_v27, %v3353_v5 }
 0x84f   :  { %3529 = vmatpush.bf16.msrb.mxu2 %v3425_v8  ;;  %3542 = vmatpush.bf16.msrb.mxu3 %v3441_v26 }
 0x853   :  { %3530 = vmatpush.bf16.msrb.mxu2 %v3423_v11  ;;  %3543 = vmatpush.bf16.msrb.mxu3 %v3439_v32 }
 0x857   :  { %3531 = vmatpush.bf16.msrb.mxu2 %v3421_v61  ;;  %3544 = vmatpush.bf16.msrb.mxu3 %v3437_v57  ;;  %v8595_v61 = vld [vmem:[#allocation20_spill] sm:$0xff] }
 0x85b   :  { %3532 = vmatpush.bf16.msrb.mxu2 %v3419_v15  ;;  %3545 = vmatpush.bf16.msrb.mxu3 %v3435_v23 }
 0x85f   :  { %3533 = vmatpush.bf16.msrb.mxu2 %v3417_v13  ;;  %3546 = vmatpush.bf16.msrb.mxu3 %v3433_v2 }
 0x862   :  { %3534 = vmatmul.bf16.vlgmr.msrb.gmra.mxu2 %v7841_v58  ;;  %3547 = vmatmul.bf16.vlgmr.msrb.gmra.mxu3 %v7843_v31  ;;  %v4547_v58 = vld [vmem:[%s8001_s3 + $0x8] sm:$0xff]  ;;  %v4548_v31 = vld [vmem:[%s8001_s3 + $0x10] sm:$0xff] }
 0x863   :  { %3565 = vmatpush.msra.mxu2 %v4544_v14  ;;  %3591 = vmatpush.msra.mxu3 %v4545_v16 }
 0x8bd   :  { %v3509_v18 = vpop.f32.mrf.mxu2 }
 0x8be   :  { %v3522_v4 = vpop.f32.mrf.mxu3 }
 0x8bf   :  { %v3523_v53 = vadd.f32 %v3522_v4, %v3509_v18 }
 0x8c1   :  { %3566 = vmatpush.msra.mxu2 %v3523_v53 }
 0x8c3   :  { %3567 = vmatpush.msra.mxu2 %v8591_v45 }
 0x8c4   :  { %3940 = vmatmul.msk.f32.vlgmr.msra.gmra.mxu2 %vm1788_vm2, %v4546_v24 }
 0x8c5   :  { %v3511_v44 = vpop.f32.mrf.mxu2 }
 0x8c6   :  { %v3524_v1 = vpop.f32.mrf.mxu3 }
 0x8cc   :  { %3941 = vmatmul.msk.f32.gmra.mxu2 %vm1788_vm2, %v4547_v58 }
 0x8d4   :  { %3942 = vmatmul.msk.f32.gmra.mxu2 %vm1788_vm2, %v4548_v31 }
 0x8e5   :  { %v3535_v43 = vpop.f32.mrf.mxu2  ;;  %v3548_v63 = vpop.f32.mrf.mxu3 }
 0x8e6   :  { %v3549_v20 = vadd.f32 %v3548_v63, %v3535_v43 }
 0x8e8   :  { %3592 = vmatpush.msra.mxu3 %v3549_v20 }
 0x8ea   :  { %3593 = vmatpush.msra.mxu3 %v8592_v28 }
 0x8eb   :  { %3943 = vmatmul.msk.f32.vlgmr.msra.gmra.mxu3 %vm1788_vm2, %v4546_v24 }
 0x8ed   :  { %v3537_v62 = vpop.f32.mrf.mxu2  ;;  %v3550_v6 = vpop.f32.mrf.mxu3 }
 0x8ee   :  { %v4549_v62 = vld [vmem:[%s7998_s0 + $0x30] sm:$0xff] }
 0x8f3   :  { %3944 = vmatmul.msk.f32.gmra.mxu3 %vm1788_vm2, %v4547_v58 }
 0x8fb   :  { %3945 = vmatmul.msk.f32.gmra.mxu3 %vm1788_vm2, %v4548_v31 }
 0x947   :  { %v3569_v33 = vpop.f32.mrf.mxu2 }
 0x948   :  { %v3570_v39 = vadd.f32 %v3569_v33, %v8594_v30 }
 0x94a   :  { %v3948_v56 = vmul.f32 -1.442695, %v3570_v39 }
 0x94f   :  { %v3572_v55 = vpop.f32.mrf.mxu2 }
 0x950   :  { %v3573_v21 = vadd.f32 %v3572_v55, %v8595_v61 }
 0x957   :  { %v3575_v52 = vpop.f32.mrf.mxu2 }
 0x958   :  { %v3576_v60 = vadd.f32 %v3575_v52, %v8593_v9 }
 0x95a   :  { %v3946_v34 = vmul.f32 -1.442695, %v3576_v60  ;;  %v4550_v60 = vld [vmem:[%s7998_s0 + $0x38] sm:$0xff]  ;;  %s4604_s0 = smov [#allocation4]  }
 0x95b   :  { %s3723_s27 = sshll.u32 %s4604_s0, 4  ;;  %s3724_s27 = int_to_ptr.vmem [resolvable:$true] %s3723_s27 }
 0x95c   :  { %4506 = vpow2.f32 %v3946_v34 }
 0x95d   :  { %4508 = vpow2.f32 %v3948_v56 }
 0x962   :  { %v4507_v7 = vpop.eup %4506 }
 0x963   :  { %v3610_v40 = vadd.f32 1.0, %v4507_v7  ;;  %v4509_v42 = vpop.eup %4508 }
 0x964   :  { %v7940_v23 = vadd.f32 1.0, %v4509_v42 }
 0x965   :  { %v3623_v37 = vand.u32 2147483648, %v3610_v40  ;;  %vm3617_vm2 = vweird.f32 %v3610_v40  ;;  %v3621_v41 = vand.u32 2147483647, %v3610_v40 }
 0x966   :  { %vm3665_vm15 = vweird.f32 %v7940_v23  ;;  %v3669_v55 = vand.u32 2147483647, %v7940_v23  ;;  %v3671_v52 = vand.u32 2147483648, %v7940_v23 }
 0x967   :  { %v3624_v19 = vor.u32 1.1754944e-38, %v3623_v37  ;;  %vm3622_vm7 = vcmp.eq.f32.partialorder %v3621_v41, 8.507059e+37 }
 0x96e   :  { %v3595_v25 = vpop.f32.mrf.mxu3 }
 0x96f   :  { %v3596_v10 = vadd.f32 %v3595_v25, %v8594_v30 }
 0x971   :  { %v3949_v22 = vmul.f32 -1.442695, %v3596_v10 }
 0x973   :  { %4510 = vpow2.f32 %v3949_v22 }
 0x974   :  { %4512 = vrcp.f32 %v3610_v40 }
 0x976   :  { %v3598_v12 = vpop.f32.mrf.mxu3 }
 0x977   :  { %v3599_v5 = vadd.f32 %v3598_v12, %v8595_v61  ;;  %v3672_v12 = vor.u32 1.1754944e-38, %v3671_v52 }
 0x979   :  { %v4511_v57 = vpop.eup %4510 }
 0x97a   :  { %v4513_v51 = vpop.eup %4512  ;;  %v7938_v59 = vadd.f32 1.0, %v4511_v57 }
 0x97b   :  { %v3613_v8 = vmul.f32 %v4513_v51, %v3610_v40  ;;  %vm3618_vm1 = vweird.f32 %v4513_v51 }
 0x97c   :  { %vm3619_vm6 = vmor %vm3617_vm2, %vm3618_vm1  ;;  %v3686_v43 = vand.u32 2147483648, %v7938_v59  ;;  %vm3680_vm14 = vweird.f32 %v7938_v59  ;;  %v3684_v20 = vand.u32 2147483647, %v7938_v59  ;;  %vm3670_vm1 = vcmp.eq.f32.partialorder %v3669_v55, 8.507059e+37 }
 0x97d   :  { %v3614_v0 = vsub.f32 1.0, %v3613_v8 }
 0x97e   :  { %v3601_v49 = vpop.f32.mrf.mxu3  ;;  %v3687_v7 = vor.u32 1.1754944e-38, %v3686_v43  ;;  %vm3685_vm4 = vcmp.eq.f32.partialorder %v3684_v20, 8.507059e+37 }
 0x97f   :  { %v3602_v29 = vadd.f32 %v3601_v49, %v8593_v9  ;;  %v3615_v48 = vmul.f32 %v4513_v51, %v3614_v0 }
 0x981   :  { %v3947_v54 = vmul.f32 -1.442695, %v3602_v29  ;;  %v3616_v11 = vadd.f32 %v4513_v51, %v3615_v48 }
 0x983   :  { %4514 = vpow2.f32 %v3947_v54  ;;  %v3620_v46 = vsel %vm3619_vm6, %v4513_v51, %v3616_v11 }
 0x984   :  { %4516 = vrcp.f32 %v7938_v59  ;;  %v3625_v13 = vsel %vm3622_vm7, %v3624_v19, %v3620_v46 }
 0x985   :  { %4518 = vrcp.f32 %v7940_v23  ;;  %v3642_v45 = vsub.f32 1.0, %v3625_v13 }
 0x987   :  { %v3644_v6 = vmul.f32 %v4549_v62, %v3642_v45 }
 0x989   :  { %v4515_v2 = vpop.eup %4514 }
 0x98a   :  { %v3611_v26 = vadd.f32 1.0, %v4515_v2  ;;  %v7944_v35 = vpop.eup %4516 }
 0x98b   :  { %v7946_v36 = vpop.eup %4518  ;;  %v3676_v32 = vmul.f32 %v7944_v35, %v7938_v59  ;;  %vm3681_vm11 = vweird.f32 %v7944_v35 }
 0x98c   :  { %4520 = vrcp.f32 %v3611_v26  ;;  %v3661_v17 = vmul.f32 %v7946_v36, %v7940_v23  ;;  %v3638_v27 = vand.u32 2147483648, %v3611_v26  ;;  %v3636_v18 = vand.u32 2147483647, %v3611_v26  ;;  %vm7971_vm0 = vmor %vm3680_vm14, %vm3681_vm11 }
 0x98d   :  { %v3677_v3 = vsub.f32 1.0, %v3676_v32  ;;  %4522 = vtanh.f32 %v3573_v21  ;;  %vm3632_vm9 = vweird.f32 %v3611_v26  ;;  %vm3666_vm13 = vweird.f32 %v7946_v36 }
 0x98e   :  { %v3662_v15 = vsub.f32 1.0, %v3661_v17  ;;  %4524 = vtanh.f32 %v3599_v5  ;;  %v3639_v24 = vor.u32 1.1754944e-38, %v3638_v27  ;;  %vm3637_vm12 = vcmp.eq.f32.partialorder %v3636_v18, 8.507059e+37  ;;  %vm7983_vm3 = vmor %vm3665_vm15, %vm3666_vm13 }
 0x98f   :  { %v3678_v14 = vmul.f32 %v7944_v35, %v3677_v3 }
 0x990   :  { %v3663_v4 = vmul.f32 %v7946_v36, %v3662_v15 }
 0x991   :  { %v3679_v44 = vadd.f32 %v7944_v35, %v3678_v14 }
 0x992   :  { %v4521_v38 = vpop.eup %4520  ;;  %v3664_v31 = vadd.f32 %v7946_v36, %v3663_v4 }
 0x993   :  { %v3628_v50 = vmul.f32 %v4521_v38, %v3611_v26  ;;  %vm3633_vm8 = vweird.f32 %v4521_v38  ;;  %v4523_v58 = vpop.eup %4522  ;;  %v3683_v39 = vsel %vm7971_vm0, %v7944_v35, %v3679_v44 }
 0x994   :  { %vm3634_vm10 = vmor %vm3632_vm9, %vm3633_vm8  ;;  %v4525_v33 = vpop.eup %4524  ;;  %v3648_v25 = vmul.f32 %v4523_v58, %v3625_v13  ;;  %v3668_v40 = vsel %vm7983_vm3, %v7946_v36, %v3664_v31  ;;  %v3688_v42 = vsel %vm3685_vm4, %v3687_v7, %v3683_v39 }
 0x995   :  { %v3629_v47 = vsub.f32 1.0, %v3628_v50  ;;  %v3673_v29 = vsel %vm3670_vm1, %v3672_v12, %v3668_v40 }
 0x996   :  { %v3650_v56 = vadd.f32 %v3648_v25, %v3644_v6 }
 0x997   :  { %v3630_v16 = vmul.f32 %v4521_v38, %v3629_v47 }
 0x998   :  { %v3690_v51 = vmul.f32 %v3673_v29, %v3650_v56 }
 0x999   :  { %v3631_v53 = vadd.f32 %v4521_v38, %v3630_v16 }
 0x99b   :  { %v3635_v1 = vsel %vm3634_vm10, %v4521_v38, %v3631_v53 }
 0x99c   :  { %v3640_v63 = vsel %vm3637_vm12, %v3639_v24, %v3635_v1 }
 0x99d   :  { %v3643_v28 = vsub.f32 1.0, %v3640_v63  ;;  %v3649_v30 = vmul.f32 %v4525_v33, %v3640_v63 }
 0x99f   :  { %v3645_v34 = vmul.f32 %v4550_v60, %v3643_v28 }
 0x9a1   :  { %v3651_v22 = vadd.f32 %v3649_v30, %v3645_v34 }
 0x9a3   :  { %v3691_v49 = vmul.f32 %v3688_v42, %v3651_v22  ;;  %v3701_v57 = vrot.slane %v3651_v22, 4 }
 0x9a5   :  { %v3694_v54 = vrot.slane %v3691_v49, 4  ;;  %v3702_v59 = vsel %vm1941_vm5, %v3650_v56, %v3701_v57 }
 0x9a6   :  { %3705 = vst [vmem:[#allocation4 + $0x8] sm:$0xff] %v3702_v59 }
 0x9a7   :  { %v3695_v23 = vsel %vm1941_vm5, %v3690_v51, %v3694_v54  ;;  %3731 = dma.vmem_to_hbm [thread:$0]  %s3724_s27, 256, %s3726_s30, [#allocation5], %s4606_s6, %s4606_s6, %s4607_s12  }
 0x9a8   :  { %3698 = vst [vmem:[#allocation2 + $0x8] sm:$0xff] %v3695_v23 }
 0x9a9   :  { %3718 = dma.vmem_to_hbm [thread:$0]  %s3711_s8, 256, %s3713_s11, [#allocation3], %s4606_s6, %s4606_s6, %s4607_s12  }
 0x9aa   :  { %4599 = dma.done.wait [#allocation3], 256  }
 0x9ab   :  { %4600 = vsyncadd [#allocation3], 4294967040 }
 0x9ac   :  { %4601 = dma.done.wait [#allocation5], 256  }
 0x9ad   :  { %4602 = vsyncadd [#allocation5], 4294967040 }
 0x9ae   :  { %3740 = vsyncpa [#allocation3], 1 }
 0x9af   :  { %3741 = vsyncpa [#allocation5], 1 }

</bundles_post_ra>
